<compile_context>
chip_gen: v5e
topology: v5e:2x2
jax: 0.10.0
libtpu: 0.0.40
codegen_flags: <defaults>
</compile_context>

<pallas_src>
import functools

import jax
import jax.numpy as jnp
from jax.experimental import pallas as pl
from jax.experimental.pallas import tpu as pltpu


_NEG = -1e30                    # additive mask value; exp() underflows to 0.0
_VMEM_LIMIT = 48 * 1024 * 1024  # explicit budget: below v7x's 64 MiB per-TC VMEM


# ============================================================================
# Pallas kernels
# ============================================================================
def _in_proj_kernel(x_ref, w_ref, b_ref, pe_ref, o_ref):
    """Fused `mlp_in` linear + sinusoidal positional-encoding add.

    x_ref:  (1, N, slot_dim)  one batch element (N = T*S tokens)
    w_ref:  (slot_dim, D)     bf16, resident across the grid
    b_ref:  (1, D)            f32
    pe_ref: (N, D)            f32, PE broadcast over slots, resident
    o_ref:  (1, N, D)         f32
    """
    x = x_ref[0].astype(w_ref.dtype)
    y = jnp.dot(x, w_ref[...], preferred_element_type=jnp.float32)
    o_ref[0] = (y + b_ref[...] + pe_ref[...]).astype(o_ref.dtype)


def _out_proj_kernel(x_ref, w_ref, b_ref, o_ref):
    """`mlp_out` linear.  x_ref: (1, N, D) -> o_ref: (1, N, slot_dim)."""
    x = x_ref[0].astype(w_ref.dtype)
    y = jnp.dot(x, w_ref[...], preferred_element_type=jnp.float32)
    o_ref[0] = (y + b_ref[...]).astype(o_ref.dtype)


def _layernorm_f32(x, g, b, eps):
    mu = jnp.mean(x, axis=-1, keepdims=True)
    var = jnp.mean(jnp.square(x - mu), axis=-1, keepdims=True)
    return (x - mu) * jax.lax.rsqrt(var + eps) * g + b


def _masked_attention(qh, kh, vh, add_mask, scale):
    """Scaled-dot-product attention for one head over all N tokens, with an
    additive mask restricting attention to the proper group (image or slot)."""
    s = jnp.dot(qh, kh.T, preferred_element_type=jnp.float32) * scale + add_mask
    s = s - jnp.max(s, axis=-1, keepdims=True)
    e = jnp.exp(s)
    inv = pl.reciprocal(jnp.sum(e, axis=-1, keepdims=True), approx=True)
    return jnp.dot(e * inv, vh, preferred_element_type=jnp.float32)


def _ocvp_layer_kernel(x_ref,
                       ln_att_g_ref, ln_att_b_ref,
                       obj_wq_ref, obj_wk_ref, obj_wv_ref,
                       time_wq_ref, time_wk_ref, time_wv_ref,
                       obj_mask_ref, time_mask_ref,
                       ln_mlp_g_ref, ln_mlp_b_ref,
                       mlp_w1_ref, mlp_b1_ref, mlp_w2_ref, mlp_b2_ref,
                       o_ref,
                       attn_scratch,
                       *, n_heads, head_dim, eps):
    """One fully-fused OCVPParLayer for one batch element.

    x_ref / o_ref: (1, N, D) with N = num_imgs * num_slots.
    attn_scratch:  (N, D) f32 VMEM — per-head outputs written in place.
    """
    x = x_ref[0].astype(jnp.float32)                                   # (N, D)

    # ---- ln_att ------------------------------------------------------------
    xn = _layernorm_f32(x, ln_att_g_ref[...], ln_att_b_ref[...], eps)  # (N, D)
    xn_c = xn.astype(obj_wq_ref.dtype)                                 # bf16

    # ---- q/k/v projections (bf16 weights, f32 accumulation) ----------------
    q_o = jnp.dot(xn_c, obj_wq_ref[...], preferred_element_type=jnp.float32)
    k_o = jnp.dot(xn_c, obj_wk_ref[...], preferred_element_type=jnp.float32)
    v_o = jnp.dot(xn_c, obj_wv_ref[...], preferred_element_type=jnp.float32)
    q_t = jnp.dot(xn_c, time_wq_ref[...], preferred_element_type=jnp.float32)
    k_t = jnp.dot(xn_c, time_wk_ref[...], preferred_element_type=jnp.float32)
    v_t = jnp.dot(xn_c, time_wv_ref[...], preferred_element_type=jnp.float32)

    obj_mask = obj_mask_ref[...]                                       # (N, N)
    time_mask = time_mask_ref[...]
    scale = 1.0 / (head_dim ** 0.5)

    # ---- both attentions per head, written directly into scratch -----------
    for h in range(n_heads):                       # static unroll (n_heads=4)
        sl = slice(h * head_dim, (h + 1) * head_dim)
        o_h = _masked_attention(q_o[:, sl], k_o[:, sl], v_o[:, sl],
                                obj_mask, scale)
        t_h = _masked_attention(q_t[:, sl], k_t[:, sl], v_t[:, sl],
                                time_mask, scale)
        attn_scratch[:, sl] = 0.5 * (o_h + t_h)

    # residual is w.r.t. the LayerNorm'ed input (matches the PyTorch module,
    # where `inputs` is rebound to `ln_att(inputs)` before the residual add).
    y = attn_scratch[...] + xn                                         # (N, D)

    # ---- ln_mlp + MLP -------------------------------------------------------
    z = _layernorm_f32(y, ln_mlp_g_ref[...], ln_mlp_b_ref[...], eps)
    h1 = jnp.dot(z.astype(mlp_w1_ref.dtype), mlp_w1_ref[...],
                 preferred_element_type=jnp.float32) + mlp_b1_ref[...]
    # TODO(synk): PyTorch nn.GELU default is exact erf GELU; tanh approximation
    # is used here for guaranteed Mosaic lowering.
    h1 = jax.nn.gelu(h1, approximate=True)
    out = jnp.dot(h1.astype(mlp_w2_ref.dtype), mlp_w2_ref[...],
                  preferred_element_type=jnp.float32) + mlp_b2_ref[...]

    o_ref[0] = (out + y).astype(o_ref.dtype)


# ============================================================================
# pallas_call wrappers
# ============================================================================
def _const2d(shape):
    """Whole-array block with a constant index_map (resident across the grid)."""
    return pl.BlockSpec(shape, lambda b: (0, 0))


def input_projection(x_flat, w, b, pe_tok):
    """x_flat: (B, N, slot_dim) -> (B, N, D), fused linear + PE add."""
    B, N, slot_dim = x_flat.shape
    D = w.shape[1]
    return pl.pallas_call(
        _in_proj_kernel,
        out_shape=jax.ShapeDtypeStruct((B, N, D), jnp.float32),
        grid=(B,),
        in_specs=[
            pl.BlockSpec((1, N, slot_dim), lambda bb: (bb, 0, 0)),
            _const2d((slot_dim, D)),
            _const2d((1, D)),
            _const2d((N, D)),
        ],
        out_specs=pl.BlockSpec((1, N, D), lambda bb: (bb, 0, 0)),
        compiler_params=pltpu.CompilerParams(
            dimension_semantics=("parallel",),
            vmem_limit_bytes=_VMEM_LIMIT),
    )(x_flat, w, b, pe_tok)


def output_projection(tok, w, b):
    """tok: (B, N, D) -> (B, N, slot_dim)."""
    B, N, D = tok.shape
    slot_dim = w.shape[1]
    return pl.pallas_call(
        _out_proj_kernel,
        out_shape=jax.ShapeDtypeStruct((B, N, slot_dim), jnp.float32),
        grid=(B,),
        in_specs=[
            pl.BlockSpec((1, N, D), lambda bb: (bb, 0, 0)),
            _const2d((D, slot_dim)),
            _const2d((1, slot_dim)),
        ],
        out_specs=pl.BlockSpec((1, N, slot_dim), lambda bb: (bb, 0, 0)),
        compiler_params=pltpu.CompilerParams(
            dimension_semantics=("parallel",),
            vmem_limit_bytes=_VMEM_LIMIT),
    )(tok, w, b)


def ocvp_par_layer(tok, lp, obj_mask, time_mask, n_heads, eps=1e-6):
    """One fused OCVPParLayer.  tok: (B, N, D)."""
    B, N, D = tok.shape
    H = lp["mlp_w1"].shape[1]
    head_dim = D // n_heads
    kern = functools.partial(_ocvp_layer_kernel, n_heads=n_heads,
                             head_dim=head_dim, eps=eps)
    # NOTE: for much larger B*T*S this kernel should additionally tile N; at
    # the shapes this module is used with, one (N, D) block per batch element
    # fits comfortably in VMEM on all generations (incl. v7x's 64 MiB).
    return pl.pallas_call(
        kern,
        out_shape=jax.ShapeDtypeStruct((B, N, D), tok.dtype),
        grid=(B,),
        in_specs=[
            pl.BlockSpec((1, N, D), lambda bb: (bb, 0, 0)),
            _const2d((1, D)), _const2d((1, D)),                   # ln_att
            _const2d((D, D)), _const2d((D, D)), _const2d((D, D)),  # obj qkv
            _const2d((D, D)), _const2d((D, D)), _const2d((D, D)),  # time qkv
            _const2d((N, N)), _const2d((N, N)),                   # masks
            _const2d((1, D)), _const2d((1, D)),                   # ln_mlp
            _const2d((D, H)), _const2d((1, H)),                   # mlp w1/b1
            _const2d((H, D)), _const2d((1, D)),                   # mlp w2/b2
        ],
        out_specs=pl.BlockSpec((1, N, D), lambda bb: (bb, 0, 0)),
        scratch_shapes=[pltpu.VMEM((N, D), jnp.float32)],
        compiler_params=pltpu.CompilerParams(
            dimension_semantics=("parallel",),
            vmem_limit_bytes=_VMEM_LIMIT),
    )(tok, lp["ln_att_g"], lp["ln_att_b"],
      lp["obj_wq"], lp["obj_wk"], lp["obj_wv"],
      lp["time_wq"], lp["time_wk"], lp["time_wv"],
      obj_mask, time_mask,
      lp["ln_mlp_g"], lp["ln_mlp_b"],
      lp["mlp_w1"], lp["mlp_b1"], lp["mlp_w2"], lp["mlp_b2"])


# ============================================================================
# Model glue (plain JAX): PE table, masks, layer loop.
# ============================================================================
def sinusoidal_pe(max_len, d_model):
    pos = jnp.arange(max_len, dtype=jnp.float32)[:, None]
    div = jnp.exp(jnp.arange(0, d_model, 2, dtype=jnp.float32)
                  * (-jnp.log(10000.0) / d_model))
    pe = jnp.zeros((max_len, d_model), jnp.float32)
    pe = pe.at[:, 0::2].set(jnp.sin(pos * div))
    pe = pe.at[:, 1::2].set(jnp.cos(pos * div))
    return pe


def build_attention_masks(T, S):
    """Additive masks over flattened tokens (row index = t*S + s).

    obj_mask : token i may attend to token j iff same image (t_i == t_j)
    time_mask: token i may attend to token j iff same slot  (s_i == s_j)
    """
    idx = jnp.arange(T * S)
    t_idx, s_idx = idx // S, idx % S
    obj_mask = jnp.where(t_idx[:, None] == t_idx[None, :], 0.0, _NEG)
    time_mask = jnp.where(s_idx[:, None] == s_idx[None, :], 0.0, _NEG)
    return obj_mask.astype(jnp.float32), time_mask.astype(jnp.float32)


def ocvp_par_forward(x, params, n_heads, residual=False):
    """OCVPPar forward.  x: (B, num_imgs, num_slots, slot_dim)."""
    B, T, S, slot_dim = x.shape
    D = params["mlp_in_w"].shape[1]
    N = T * S

    x_flat = x.reshape(B, N, slot_dim)

    # mlp_in + SlotPositionalEncoding (PE over time, broadcast over slots;
    # dropout is identity at eval time) — fused in one kernel.
    pe_tok = jnp.broadcast_to(params["pe"][:T, None, :], (T, S, D)).reshape(N, D)
    tok = input_projection(x_flat, params["mlp_in_w"], params["mlp_in_b"], pe_tok)

    obj_mask, time_mask = build_attention_masks(T, S)
    for lp in params["layers"]:
        tok = ocvp_par_layer(tok, lp, obj_mask, time_mask, n_heads)

    out = output_projection(tok, params["mlp_out_w"], params["mlp_out_b"])
    out = out.reshape(B, T, S, slot_dim)
    return out + x if residual else out


def init_params(key, slot_dim, token_dim, hidden_dim, num_layers, max_len,
                param_dtype=jnp.bfloat16):
    """Matmul weights stored in bf16 (halves HBM/VMEM traffic on v6e/v7x);
    biases / LayerNorm parameters / PE kept in f32."""
    def dense(k, din, dout, scale=0.02):
        return (scale * jax.random.normal(k, (din, dout), dtype=jnp.float32)
                ).astype(param_dtype)

    keys = iter(jax.random.split(key, 2 + num_layers * 8))
    params = {
        "mlp_in_w": dense(next(keys), slot_dim, token_dim),
        "mlp_in_b": jnp.zeros((1, token_dim), jnp.float32),
        "mlp_out_w": dense(next(keys), token_dim, slot_dim),
        "mlp_out_b": jnp.zeros((1, slot_dim), jnp.float32),
        "pe": sinusoidal_pe(max_len, token_dim),
        "layers": [],
    }
    for _ in range(num_layers):
        lp = {
            "ln_att_g": jnp.ones((1, token_dim), jnp.float32),
            "ln_att_b": jnp.zeros((1, token_dim), jnp.float32),
            "ln_mlp_g": jnp.ones((1, token_dim), jnp.float32),
            "ln_mlp_b": jnp.zeros((1, token_dim), jnp.float32),
            "obj_wq": dense(next(keys), token_dim, token_dim),
            "obj_wk": dense(next(keys), token_dim, token_dim),
            "obj_wv": dense(next(keys), token_dim, token_dim),
            "time_wq": dense(next(keys), token_dim, token_dim),
            "time_wk": dense(next(keys), token_dim, token_dim),
            "time_wv": dense(next(keys), token_dim, token_dim),
            "mlp_w1": dense(next(keys), token_dim, hidden_dim),
            "mlp_b1": jnp.zeros((1, hidden_dim), jnp.float32),
            "mlp_w2": dense(next(keys), hidden_dim, token_dim),
            "mlp_b2": jnp.zeros((1, token_dim), jnp.float32),
        }
        params["layers"].append(lp)
    return params


if __name__ == "__main__":
    # Small shapes consistent with the module: (B, num_imgs, num_slots, slot_dim)
    B, T, S = 2, 4, 6
    slot_dim, token_dim, hidden_dim = 32, 64, 128
    n_heads, num_layers, input_buffer_size = 4, 2, 5

    key = jax.random.PRNGKey(0)
    kx, kp = jax.random.split(key)
    x = jax.random.normal(kx, (B, T, S, slot_dim), dtype=jnp.float32)
    params = init_params(kp, slot_dim, token_dim, hidden_dim, num_layers,
                         input_buffer_size)

    fwd = jax.jit(functools.partial(ocvp_par_forward, n_heads=n_heads,
                                    residual=False))
    out = fwd(x, params)
    out = jax.block_until_ready(out)
    assert out.shape == (B, T, S, slot_dim), out.shape
    assert bool(jnp.all(jnp.isfinite(out)))
    print("KERNEL_OK")
</pallas_src>

<mosaic_0001>
module attributes {stable_mosaic.version = 11 : i64} {
  func.func @_in_proj_kernel(%arg0: i32, %arg1: memref<1x24x32xf32, #tpu.memory_space<vmem>>, %arg2: memref<32x64xbf16, #tpu.memory_space<vmem>>, %arg3: memref<1x64xf32, #tpu.memory_space<vmem>>, %arg4: memref<24x64xf32, #tpu.memory_space<vmem>>, %arg5: memref<1x24x64xf32, #tpu.memory_space<vmem>>) attributes {dimension_semantics = [#tpu.dimension_semantics<parallel>], iteration_bounds = array<i64: 2>, scalar_prefetch = 0 : i64, scratch_operands = 0 : i64, tpu.core_type = #tpu.core_type<tc>, window_params = [{transform_indices = @transform_0, window_bounds = array<i64: 1, 24, 32>}, {pipeline_mode = #tpu.pipeline_mode<synchronous>, transform_indices = @transform_1, window_bounds = array<i64: 32, 64>}, {pipeline_mode = #tpu.pipeline_mode<synchronous>, transform_indices = @transform_2, window_bounds = array<i64: 1, 64>}, {pipeline_mode = #tpu.pipeline_mode<synchronous>, transform_indices = @transform_3, window_bounds = array<i64: 24, 64>}, {transform_indices = @transform_4, window_bounds = array<i64: 1, 24, 64>}]} {
    %c0 = arith.constant 0 : index
    %c0_0 = arith.constant 0 : index
    %c0_1 = arith.constant 0 : index
    %0 = vector.load %arg1[%c0, %c0_0, %c0_1] : memref<1x24x32xf32, #tpu.memory_space<vmem>>, vector<1x24x32xf32>
    %1 = vector.shape_cast %0 : vector<1x24x32xf32> to vector<24x32xf32>
    %2 = arith.truncf %1 : vector<24x32xf32> to vector<24x32xbf16>
    %c0_2 = arith.constant 0 : index
    %c0_3 = arith.constant 0 : index
    %3 = vector.load %arg2[%c0_2, %c0_3] : memref<32x64xbf16, #tpu.memory_space<vmem>>, vector<32x64xbf16>
    %cst = arith.constant dense<0.000000e+00> : vector<24x64xf32>
    %4 = tpu.matmul %2, %3, %cst {dimension_numbers = #tpu.dot_dimension_numbers<[1], [0], [0], [1], [0, 0, 1, 1], [], []>} : vector<24x32xbf16>, vector<32x64xbf16>, vector<24x64xf32> -> vector<24x64xf32>
    %c0_4 = arith.constant 0 : index
    %c0_5 = arith.constant 0 : index
    %5 = vector.load %arg3[%c0_4, %c0_5] : memref<1x64xf32, #tpu.memory_space<vmem>>, vector<1x64xf32>
    %6 = vector.broadcast %5 : vector<1x64xf32> to vector<24x64xf32>
    %7 = arith.addf %4, %6 : vector<24x64xf32>
    %c0_6 = arith.constant 0 : index
    %c0_7 = arith.constant 0 : index
    %8 = vector.load %arg4[%c0_6, %c0_7] : memref<24x64xf32, #tpu.memory_space<vmem>>, vector<24x64xf32>
    %9 = arith.addf %7, %8 : vector<24x64xf32>
    %c0_8 = arith.constant 0 : index
    %c0_9 = arith.constant 0 : index
    %c0_10 = arith.constant 0 : index
    %10 = vector.load %arg5[%c0_8, %c0_9, %c0_10] : memref<1x24x64xf32, #tpu.memory_space<vmem>>, vector<1x24x64xf32>
    %11 = vector.shape_cast %10 : vector<1x24x64xf32> to vector<24x64xf32>
    %12 = vector.shape_cast %9 : vector<24x64xf32> to vector<1x24x64xf32>
    tpu.vector_store %arg5[%c0_8, %c0_9, %c0_10], %12 {strides = array<i32>} : memref<1x24x64xf32, #tpu.memory_space<vmem>>, vector<1x24x64xf32>,
    return
  }
  func.func @transform_0(%arg0: i32) -> (i32, i32, i32) {
    %c0_i32 = arith.constant 0 : i32
    %c0_i32_0 = arith.constant 0 : i32
    %c0_i32_1 = arith.constant 0 : i32
    return %arg0, %c0_i32, %c0_i32_0 : i32, i32, i32
  }
  func.func @transform_1(%arg0: i32) -> (i32, i32) {
    %c0_i32 = arith.constant 0 : i32
    %c0_i32_0 = arith.constant 0 : i32
    %c0_i32_1 = arith.constant 0 : i32
    return %c0_i32, %c0_i32_0 : i32, i32
  }
  func.func @transform_2(%arg0: i32) -> (i32, i32) {
    %c0_i32 = arith.constant 0 : i32
    %c0_i32_0 = arith.constant 0 : i32
    %c0_i32_1 = arith.constant 0 : i32
    return %c0_i32, %c0_i32_0 : i32, i32
  }
  func.func @transform_3(%arg0: i32) -> (i32, i32) {
    %c0_i32 = arith.constant 0 : i32
    %c0_i32_0 = arith.constant 0 : i32
    %c0_i32_1 = arith.constant 0 : i32
    return %c0_i32, %c0_i32_0 : i32, i32
  }
  func.func @transform_4(%arg0: i32) -> (i32, i32, i32) {
    %c0_i32 = arith.constant 0 : i32
    %c0_i32_0 = arith.constant 0 : i32
    %c0_i32_1 = arith.constant 0 : i32
    return %arg0, %c0_i32, %c0_i32_0 : i32, i32, i32
  }
}

module attributes {stable_mosaic.version = 11 : i64} {
  func.func @_ocvp_layer_kernel(%arg0: i32, %arg1: memref<1x24x64xf32, #tpu.memory_space<vmem>>, %arg2: memref<1x64xf32, #tpu.memory_space<vmem>>, %arg3: memref<1x64xf32, #tpu.memory_space<vmem>>, %arg4: memref<64x64xbf16, #tpu.memory_space<vmem>>, %arg5: memref<64x64xbf16, #tpu.memory_space<vmem>>, %arg6: memref<64x64xbf16, #tpu.memory_space<vmem>>, %arg7: memref<64x64xbf16, #tpu.memory_space<vmem>>, %arg8: memref<64x64xbf16, #tpu.memory_space<vmem>>, %arg9: memref<64x64xbf16, #tpu.memory_space<vmem>>, %arg10: memref<24x24xf32, #tpu.memory_space<vmem>>, %arg11: memref<24x24xf32, #tpu.memory_space<vmem>>, %arg12: memref<1x64xf32, #tpu.memory_space<vmem>>, %arg13: memref<1x64xf32, #tpu.memory_space<vmem>>, %arg14: memref<64x128xbf16, #tpu.memory_space<vmem>>, %arg15: memref<1x128xf32, #tpu.memory_space<vmem>>, %arg16: memref<128x64xbf16, #tpu.memory_space<vmem>>, %arg17: memref<1x64xf32, #tpu.memory_space<vmem>>, %arg18: memref<1x24x64xf32, #tpu.memory_space<vmem>>, %arg19: memref<24x64xf32, #tpu.memory_space<vmem>>) attributes {dimension_semantics = [#tpu.dimension_semantics<parallel>], iteration_bounds = array<i64: 2>, scalar_prefetch = 0 : i64, scratch_operands = 1 : i64, tpu.core_type = #tpu.core_type<tc>, window_params = [{transform_indices = @transform_0, window_bounds = array<i64: 1, 24, 64>}, {pipeline_mode = #tpu.pipeline_mode<synchronous>, transform_indices = @transform_1, window_bounds = array<i64: 1, 64>}, {pipeline_mode = #tpu.pipeline_mode<synchronous>, transform_indices = @transform_2, window_bounds = array<i64: 1, 64>}, {pipeline_mode = #tpu.pipeline_mode<synchronous>, transform_indices = @transform_3, window_bounds = array<i64: 64, 64>}, {pipeline_mode = #tpu.pipeline_mode<synchronous>, transform_indices = @transform_4, window_bounds = array<i64: 64, 64>}, {pipeline_mode = #tpu.pipeline_mode<synchronous>, transform_indices = @transform_5, window_bounds = array<i64: 64, 64>}, {pipeline_mode = #tpu.pipeline_mode<synchronous>, transform_indices = @transform_6, window_bounds = array<i64: 64, 64>}, {pipeline_mode = #tpu.pipeline_mode<synchronous>, transform_indices = @transform_7, window_bounds = array<i64: 64, 64>}, {pipeline_mode = #tpu.pipeline_mode<synchronous>, transform_indices = @transform_8, window_bounds = array<i64: 64, 64>}, {pipeline_mode = #tpu.pipeline_mode<synchronous>, transform_indices = @transform_9, window_bounds = array<i64: 24, 24>}, {pipeline_mode = #tpu.pipeline_mode<synchronous>, transform_indices = @transform_10, window_bounds = array<i64: 24, 24>}, {pipeline_mode = #tpu.pipeline_mode<synchronous>, transform_indices = @transform_11, window_bounds = array<i64: 1, 64>}, {pipeline_mode = #tpu.pipeline_mode<synchronous>, transform_indices = @transform_12, window_bounds = array<i64: 1, 64>}, {pipeline_mode = #tpu.pipeline_mode<synchronous>, transform_indices = @transform_13, window_bounds = array<i64: 64, 128>}, {pipeline_mode = #tpu.pipeline_mode<synchronous>, transform_indices = @transform_14, window_bounds = array<i64: 1, 128>}, {pipeline_mode = #tpu.pipeline_mode<synchronous>, transform_indices = @transform_15, window_bounds = array<i64: 128, 64>}, {pipeline_mode = #tpu.pipeline_mode<synchronous>, transform_indices = @transform_16, window_bounds = array<i64: 1, 64>}, {transform_indices = @transform_17, window_bounds = array<i64: 1, 24, 64>}]} {
    %c0 = arith.constant 0 : index
    %c0_0 = arith.constant 0 : index
    %c0_1 = arith.constant 0 : index
    %0 = vector.load %arg1[%c0, %c0_0, %c0_1] : memref<1x24x64xf32, #tpu.memory_space<vmem>>, vector<1x24x64xf32>
    %1 = vector.shape_cast %0 : vector<1x24x64xf32> to vector<24x64xf32>
    %c0_2 = arith.constant 0 : index
    %c0_3 = arith.constant 0 : index
    %2 = vector.load %arg2[%c0_2, %c0_3] : memref<1x64xf32, #tpu.memory_space<vmem>>, vector<1x64xf32>
    %c0_4 = arith.constant 0 : index
    %c0_5 = arith.constant 0 : index
    %3 = vector.load %arg3[%c0_4, %c0_5] : memref<1x64xf32, #tpu.memory_space<vmem>>, vector<1x64xf32>
    %cst = arith.constant dense<0.000000e+00> : vector<24xf32>
    %4 = vector.multi_reduction <add>, %1, %cst [1] : vector<24x64xf32> to vector<24xf32>
    %5 = vector.shape_cast %4 : vector<24xf32> to vector<24x1xf32>
    %cst_6 = arith.constant 6.400000e+01 : f32
    %6 = vector.broadcast %cst_6 : f32 to vector<24x1xf32>
    %7 = arith.divf %5, %6 : vector<24x1xf32>
    %8 = vector.broadcast %7 : vector<24x1xf32> to vector<24x64xf32>
    %9 = arith.subf %1, %8 : vector<24x64xf32>
    %10 = arith.mulf %9, %9 : vector<24x64xf32>
    %cst_7 = arith.constant dense<0.000000e+00> : vector<24xf32>
    %11 = vector.multi_reduction <add>, %10, %cst_7 [1] : vector<24x64xf32> to vector<24xf32>
    %12 = vector.shape_cast %11 : vector<24xf32> to vector<24x1xf32>
    %cst_8 = arith.constant 6.400000e+01 : f32
    %13 = vector.broadcast %cst_8 : f32 to vector<24x1xf32>
    %14 = arith.divf %12, %13 : vector<24x1xf32>
    %15 = vector.broadcast %7 : vector<24x1xf32> to vector<24x64xf32>
    %16 = arith.subf %1, %15 : vector<24x64xf32>
    %cst_9 = arith.constant 9.99999997E-7 : f32
    %17 = vector.broadcast %cst_9 : f32 to vector<24x1xf32>
    %18 = arith.addf %14, %17 : vector<24x1xf32>
    %19 = math.rsqrt %18 : vector<24x1xf32>
    %20 = vector.broadcast %19 : vector<24x1xf32> to vector<24x64xf32>
    %21 = arith.mulf %16, %20 : vector<24x64xf32>
    %22 = vector.broadcast %2 : vector<1x64xf32> to vector<24x64xf32>
    %23 = arith.mulf %21, %22 : vector<24x64xf32>
    %24 = vector.broadcast %3 : vector<1x64xf32> to vector<24x64xf32>
    %25 = arith.addf %23, %24 : vector<24x64xf32>
    %26 = arith.truncf %25 : vector<24x64xf32> to vector<24x64xbf16>
    %c0_10 = arith.constant 0 : index
    %c0_11 = arith.constant 0 : index
    %27 = vector.load %arg4[%c0_10, %c0_11] : memref<64x64xbf16, #tpu.memory_space<vmem>>, vector<64x64xbf16>
    %cst_12 = arith.constant dense<0.000000e+00> : vector<24x64xf32>
    %28 = tpu.matmul %26, %27, %cst_12 {dimension_numbers = #tpu.dot_dimension_numbers<[1], [0], [0], [1], [0, 0, 1, 1], [], []>} : vector<24x64xbf16>, vector<64x64xbf16>, vector<24x64xf32> -> vector<24x64xf32>
    %c0_13 = arith.constant 0 : index
    %c0_14 = arith.constant 0 : index
    %29 = vector.load %arg5[%c0_13, %c0_14] : memref<64x64xbf16, #tpu.memory_space<vmem>>, vector<64x64xbf16>
    %cst_15 = arith.constant dense<0.000000e+00> : vector<24x64xf32>
    %30 = tpu.matmul %26, %29, %cst_15 {dimension_numbers = #tpu.dot_dimension_numbers<[1], [0], [0], [1], [0, 0, 1, 1], [], []>} : vector<24x64xbf16>, vector<64x64xbf16>, vector<24x64xf32> -> vector<24x64xf32>
    %c0_16 = arith.constant 0 : index
    %c0_17 = arith.constant 0 : index
    %31 = vector.load %arg6[%c0_16, %c0_17] : memref<64x64xbf16, #tpu.memory_space<vmem>>, vector<64x64xbf16>
    %cst_18 = arith.constant dense<0.000000e+00> : vector<24x64xf32>
    %32 = tpu.matmul %26, %31, %cst_18 {dimension_numbers = #tpu.dot_dimension_numbers<[1], [0], [0], [1], [0, 0, 1, 1], [], []>} : vector<24x64xbf16>, vector<64x64xbf16>, vector<24x64xf32> -> vector<24x64xf32>
    %c0_19 = arith.constant 0 : index
    %c0_20 = arith.constant 0 : index
    %33 = vector.load %arg7[%c0_19, %c0_20] : memref<64x64xbf16, #tpu.memory_space<vmem>>, vector<64x64xbf16>
    %cst_21 = arith.constant dense<0.000000e+00> : vector<24x64xf32>
    %34 = tpu.matmul %26, %33, %cst_21 {dimension_numbers = #tpu.dot_dimension_numbers<[1], [0], [0], [1], [0, 0, 1, 1], [], []>} : vector<24x64xbf16>, vector<64x64xbf16>, vector<24x64xf32> -> vector<24x64xf32>
    %c0_22 = arith.constant 0 : index
    %c0_23 = arith.constant 0 : index
    %35 = vector.load %arg8[%c0_22, %c0_23] : memref<64x64xbf16, #tpu.memory_space<vmem>>, vector<64x64xbf16>
    %cst_24 = arith.constant dense<0.000000e+00> : vector<24x64xf32>
    %36 = tpu.matmul %26, %35, %cst_24 {dimension_numbers = #tpu.dot_dimension_numbers<[1], [0], [0], [1], [0, 0, 1, 1], [], []>} : vector<24x64xbf16>, vector<64x64xbf16>, vector<24x64xf32> -> vector<24x64xf32>
    %c0_25 = arith.constant 0 : index
    %c0_26 = arith.constant 0 : index
    %37 = vector.load %arg9[%c0_25, %c0_26] : memref<64x64xbf16, #tpu.memory_space<vmem>>, vector<64x64xbf16>
    %cst_27 = arith.constant dense<0.000000e+00> : vector<24x64xf32>
    %38 = tpu.matmul %26, %37, %cst_27 {dimension_numbers = #tpu.dot_dimension_numbers<[1], [0], [0], [1], [0, 0, 1, 1], [], []>} : vector<24x64xbf16>, vector<64x64xbf16>, vector<24x64xf32> -> vector<24x64xf32>
    %c0_28 = arith.constant 0 : index
    %c0_29 = arith.constant 0 : index
    %39 = vector.load %arg10[%c0_28, %c0_29] : memref<24x24xf32, #tpu.memory_space<vmem>>, vector<24x24xf32>
    %c0_30 = arith.constant 0 : index
    %c0_31 = arith.constant 0 : index
    %40 = vector.load %arg11[%c0_30, %c0_31] : memref<24x24xf32, #tpu.memory_space<vmem>>, vector<24x24xf32>
    %41 = vector.extract_strided_slice %28 {offsets = [0, 0], sizes = [24, 16], strides = [1, 1]} : vector<24x64xf32> to vector<24x16xf32>
    %42 = vector.extract_strided_slice %30 {offsets = [0, 0], sizes = [24, 16], strides = [1, 1]} : vector<24x64xf32> to vector<24x16xf32>
    %43 = vector.extract_strided_slice %32 {offsets = [0, 0], sizes = [24, 16], strides = [1, 1]} : vector<24x64xf32> to vector<24x16xf32>
    %44 = tpu.transpose %42, [1, 0] : vector<24x16xf32> -> vector<16x24xf32>
    %cst_32 = arith.constant dense<0.000000e+00> : vector<24x24xf32>
    %45 = tpu.matmul %41, %44, %cst_32 {dimension_numbers = #tpu.dot_dimension_numbers<[1], [0], [0], [1], [0, 0, 1, 1], [], []>} : vector<24x16xf32>, vector<16x24xf32>, vector<24x24xf32> -> vector<24x24xf32>
    %cst_33 = arith.constant 2.500000e-01 : f32
    %46 = vector.broadcast %cst_33 : f32 to vector<24x24xf32>
    %47 = arith.mulf %45, %46 : vector<24x24xf32>
    %48 = arith.addf %47, %39 : vector<24x24xf32>
    %cst_34 = arith.constant dense<0xFF800000> : vector<24xf32>
    %49 = vector.multi_reduction <maximumf>, %48, %cst_34 [1] : vector<24x24xf32> to vector<24xf32>
    %50 = vector.shape_cast %49 : vector<24xf32> to vector<24x1xf32>
    %51 = vector.broadcast %50 : vector<24x1xf32> to vector<24x24xf32>
    %52 = arith.subf %48, %51 : vector<24x24xf32>
    %53 = math.exp %52 : vector<24x24xf32>
    %cst_35 = arith.constant dense<0.000000e+00> : vector<24xf32>
    %54 = vector.multi_reduction <add>, %53, %cst_35 [1] : vector<24x24xf32> to vector<24xf32>
    %55 = vector.shape_cast %54 : vector<24xf32> to vector<24x1xf32>
    %56 = tpu.reciprocal %55 {approx = true} : vector<24x1xf32> -> vector<24x1xf32>
    %57 = vector.broadcast %56 : vector<24x1xf32> to vector<24x24xf32>
    %58 = arith.mulf %53, %57 : vector<24x24xf32>
    %cst_36 = arith.constant dense<0.000000e+00> : vector<24x16xf32>
    %59 = tpu.matmul %58, %43, %cst_36 {dimension_numbers = #tpu.dot_dimension_numbers<[1], [0], [0], [1], [0, 0, 1, 1], [], []>} : vector<24x24xf32>, vector<24x16xf32>, vector<24x16xf32> -> vector<24x16xf32>
    %60 = vector.extract_strided_slice %34 {offsets = [0, 0], sizes = [24, 16], strides = [1, 1]} : vector<24x64xf32> to vector<24x16xf32>
    %61 = vector.extract_strided_slice %36 {offsets = [0, 0], sizes = [24, 16], strides = [1, 1]} : vector<24x64xf32> to vector<24x16xf32>
    %62 = vector.extract_strided_slice %38 {offsets = [0, 0], sizes = [24, 16], strides = [1, 1]} : vector<24x64xf32> to vector<24x16xf32>
    %63 = tpu.transpose %61, [1, 0] : vector<24x16xf32> -> vector<16x24xf32>
    %cst_37 = arith.constant dense<0.000000e+00> : vector<24x24xf32>
    %64 = tpu.matmul %60, %63, %cst_37 {dimension_numbers = #tpu.dot_dimension_numbers<[1], [0], [0], [1], [0, 0, 1, 1], [], []>} : vector<24x16xf32>, vector<16x24xf32>, vector<24x24xf32> -> vector<24x24xf32>
    %cst_38 = arith.constant 2.500000e-01 : f32
    %65 = vector.broadcast %cst_38 : f32 to vector<24x24xf32>
    %66 = arith.mulf %64, %65 : vector<24x24xf32>
    %67 = arith.addf %66, %40 : vector<24x24xf32>
    %cst_39 = arith.constant dense<0xFF800000> : vector<24xf32>
    %68 = vector.multi_reduction <maximumf>, %67, %cst_39 [1] : vector<24x24xf32> to vector<24xf32>
    %69 = vector.shape_cast %68 : vector<24xf32> to vector<24x1xf32>
    %70 = vector.broadcast %69 : vector<24x1xf32> to vector<24x24xf32>
    %71 = arith.subf %67, %70 : vector<24x24xf32>
    %72 = math.exp %71 : vector<24x24xf32>
    %cst_40 = arith.constant dense<0.000000e+00> : vector<24xf32>
    %73 = vector.multi_reduction <add>, %72, %cst_40 [1] : vector<24x24xf32> to vector<24xf32>
    %74 = vector.shape_cast %73 : vector<24xf32> to vector<24x1xf32>
    %75 = tpu.reciprocal %74 {approx = true} : vector<24x1xf32> -> vector<24x1xf32>
    %76 = vector.broadcast %75 : vector<24x1xf32> to vector<24x24xf32>
    %77 = arith.mulf %72, %76 : vector<24x24xf32>
    %cst_41 = arith.constant dense<0.000000e+00> : vector<24x16xf32>
    %78 = tpu.matmul %77, %62, %cst_41 {dimension_numbers = #tpu.dot_dimension_numbers<[1], [0], [0], [1], [0, 0, 1, 1], [], []>} : vector<24x24xf32>, vector<24x16xf32>, vector<24x16xf32> -> vector<24x16xf32>
    %79 = arith.addf %59, %78 : vector<24x16xf32>
    %cst_42 = arith.constant 5.000000e-01 : f32
    %80 = vector.broadcast %cst_42 : f32 to vector<24x16xf32>
    %81 = arith.mulf %80, %79 : vector<24x16xf32>
    %c0_43 = arith.constant 0 : index
    %c0_44 = arith.constant 0 : index
    %82 = vector.load %arg19[%c0_43, %c0_44] : memref<24x64xf32, #tpu.memory_space<vmem>>, vector<24x16xf32>
    tpu.vector_store %arg19[%c0_43, %c0_44], %81 {strides = array<i32>} : memref<24x64xf32, #tpu.memory_space<vmem>>, vector<24x16xf32>,
    %83 = vector.extract_strided_slice %28 {offsets = [0, 16], sizes = [24, 16], strides = [1, 1]} : vector<24x64xf32> to vector<24x16xf32>
    %84 = vector.extract_strided_slice %30 {offsets = [0, 16], sizes = [24, 16], strides = [1, 1]} : vector<24x64xf32> to vector<24x16xf32>
    %85 = vector.extract_strided_slice %32 {offsets = [0, 16], sizes = [24, 16], strides = [1, 1]} : vector<24x64xf32> to vector<24x16xf32>
    %86 = tpu.transpose %84, [1, 0] : vector<24x16xf32> -> vector<16x24xf32>
    %cst_45 = arith.constant dense<0.000000e+00> : vector<24x24xf32>
    %87 = tpu.matmul %83, %86, %cst_45 {dimension_numbers = #tpu.dot_dimension_numbers<[1], [0], [0], [1], [0, 0, 1, 1], [], []>} : vector<24x16xf32>, vector<16x24xf32>, vector<24x24xf32> -> vector<24x24xf32>
    %cst_46 = arith.constant 2.500000e-01 : f32
    %88 = vector.broadcast %cst_46 : f32 to vector<24x24xf32>
    %89 = arith.mulf %87, %88 : vector<24x24xf32>
    %90 = arith.addf %89, %39 : vector<24x24xf32>
    %cst_47 = arith.constant dense<0xFF800000> : vector<24xf32>
    %91 = vector.multi_reduction <maximumf>, %90, %cst_47 [1] : vector<24x24xf32> to vector<24xf32>
    %92 = vector.shape_cast %91 : vector<24xf32> to vector<24x1xf32>
    %93 = vector.broadcast %92 : vector<24x1xf32> to vector<24x24xf32>
    %94 = arith.subf %90, %93 : vector<24x24xf32>
    %95 = math.exp %94 : vector<24x24xf32>
    %cst_48 = arith.constant dense<0.000000e+00> : vector<24xf32>
    %96 = vector.multi_reduction <add>, %95, %cst_48 [1] : vector<24x24xf32> to vector<24xf32>
    %97 = vector.shape_cast %96 : vector<24xf32> to vector<24x1xf32>
    %98 = tpu.reciprocal %97 {approx = true} : vector<24x1xf32> -> vector<24x1xf32>
    %99 = vector.broadcast %98 : vector<24x1xf32> to vector<24x24xf32>
    %100 = arith.mulf %95, %99 : vector<24x24xf32>
    %cst_49 = arith.constant dense<0.000000e+00> : vector<24x16xf32>
    %101 = tpu.matmul %100, %85, %cst_49 {dimension_numbers = #tpu.dot_dimension_numbers<[1], [0], [0], [1], [0, 0, 1, 1], [], []>} : vector<24x24xf32>, vector<24x16xf32>, vector<24x16xf32> -> vector<24x16xf32>
    %102 = vector.extract_strided_slice %34 {offsets = [0, 16], sizes = [24, 16], strides = [1, 1]} : vector<24x64xf32> to vector<24x16xf32>
    %103 = vector.extract_strided_slice %36 {offsets = [0, 16], sizes = [24, 16], strides = [1, 1]} : vector<24x64xf32> to vector<24x16xf32>
    %104 = vector.extract_strided_slice %38 {offsets = [0, 16], sizes = [24, 16], strides = [1, 1]} : vector<24x64xf32> to vector<24x16xf32>
    %105 = tpu.transpose %103, [1, 0] : vector<24x16xf32> -> vector<16x24xf32>
    %cst_50 = arith.constant dense<0.000000e+00> : vector<24x24xf32>
    %106 = tpu.matmul %102, %105, %cst_50 {dimension_numbers = #tpu.dot_dimension_numbers<[1], [0], [0], [1], [0, 0, 1, 1], [], []>} : vector<24x16xf32>, vector<16x24xf32>, vector<24x24xf32> -> vector<24x24xf32>
    %cst_51 = arith.constant 2.500000e-01 : f32
    %107 = vector.broadcast %cst_51 : f32 to vector<24x24xf32>
    %108 = arith.mulf %106, %107 : vector<24x24xf32>
    %109 = arith.addf %108, %40 : vector<24x24xf32>
    %cst_52 = arith.constant dense<0xFF800000> : vector<24xf32>
    %110 = vector.multi_reduction <maximumf>, %109, %cst_52 [1] : vector<24x24xf32> to vector<24xf32>
    %111 = vector.shape_cast %110 : vector<24xf32> to vector<24x1xf32>
    %112 = vector.broadcast %111 : vector<24x1xf32> to vector<24x24xf32>
    %113 = arith.subf %109, %112 : vector<24x24xf32>
    %114 = math.exp %113 : vector<24x24xf32>
    %cst_53 = arith.constant dense<0.000000e+00> : vector<24xf32>
    %115 = vector.multi_reduction <add>, %114, %cst_53 [1] : vector<24x24xf32> to vector<24xf32>
    %116 = vector.shape_cast %115 : vector<24xf32> to vector<24x1xf32>
    %117 = tpu.reciprocal %116 {approx = true} : vector<24x1xf32> -> vector<24x1xf32>
    %118 = vector.broadcast %117 : vector<24x1xf32> to vector<24x24xf32>
    %119 = arith.mulf %114, %118 : vector<24x24xf32>
    %cst_54 = arith.constant dense<0.000000e+00> : vector<24x16xf32>
    %120 = tpu.matmul %119, %104, %cst_54 {dimension_numbers = #tpu.dot_dimension_numbers<[1], [0], [0], [1], [0, 0, 1, 1], [], []>} : vector<24x24xf32>, vector<24x16xf32>, vector<24x16xf32> -> vector<24x16xf32>
    %121 = arith.addf %101, %120 : vector<24x16xf32>
    %cst_55 = arith.constant 5.000000e-01 : f32
    %122 = vector.broadcast %cst_55 : f32 to vector<24x16xf32>
    %123 = arith.mulf %122, %121 : vector<24x16xf32>
    %c0_56 = arith.constant 0 : index
    %c16 = arith.constant 16 : index
    %124 = vector.load %arg19[%c0_56, %c16] : memref<24x64xf32, #tpu.memory_space<vmem>>, vector<24x16xf32>
    tpu.vector_store %arg19[%c0_56, %c16], %123 {strides = array<i32>} : memref<24x64xf32, #tpu.memory_space<vmem>>, vector<24x16xf32>,
    %125 = vector.extract_strided_slice %28 {offsets = [0, 32], sizes = [24, 16], strides = [1, 1]} : vector<24x64xf32> to vector<24x16xf32>
    %126 = vector.extract_strided_slice %30 {offsets = [0, 32], sizes = [24, 16], strides = [1, 1]} : vector<24x64xf32> to vector<24x16xf32>
    %127 = vector.extract_strided_slice %32 {offsets = [0, 32], sizes = [24, 16], strides = [1, 1]} : vector<24x64xf32> to vector<24x16xf32>
    %128 = tpu.transpose %126, [1, 0] : vector<24x16xf32> -> vector<16x24xf32>
    %cst_57 = arith.constant dense<0.000000e+00> : vector<24x24xf32>
    %129 = tpu.matmul %125, %128, %cst_57 {dimension_numbers = #tpu.dot_dimension_numbers<[1], [0], [0], [1], [0, 0, 1, 1], [], []>} : vector<24x16xf32>, vector<16x24xf32>, vector<24x24xf32> -> vector<24x24xf32>
    %cst_58 = arith.constant 2.500000e-01 : f32
    %130 = vector.broadcast %cst_58 : f32 to vector<24x24xf32>
    %131 = arith.mulf %129, %130 : vector<24x24xf32>
    %132 = arith.addf %131, %39 : vector<24x24xf32>
    %cst_59 = arith.constant dense<0xFF800000> : vector<24xf32>
    %133 = vector.multi_reduction <maximumf>, %132, %cst_59 [1] : vector<24x24xf32> to vector<24xf32>
    %134 = vector.shape_cast %133 : vector<24xf32> to vector<24x1xf32>
    %135 = vector.broadcast %134 : vector<24x1xf32> to vector<24x24xf32>
    %136 = arith.subf %132, %135 : vector<24x24xf32>
    %137 = math.exp %136 : vector<24x24xf32>
    %cst_60 = arith.constant dense<0.000000e+00> : vector<24xf32>
    %138 = vector.multi_reduction <add>, %137, %cst_60 [1] : vector<24x24xf32> to vector<24xf32>
    %139 = vector.shape_cast %138 : vector<24xf32> to vector<24x1xf32>
    %140 = tpu.reciprocal %139 {approx = true} : vector<24x1xf32> -> vector<24x1xf32>
    %141 = vector.broadcast %140 : vector<24x1xf32> to vector<24x24xf32>
    %142 = arith.mulf %137, %141 : vector<24x24xf32>
    %cst_61 = arith.constant dense<0.000000e+00> : vector<24x16xf32>
    %143 = tpu.matmul %142, %127, %cst_61 {dimension_numbers = #tpu.dot_dimension_numbers<[1], [0], [0], [1], [0, 0, 1, 1], [], []>} : vector<24x24xf32>, vector<24x16xf32>, vector<24x16xf32> -> vector<24x16xf32>
    %144 = vector.extract_strided_slice %34 {offsets = [0, 32], sizes = [24, 16], strides = [1, 1]} : vector<24x64xf32> to vector<24x16xf32>
    %145 = vector.extract_strided_slice %36 {offsets = [0, 32], sizes = [24, 16], strides = [1, 1]} : vector<24x64xf32> to vector<24x16xf32>
    %146 = vector.extract_strided_slice %38 {offsets = [0, 32], sizes = [24, 16], strides = [1, 1]} : vector<24x64xf32> to vector<24x16xf32>
    %147 = tpu.transpose %145, [1, 0] : vector<24x16xf32> -> vector<16x24xf32>
    %cst_62 = arith.constant dense<0.000000e+00> : vector<24x24xf32>
    %148 = tpu.matmul %144, %147, %cst_62 {dimension_numbers = #tpu.dot_dimension_numbers<[1], [0], [0], [1], [0, 0, 1, 1], [], []>} : vector<24x16xf32>, vector<16x24xf32>, vector<24x24xf32> -> vector<24x24xf32>
    %cst_63 = arith.constant 2.500000e-01 : f32
    %149 = vector.broadcast %cst_63 : f32 to vector<24x24xf32>
    %150 = arith.mulf %148, %149 : vector<24x24xf32>
    %151 = arith.addf %150, %40 : vector<24x24xf32>
    %cst_64 = arith.constant dense<0xFF800000> : vector<24xf32>
    %152 = vector.multi_reduction <maximumf>, %151, %cst_64 [1] : vector<24x24xf32> to vector<24xf32>
    %153 = vector.shape_cast %152 : vector<24xf32> to vector<24x1xf32>
    %154 = vector.broadcast %153 : vector<24x1xf32> to vector<24x24xf32>
    %155 = arith.subf %151, %154 : vector<24x24xf32>
    %156 = math.exp %155 : vector<24x24xf32>
    %cst_65 = arith.constant dense<0.000000e+00> : vector<24xf32>
    %157 = vector.multi_reduction <add>, %156, %cst_65 [1] : vector<24x24xf32> to vector<24xf32>
    %158 = vector.shape_cast %157 : vector<24xf32> to vector<24x1xf32>
    %159 = tpu.reciprocal %158 {approx = true} : vector<24x1xf32> -> vector<24x1xf32>
    %160 = vector.broadcast %159 : vector<24x1xf32> to vector<24x24xf32>
    %161 = arith.mulf %156, %160 : vector<24x24xf32>
    %cst_66 = arith.constant dense<0.000000e+00> : vector<24x16xf32>
    %162 = tpu.matmul %161, %146, %cst_66 {dimension_numbers = #tpu.dot_dimension_numbers<[1], [0], [0], [1], [0, 0, 1, 1], [], []>} : vector<24x24xf32>, vector<24x16xf32>, vector<24x16xf32> -> vector<24x16xf32>
    %163 = arith.addf %143, %162 : vector<24x16xf32>
    %cst_67 = arith.constant 5.000000e-01 : f32
    %164 = vector.broadcast %cst_67 : f32 to vector<24x16xf32>
    %165 = arith.mulf %164, %163 : vector<24x16xf32>
    %c0_68 = arith.constant 0 : index
    %c32 = arith.constant 32 : index
    %166 = vector.load %arg19[%c0_68, %c32] : memref<24x64xf32, #tpu.memory_space<vmem>>, vector<24x16xf32>
    tpu.vector_store %arg19[%c0_68, %c32], %165 {strides = array<i32>} : memref<24x64xf32, #tpu.memory_space<vmem>>, vector<24x16xf32>,
    %167 = vector.extract_strided_slice %28 {offsets = [0, 48], sizes = [24, 16], strides = [1, 1]} : vector<24x64xf32> to vector<24x16xf32>
    %168 = vector.extract_strided_slice %30 {offsets = [0, 48], sizes = [24, 16], strides = [1, 1]} : vector<24x64xf32> to vector<24x16xf32>
    %169 = vector.extract_strided_slice %32 {offsets = [0, 48], sizes = [24, 16], strides = [1, 1]} : vector<24x64xf32> to vector<24x16xf32>
    %170 = tpu.transpose %168, [1, 0] : vector<24x16xf32> -> vector<16x24xf32>
    %cst_69 = arith.constant dense<0.000000e+00> : vector<24x24xf32>
    %171 = tpu.matmul %167, %170, %cst_69 {dimension_numbers = #tpu.dot_dimension_numbers<[1], [0], [0], [1], [0, 0, 1, 1], [], []>} : vector<24x16xf32>, vector<16x24xf32>, vector<24x24xf32> -> vector<24x24xf32>
    %cst_70 = arith.constant 2.500000e-01 : f32
    %172 = vector.broadcast %cst_70 : f32 to vector<24x24xf32>
    %173 = arith.mulf %171, %172 : vector<24x24xf32>
    %174 = arith.addf %173, %39 : vector<24x24xf32>
    %cst_71 = arith.constant dense<0xFF800000> : vector<24xf32>
    %175 = vector.multi_reduction <maximumf>, %174, %cst_71 [1] : vector<24x24xf32> to vector<24xf32>
    %176 = vector.shape_cast %175 : vector<24xf32> to vector<24x1xf32>
    %177 = vector.broadcast %176 : vector<24x1xf32> to vector<24x24xf32>
    %178 = arith.subf %174, %177 : vector<24x24xf32>
    %179 = math.exp %178 : vector<24x24xf32>
    %cst_72 = arith.constant dense<0.000000e+00> : vector<24xf32>
    %180 = vector.multi_reduction <add>, %179, %cst_72 [1] : vector<24x24xf32> to vector<24xf32>
    %181 = vector.shape_cast %180 : vector<24xf32> to vector<24x1xf32>
    %182 = tpu.reciprocal %181 {approx = true} : vector<24x1xf32> -> vector<24x1xf32>
    %183 = vector.broadcast %182 : vector<24x1xf32> to vector<24x24xf32>
    %184 = arith.mulf %179, %183 : vector<24x24xf32>
    %cst_73 = arith.constant dense<0.000000e+00> : vector<24x16xf32>
    %185 = tpu.matmul %184, %169, %cst_73 {dimension_numbers = #tpu.dot_dimension_numbers<[1], [0], [0], [1], [0, 0, 1, 1], [], []>} : vector<24x24xf32>, vector<24x16xf32>, vector<24x16xf32> -> vector<24x16xf32>
    %186 = vector.extract_strided_slice %34 {offsets = [0, 48], sizes = [24, 16], strides = [1, 1]} : vector<24x64xf32> to vector<24x16xf32>
    %187 = vector.extract_strided_slice %36 {offsets = [0, 48], sizes = [24, 16], strides = [1, 1]} : vector<24x64xf32> to vector<24x16xf32>
    %188 = vector.extract_strided_slice %38 {offsets = [0, 48], sizes = [24, 16], strides = [1, 1]} : vector<24x64xf32> to vector<24x16xf32>
    %189 = tpu.transpose %187, [1, 0] : vector<24x16xf32> -> vector<16x24xf32>
    %cst_74 = arith.constant dense<0.000000e+00> : vector<24x24xf32>
    %190 = tpu.matmul %186, %189, %cst_74 {dimension_numbers = #tpu.dot_dimension_numbers<[1], [0], [0], [1], [0, 0, 1, 1], [], []>} : vector<24x16xf32>, vector<16x24xf32>, vector<24x24xf32> -> vector<24x24xf32>
    %cst_75 = arith.constant 2.500000e-01 : f32
    %191 = vector.broadcast %cst_75 : f32 to vector<24x24xf32>
    %192 = arith.mulf %190, %191 : vector<24x24xf32>
    %193 = arith.addf %192, %40 : vector<24x24xf32>
    %cst_76 = arith.constant dense<0xFF800000> : vector<24xf32>
    %194 = vector.multi_reduction <maximumf>, %193, %cst_76 [1] : vector<24x24xf32> to vector<24xf32>
    %195 = vector.shape_cast %194 : vector<24xf32> to vector<24x1xf32>
    %196 = vector.broadcast %195 : vector<24x1xf32> to vector<24x24xf32>
    %197 = arith.subf %193, %196 : vector<24x24xf32>
    %198 = math.exp %197 : vector<24x24xf32>
    %cst_77 = arith.constant dense<0.000000e+00> : vector<24xf32>
    %199 = vector.multi_reduction <add>, %198, %cst_77 [1] : vector<24x24xf32> to vector<24xf32>
    %200 = vector.shape_cast %199 : vector<24xf32> to vector<24x1xf32>
    %201 = tpu.reciprocal %200 {approx = true} : vector<24x1xf32> -> vector<24x1xf32>
    %202 = vector.broadcast %201 : vector<24x1xf32> to vector<24x24xf32>
    %203 = arith.mulf %198, %202 : vector<24x24xf32>
    %cst_78 = arith.constant dense<0.000000e+00> : vector<24x16xf32>
    %204 = tpu.matmul %203, %188, %cst_78 {dimension_numbers = #tpu.dot_dimension_numbers<[1], [0], [0], [1], [0, 0, 1, 1], [], []>} : vector<24x24xf32>, vector<24x16xf32>, vector<24x16xf32> -> vector<24x16xf32>
    %205 = arith.addf %185, %204 : vector<24x16xf32>
    %cst_79 = arith.constant 5.000000e-01 : f32
    %206 = vector.broadcast %cst_79 : f32 to vector<24x16xf32>
    %207 = arith.mulf %206, %205 : vector<24x16xf32>
    %c0_80 = arith.constant 0 : index
    %c48 = arith.constant 48 : index
    %208 = vector.load %arg19[%c0_80, %c48] : memref<24x64xf32, #tpu.memory_space<vmem>>, vector<24x16xf32>
    tpu.vector_store %arg19[%c0_80, %c48], %207 {strides = array<i32>} : memref<24x64xf32, #tpu.memory_space<vmem>>, vector<24x16xf32>,
    %c0_81 = arith.constant 0 : index
    %c0_82 = arith.constant 0 : index
    %209 = vector.load %arg19[%c0_81, %c0_82] : memref<24x64xf32, #tpu.memory_space<vmem>>, vector<24x64xf32>
    %210 = arith.addf %209, %25 : vector<24x64xf32>
    %c0_83 = arith.constant 0 : index
    %c0_84 = arith.constant 0 : index
    %211 = vector.load %arg12[%c0_83, %c0_84] : memref<1x64xf32, #tpu.memory_space<vmem>>, vector<1x64xf32>
    %c0_85 = arith.constant 0 : index
    %c0_86 = arith.constant 0 : index
    %212 = vector.load %arg13[%c0_85, %c0_86] : memref<1x64xf32, #tpu.memory_space<vmem>>, vector<1x64xf32>
    %cst_87 = arith.constant dense<0.000000e+00> : vector<24xf32>
    %213 = vector.multi_reduction <add>, %210, %cst_87 [1] : vector<24x64xf32> to vector<24xf32>
    %214 = vector.shape_cast %213 : vector<24xf32> to vector<24x1xf32>
    %cst_88 = arith.constant 6.400000e+01 : f32
    %215 = vector.broadcast %cst_88 : f32 to vector<24x1xf32>
    %216 = arith.divf %214, %215 : vector<24x1xf32>
    %217 = vector.broadcast %216 : vector<24x1xf32> to vector<24x64xf32>
    %218 = arith.subf %210, %217 : vector<24x64xf32>
    %219 = arith.mulf %218, %218 : vector<24x64xf32>
    %cst_89 = arith.constant dense<0.000000e+00> : vector<24xf32>
    %220 = vector.multi_reduction <add>, %219, %cst_89 [1] : vector<24x64xf32> to vector<24xf32>
    %221 = vector.shape_cast %220 : vector<24xf32> to vector<24x1xf32>
    %cst_90 = arith.constant 6.400000e+01 : f32
    %222 = vector.broadcast %cst_90 : f32 to vector<24x1xf32>
    %223 = arith.divf %221, %222 : vector<24x1xf32>
    %224 = vector.broadcast %216 : vector<24x1xf32> to vector<24x64xf32>
    %225 = arith.subf %210, %224 : vector<24x64xf32>
    %cst_91 = arith.constant 9.99999997E-7 : f32
    %226 = vector.broadcast %cst_91 : f32 to vector<24x1xf32>
    %227 = arith.addf %223, %226 : vector<24x1xf32>
    %228 = math.rsqrt %227 : vector<24x1xf32>
    %229 = vector.broadcast %228 : vector<24x1xf32> to vector<24x64xf32>
    %230 = arith.mulf %225, %229 : vector<24x64xf32>
    %231 = vector.broadcast %211 : vector<1x64xf32> to vector<24x64xf32>
    %232 = arith.mulf %230, %231 : vector<24x64xf32>
    %233 = vector.broadcast %212 : vector<1x64xf32> to vector<24x64xf32>
    %234 = arith.addf %232, %233 : vector<24x64xf32>
    %235 = arith.truncf %234 : vector<24x64xf32> to vector<24x64xbf16>
    %c0_92 = arith.constant 0 : index
    %c0_93 = arith.constant 0 : index
    %236 = vector.load %arg14[%c0_92, %c0_93] : memref<64x128xbf16, #tpu.memory_space<vmem>>, vector<64x128xbf16>
    %cst_94 = arith.constant dense<0.000000e+00> : vector<24x128xf32>
    %237 = tpu.matmul %235, %236, %cst_94 {dimension_numbers = #tpu.dot_dimension_numbers<[1], [0], [0], [1], [0, 0, 1, 1], [], []>} : vector<24x64xbf16>, vector<64x128xbf16>, vector<24x128xf32> -> vector<24x128xf32>
    %c0_95 = arith.constant 0 : index
    %c0_96 = arith.constant 0 : index
    %238 = vector.load %arg15[%c0_95, %c0_96] : memref<1x128xf32, #tpu.memory_space<vmem>>, vector<1x128xf32>
    %239 = vector.broadcast %238 : vector<1x128xf32> to vector<24x128xf32>
    %240 = arith.addf %237, %239 : vector<24x128xf32>
    %241 = arith.mulf %240, %240 : vector<24x128xf32>
    %242 = arith.mulf %240, %241 : vector<24x128xf32>
    %cst_97 = arith.constant 4.471500e-02 : f32
    %243 = vector.broadcast %cst_97 : f32 to vector<24x128xf32>
    %244 = arith.mulf %243, %242 : vector<24x128xf32>
    %245 = arith.addf %240, %244 : vector<24x128xf32>
    %cst_98 = arith.constant 0.797884583 : f32
    %246 = vector.broadcast %cst_98 : f32 to vector<24x128xf32>
    %247 = arith.mulf %246, %245 : vector<24x128xf32>
    %248 = math.tanh %247 : vector<24x128xf32>
    %cst_99 = arith.constant 1.000000e+00 : f32
    %249 = vector.broadcast %cst_99 : f32 to vector<24x128xf32>
    %250 = arith.addf %249, %248 : vector<24x128xf32>
    %cst_100 = arith.constant 5.000000e-01 : f32
    %251 = vector.broadcast %cst_100 : f32 to vector<24x128xf32>
    %252 = arith.mulf %251, %250 : vector<24x128xf32>
    %253 = arith.mulf %240, %252 : vector<24x128xf32>
    %254 = arith.truncf %253 : vector<24x128xf32> to vector<24x128xbf16>
    %c0_101 = arith.constant 0 : index
    %c0_102 = arith.constant 0 : index
    %255 = vector.load %arg16[%c0_101, %c0_102] : memref<128x64xbf16, #tpu.memory_space<vmem>>, vector<128x64xbf16>
    %cst_103 = arith.constant dense<0.000000e+00> : vector<24x64xf32>
    %256 = tpu.matmul %254, %255, %cst_103 {dimension_numbers = #tpu.dot_dimension_numbers<[1], [0], [0], [1], [0, 0, 1, 1], [], []>} : vector<24x128xbf16>, vector<128x64xbf16>, vector<24x64xf32> -> vector<24x64xf32>
    %c0_104 = arith.constant 0 : index
    %c0_105 = arith.constant 0 : index
    %257 = vector.load %arg17[%c0_104, %c0_105] : memref<1x64xf32, #tpu.memory_space<vmem>>, vector<1x64xf32>
    %258 = vector.broadcast %257 : vector<1x64xf32> to vector<24x64xf32>
    %259 = arith.addf %256, %258 : vector<24x64xf32>
    %260 = arith.addf %259, %210 : vector<24x64xf32>
    %c0_106 = arith.constant 0 : index
    %c0_107 = arith.constant 0 : index
    %c0_108 = arith.constant 0 : index
    %261 = vector.load %arg18[%c0_106, %c0_107, %c0_108] : memref<1x24x64xf32, #tpu.memory_space<vmem>>, vector<1x24x64xf32>
    %262 = vector.shape_cast %261 : vector<1x24x64xf32> to vector<24x64xf32>
    %263 = vector.shape_cast %260 : vector<24x64xf32> to vector<1x24x64xf32>
    tpu.vector_store %arg18[%c0_106, %c0_107, %c0_108], %263 {strides = array<i32>} : memref<1x24x64xf32, #tpu.memory_space<vmem>>, vector<1x24x64xf32>,
    return
  }
  func.func @transform_0(%arg0: i32) -> (i32, i32, i32) {
    %c0_i32 = arith.constant 0 : i32
    %c0_i32_0 = arith.constant 0 : i32
    %c0_i32_1 = arith.constant 0 : i32
    return %arg0, %c0_i32, %c0_i32_0 : i32, i32, i32
  }
  func.func @transform_1(%arg0: i32) -> (i32, i32) {
    %c0_i32 = arith.constant 0 : i32
    %c0_i32_0 = arith.constant 0 : i32
    %c0_i32_1 = arith.constant 0 : i32
    return %c0_i32, %c0_i32_0 : i32, i32
  }
  func.func @transform_2(%arg0: i32) -> (i32, i32) {
    %c0_i32 = arith.constant 0 : i32
    %c0_i32_0 = arith.constant 0 : i32
    %c0_i32_1 = arith.constant 0 : i32
    return %c0_i32, %c0_i32_0 : i32, i32
  }
  func.func @transform_3(%arg0: i32) -> (i32, i32) {
    %c0_i32 = arith.constant 0 : i32
    %c0_i32_0 = arith.constant 0 : i32
    %c0_i32_1 = arith.constant 0 : i32
    return %c0_i32, %c0_i32_0 : i32, i32
  }
  func.func @transform_4(%arg0: i32) -> (i32, i32) {
    %c0_i32 = arith.constant 0 : i32
    %c0_i32_0 = arith.constant 0 : i32
    %c0_i32_1 = arith.constant 0 : i32
    return %c0_i32, %c0_i32_0 : i32, i32
  }
  func.func @transform_5(%arg0: i32) -> (i32, i32) {
    %c0_i32 = arith.constant 0 : i32
    %c0_i32_0 = arith.constant 0 : i32
    %c0_i32_1 = arith.constant 0 : i32
    return %c0_i32, %c0_i32_0 : i32, i32
  }
  func.func @transform_6(%arg0: i32) -> (i32, i32) {
    %c0_i32 = arith.constant 0 : i32
    %c0_i32_0 = arith.constant 0 : i32
    %c0_i32_1 = arith.constant 0 : i32
    return %c0_i32, %c0_i32_0 : i32, i32
  }
  func.func @transform_7(%arg0: i32) -> (i32, i32) {
    %c0_i32 = arith.constant 0 : i32
    %c0_i32_0 = arith.constant 0 : i32
    %c0_i32_1 = arith.constant 0 : i32
    return %c0_i32, %c0_i32_0 : i32, i32
  }
  func.func @transform_8(%arg0: i32) -> (i32, i32) {
    %c0_i32 = arith.constant 0 : i32
    %c0_i32_0 = arith.constant 0 : i32
    %c0_i32_1 = arith.constant 0 : i32
    return %c0_i32, %c0_i32_0 : i32, i32
  }
  func.func @transform_9(%arg0: i32) -> (i32, i32) {
    %c0_i32 = arith.constant 0 : i32
    %c0_i32_0 = arith.constant 0 : i32
    %c0_i32_1 = arith.constant 0 : i32
    return %c0_i32, %c0_i32_0 : i32, i32
  }
  func.func @transform_10(%arg0: i32) -> (i32, i32) {
    %c0_i32 = arith.constant 0 : i32
    %c0_i32_0 = arith.constant 0 : i32
    %c0_i32_1 = arith.constant 0 : i32
    return %c0_i32, %c0_i32_0 : i32, i32
  }
  func.func @transform_11(%arg0: i32) -> (i32, i32) {
    %c0_i32 = arith.constant 0 : i32
    %c0_i32_0 = arith.constant 0 : i32
    %c0_i32_1 = arith.constant 0 : i32
    return %c0_i32, %c0_i32_0 : i32, i32
  }
  func.func @transform_12(%arg0: i32) -> (i32, i32) {
    %c0_i32 = arith.constant 0 : i32
    %c0_i32_0 = arith.constant 0 : i32
    %c0_i32_1 = arith.constant 0 : i32
    return %c0_i32, %c0_i32_0 : i32, i32
  }
  func.func @transform_13(%arg0: i32) -> (i32, i32) {
    %c0_i32 = arith.constant 0 : i32
    %c0_i32_0 = arith.constant 0 : i32
    %c0_i32_1 = arith.constant 0 : i32
    return %c0_i32, %c0_i32_0 : i32, i32
  }
  func.func @transform_14(%arg0: i32) -> (i32, i32) {
    %c0_i32 = arith.constant 0 : i32
    %c0_i32_0 = arith.constant 0 : i32
    %c0_i32_1 = arith.constant 0 : i32
    return %c0_i32, %c0_i32_0 : i32, i32
  }
  func.func @transform_15(%arg0: i32) -> (i32, i32) {
    %c0_i32 = arith.constant 0 : i32
    %c0_i32_0 = arith.constant 0 : i32
    %c0_i32_1 = arith.constant 0 : i32
    return %c0_i32, %c0_i32_0 : i32, i32
  }
  func.func @transform_16(%arg0: i32) -> (i32, i32) {
    %c0_i32 = arith.constant 0 : i32
    %c0_i32_0 = arith.constant 0 : i32
    %c0_i32_1 = arith.constant 0 : i32
    return %c0_i32, %c0_i32_0 : i32, i32
  }
  func.func @transform_17(%arg0: i32) -> (i32, i32, i32) {
    %c0_i32 = arith.constant 0 : i32
    %c0_i32_0 = arith.constant 0 : i32
    %c0_i32_1 = arith.constant 0 : i32
    return %arg0, %c0_i32, %c0_i32_0 : i32, i32, i32
  }
}

module attributes {stable_mosaic.version = 11 : i64} {
  func.func @_ocvp_layer_kernel(%arg0: i32, %arg1: memref<1x24x64xf32, #tpu.memory_space<vmem>>, %arg2: memref<1x64xf32, #tpu.memory_space<vmem>>, %arg3: memref<1x64xf32, #tpu.memory_space<vmem>>, %arg4: memref<64x64xbf16, #tpu.memory_space<vmem>>, %arg5: memref<64x64xbf16, #tpu.memory_space<vmem>>, %arg6: memref<64x64xbf16, #tpu.memory_space<vmem>>, %arg7: memref<64x64xbf16, #tpu.memory_space<vmem>>, %arg8: memref<64x64xbf16, #tpu.memory_space<vmem>>, %arg9: memref<64x64xbf16, #tpu.memory_space<vmem>>, %arg10: memref<24x24xf32, #tpu.memory_space<vmem>>, %arg11: memref<24x24xf32, #tpu.memory_space<vmem>>, %arg12: memref<1x64xf32, #tpu.memory_space<vmem>>, %arg13: memref<1x64xf32, #tpu.memory_space<vmem>>, %arg14: memref<64x128xbf16, #tpu.memory_space<vmem>>, %arg15: memref<1x128xf32, #tpu.memory_space<vmem>>, %arg16: memref<128x64xbf16, #tpu.memory_space<vmem>>, %arg17: memref<1x64xf32, #tpu.memory_space<vmem>>, %arg18: memref<1x24x64xf32, #tpu.memory_space<vmem>>, %arg19: memref<24x64xf32, #tpu.memory_space<vmem>>) attributes {dimension_semantics = [#tpu.dimension_semantics<parallel>], iteration_bounds = array<i64: 2>, scalar_prefetch = 0 : i64, scratch_operands = 1 : i64, tpu.core_type = #tpu.core_type<tc>, window_params = [{transform_indices = @transform_0, window_bounds = array<i64: 1, 24, 64>}, {pipeline_mode = #tpu.pipeline_mode<synchronous>, transform_indices = @transform_1, window_bounds = array<i64: 1, 64>}, {pipeline_mode = #tpu.pipeline_mode<synchronous>, transform_indices = @transform_2, window_bounds = array<i64: 1, 64>}, {pipeline_mode = #tpu.pipeline_mode<synchronous>, transform_indices = @transform_3, window_bounds = array<i64: 64, 64>}, {pipeline_mode = #tpu.pipeline_mode<synchronous>, transform_indices = @transform_4, window_bounds = array<i64: 64, 64>}, {pipeline_mode = #tpu.pipeline_mode<synchronous>, transform_indices = @transform_5, window_bounds = array<i64: 64, 64>}, {pipeline_mode = #tpu.pipeline_mode<synchronous>, transform_indices = @transform_6, window_bounds = array<i64: 64, 64>}, {pipeline_mode = #tpu.pipeline_mode<synchronous>, transform_indices = @transform_7, window_bounds = array<i64: 64, 64>}, {pipeline_mode = #tpu.pipeline_mode<synchronous>, transform_indices = @transform_8, window_bounds = array<i64: 64, 64>}, {pipeline_mode = #tpu.pipeline_mode<synchronous>, transform_indices = @transform_9, window_bounds = array<i64: 24, 24>}, {pipeline_mode = #tpu.pipeline_mode<synchronous>, transform_indices = @transform_10, window_bounds = array<i64: 24, 24>}, {pipeline_mode = #tpu.pipeline_mode<synchronous>, transform_indices = @transform_11, window_bounds = array<i64: 1, 64>}, {pipeline_mode = #tpu.pipeline_mode<synchronous>, transform_indices = @transform_12, window_bounds = array<i64: 1, 64>}, {pipeline_mode = #tpu.pipeline_mode<synchronous>, transform_indices = @transform_13, window_bounds = array<i64: 64, 128>}, {pipeline_mode = #tpu.pipeline_mode<synchronous>, transform_indices = @transform_14, window_bounds = array<i64: 1, 128>}, {pipeline_mode = #tpu.pipeline_mode<synchronous>, transform_indices = @transform_15, window_bounds = array<i64: 128, 64>}, {pipeline_mode = #tpu.pipeline_mode<synchronous>, transform_indices = @transform_16, window_bounds = array<i64: 1, 64>}, {transform_indices = @transform_17, window_bounds = array<i64: 1, 24, 64>}]} {
    %c0 = arith.constant 0 : index
    %c0_0 = arith.constant 0 : index
    %c0_1 = arith.constant 0 : index
    %0 = vector.load %arg1[%c0, %c0_0, %c0_1] : memref<1x24x64xf32, #tpu.memory_space<vmem>>, vector<1x24x64xf32>
    %1 = vector.shape_cast %0 : vector<1x24x64xf32> to vector<24x64xf32>
    %c0_2 = arith.constant 0 : index
    %c0_3 = arith.constant 0 : index
    %2 = vector.load %arg2[%c0_2, %c0_3] : memref<1x64xf32, #tpu.memory_space<vmem>>, vector<1x64xf32>
    %c0_4 = arith.constant 0 : index
    %c0_5 = arith.constant 0 : index
    %3 = vector.load %arg3[%c0_4, %c0_5] : memref<1x64xf32, #tpu.memory_space<vmem>>, vector<1x64xf32>
    %cst = arith.constant dense<0.000000e+00> : vector<24xf32>
    %4 = vector.multi_reduction <add>, %1, %cst [1] : vector<24x64xf32> to vector<24xf32>
    %5 = vector.shape_cast %4 : vector<24xf32> to vector<24x1xf32>
    %cst_6 = arith.constant 6.400000e+01 : f32
    %6 = vector.broadcast %cst_6 : f32 to vector<24x1xf32>
    %7 = arith.divf %5, %6 : vector<24x1xf32>
    %8 = vector.broadcast %7 : vector<24x1xf32> to vector<24x64xf32>
    %9 = arith.subf %1, %8 : vector<24x64xf32>
    %10 = arith.mulf %9, %9 : vector<24x64xf32>
    %cst_7 = arith.constant dense<0.000000e+00> : vector<24xf32>
    %11 = vector.multi_reduction <add>, %10, %cst_7 [1] : vector<24x64xf32> to vector<24xf32>
    %12 = vector.shape_cast %11 : vector<24xf32> to vector<24x1xf32>
    %cst_8 = arith.constant 6.400000e+01 : f32
    %13 = vector.broadcast %cst_8 : f32 to vector<24x1xf32>
    %14 = arith.divf %12, %13 : vector<24x1xf32>
    %15 = vector.broadcast %7 : vector<24x1xf32> to vector<24x64xf32>
    %16 = arith.subf %1, %15 : vector<24x64xf32>
    %cst_9 = arith.constant 9.99999997E-7 : f32
    %17 = vector.broadcast %cst_9 : f32 to vector<24x1xf32>
    %18 = arith.addf %14, %17 : vector<24x1xf32>
    %19 = math.rsqrt %18 : vector<24x1xf32>
    %20 = vector.broadcast %19 : vector<24x1xf32> to vector<24x64xf32>
    %21 = arith.mulf %16, %20 : vector<24x64xf32>
    %22 = vector.broadcast %2 : vector<1x64xf32> to vector<24x64xf32>
    %23 = arith.mulf %21, %22 : vector<24x64xf32>
    %24 = vector.broadcast %3 : vector<1x64xf32> to vector<24x64xf32>
    %25 = arith.addf %23, %24 : vector<24x64xf32>
    %26 = arith.truncf %25 : vector<24x64xf32> to vector<24x64xbf16>
    %c0_10 = arith.constant 0 : index
    %c0_11 = arith.constant 0 : index
    %27 = vector.load %arg4[%c0_10, %c0_11] : memref<64x64xbf16, #tpu.memory_space<vmem>>, vector<64x64xbf16>
    %cst_12 = arith.constant dense<0.000000e+00> : vector<24x64xf32>
    %28 = tpu.matmul %26, %27, %cst_12 {dimension_numbers = #tpu.dot_dimension_numbers<[1], [0], [0], [1], [0, 0, 1, 1], [], []>} : vector<24x64xbf16>, vector<64x64xbf16>, vector<24x64xf32> -> vector<24x64xf32>
    %c0_13 = arith.constant 0 : index
    %c0_14 = arith.constant 0 : index
    %29 = vector.load %arg5[%c0_13, %c0_14] : memref<64x64xbf16, #tpu.memory_space<vmem>>, vector<64x64xbf16>
    %cst_15 = arith.constant dense<0.000000e+00> : vector<24x64xf32>
    %30 = tpu.matmul %26, %29, %cst_15 {dimension_numbers = #tpu.dot_dimension_numbers<[1], [0], [0], [1], [0, 0, 1, 1], [], []>} : vector<24x64xbf16>, vector<64x64xbf16>, vector<24x64xf32> -> vector<24x64xf32>
    %c0_16 = arith.constant 0 : index
    %c0_17 = arith.constant 0 : index
    %31 = vector.load %arg6[%c0_16, %c0_17] : memref<64x64xbf16, #tpu.memory_space<vmem>>, vector<64x64xbf16>
    %cst_18 = arith.constant dense<0.000000e+00> : vector<24x64xf32>
    %32 = tpu.matmul %26, %31, %cst_18 {dimension_numbers = #tpu.dot_dimension_numbers<[1], [0], [0], [1], [0, 0, 1, 1], [], []>} : vector<24x64xbf16>, vector<64x64xbf16>, vector<24x64xf32> -> vector<24x64xf32>
    %c0_19 = arith.constant 0 : index
    %c0_20 = arith.constant 0 : index
    %33 = vector.load %arg7[%c0_19, %c0_20] : memref<64x64xbf16, #tpu.memory_space<vmem>>, vector<64x64xbf16>
    %cst_21 = arith.constant dense<0.000000e+00> : vector<24x64xf32>
    %34 = tpu.matmul %26, %33, %cst_21 {dimension_numbers = #tpu.dot_dimension_numbers<[1], [0], [0], [1], [0, 0, 1, 1], [], []>} : vector<24x64xbf16>, vector<64x64xbf16>, vector<24x64xf32> -> vector<24x64xf32>
    %c0_22 = arith.constant 0 : index
    %c0_23 = arith.constant 0 : index
    %35 = vector.load %arg8[%c0_22, %c0_23] : memref<64x64xbf16, #tpu.memory_space<vmem>>, vector<64x64xbf16>
    %cst_24 = arith.constant dense<0.000000e+00> : vector<24x64xf32>
    %36 = tpu.matmul %26, %35, %cst_24 {dimension_numbers = #tpu.dot_dimension_numbers<[1], [0], [0], [1], [0, 0, 1, 1], [], []>} : vector<24x64xbf16>, vector<64x64xbf16>, vector<24x64xf32> -> vector<24x64xf32>
    %c0_25 = arith.constant 0 : index
    %c0_26 = arith.constant 0 : index
    %37 = vector.load %arg9[%c0_25, %c0_26] : memref<64x64xbf16, #tpu.memory_space<vmem>>, vector<64x64xbf16>
    %cst_27 = arith.constant dense<0.000000e+00> : vector<24x64xf32>
    %38 = tpu.matmul %26, %37, %cst_27 {dimension_numbers = #tpu.dot_dimension_numbers<[1], [0], [0], [1], [0, 0, 1, 1], [], []>} : vector<24x64xbf16>, vector<64x64xbf16>, vector<24x64xf32> -> vector<24x64xf32>
    %c0_28 = arith.constant 0 : index
    %c0_29 = arith.constant 0 : index
    %39 = vector.load %arg10[%c0_28, %c0_29] : memref<24x24xf32, #tpu.memory_space<vmem>>, vector<24x24xf32>
    %c0_30 = arith.constant 0 : index
    %c0_31 = arith.constant 0 : index
    %40 = vector.load %arg11[%c0_30, %c0_31] : memref<24x24xf32, #tpu.memory_space<vmem>>, vector<24x24xf32>
    %41 = vector.extract_strided_slice %28 {offsets = [0, 0], sizes = [24, 16], strides = [1, 1]} : vector<24x64xf32> to vector<24x16xf32>
    %42 = vector.extract_strided_slice %30 {offsets = [0, 0], sizes = [24, 16], strides = [1, 1]} : vector<24x64xf32> to vector<24x16xf32>
    %43 = vector.extract_strided_slice %32 {offsets = [0, 0], sizes = [24, 16], strides = [1, 1]} : vector<24x64xf32> to vector<24x16xf32>
    %44 = tpu.transpose %42, [1, 0] : vector<24x16xf32> -> vector<16x24xf32>
    %cst_32 = arith.constant dense<0.000000e+00> : vector<24x24xf32>
    %45 = tpu.matmul %41, %44, %cst_32 {dimension_numbers = #tpu.dot_dimension_numbers<[1], [0], [0], [1], [0, 0, 1, 1], [], []>} : vector<24x16xf32>, vector<16x24xf32>, vector<24x24xf32> -> vector<24x24xf32>
    %cst_33 = arith.constant 2.500000e-01 : f32
    %46 = vector.broadcast %cst_33 : f32 to vector<24x24xf32>
    %47 = arith.mulf %45, %46 : vector<24x24xf32>
    %48 = arith.addf %47, %39 : vector<24x24xf32>
    %cst_34 = arith.constant dense<0xFF800000> : vector<24xf32>
    %49 = vector.multi_reduction <maximumf>, %48, %cst_34 [1] : vector<24x24xf32> to vector<24xf32>
    %50 = vector.shape_cast %49 : vector<24xf32> to vector<24x1xf32>
    %51 = vector.broadcast %50 : vector<24x1xf32> to vector<24x24xf32>
    %52 = arith.subf %48, %51 : vector<24x24xf32>
    %53 = math.exp %52 : vector<24x24xf32>
    %cst_35 = arith.constant dense<0.000000e+00> : vector<24xf32>
    %54 = vector.multi_reduction <add>, %53, %cst_35 [1] : vector<24x24xf32> to vector<24xf32>
    %55 = vector.shape_cast %54 : vector<24xf32> to vector<24x1xf32>
    %56 = tpu.reciprocal %55 {approx = true} : vector<24x1xf32> -> vector<24x1xf32>
    %57 = vector.broadcast %56 : vector<24x1xf32> to vector<24x24xf32>
    %58 = arith.mulf %53, %57 : vector<24x24xf32>
    %cst_36 = arith.constant dense<0.000000e+00> : vector<24x16xf32>
    %59 = tpu.matmul %58, %43, %cst_36 {dimension_numbers = #tpu.dot_dimension_numbers<[1], [0], [0], [1], [0, 0, 1, 1], [], []>} : vector<24x24xf32>, vector<24x16xf32>, vector<24x16xf32> -> vector<24x16xf32>
    %60 = vector.extract_strided_slice %34 {offsets = [0, 0], sizes = [24, 16], strides = [1, 1]} : vector<24x64xf32> to vector<24x16xf32>
    %61 = vector.extract_strided_slice %36 {offsets = [0, 0], sizes = [24, 16], strides = [1, 1]} : vector<24x64xf32> to vector<24x16xf32>
    %62 = vector.extract_strided_slice %38 {offsets = [0, 0], sizes = [24, 16], strides = [1, 1]} : vector<24x64xf32> to vector<24x16xf32>
    %63 = tpu.transpose %61, [1, 0] : vector<24x16xf32> -> vector<16x24xf32>
    %cst_37 = arith.constant dense<0.000000e+00> : vector<24x24xf32>
    %64 = tpu.matmul %60, %63, %cst_37 {dimension_numbers = #tpu.dot_dimension_numbers<[1], [0], [0], [1], [0, 0, 1, 1], [], []>} : vector<24x16xf32>, vector<16x24xf32>, vector<24x24xf32> -> vector<24x24xf32>
    %cst_38 = arith.constant 2.500000e-01 : f32
    %65 = vector.broadcast %cst_38 : f32 to vector<24x24xf32>
    %66 = arith.mulf %64, %65 : vector<24x24xf32>
    %67 = arith.addf %66, %40 : vector<24x24xf32>
    %cst_39 = arith.constant dense<0xFF800000> : vector<24xf32>
    %68 = vector.multi_reduction <maximumf>, %67, %cst_39 [1] : vector<24x24xf32> to vector<24xf32>
    %69 = vector.shape_cast %68 : vector<24xf32> to vector<24x1xf32>
    %70 = vector.broadcast %69 : vector<24x1xf32> to vector<24x24xf32>
    %71 = arith.subf %67, %70 : vector<24x24xf32>
    %72 = math.exp %71 : vector<24x24xf32>
    %cst_40 = arith.constant dense<0.000000e+00> : vector<24xf32>
    %73 = vector.multi_reduction <add>, %72, %cst_40 [1] : vector<24x24xf32> to vector<24xf32>
    %74 = vector.shape_cast %73 : vector<24xf32> to vector<24x1xf32>
    %75 = tpu.reciprocal %74 {approx = true} : vector<24x1xf32> -> vector<24x1xf32>
    %76 = vector.broadcast %75 : vector<24x1xf32> to vector<24x24xf32>
    %77 = arith.mulf %72, %76 : vector<24x24xf32>
    %cst_41 = arith.constant dense<0.000000e+00> : vector<24x16xf32>
    %78 = tpu.matmul %77, %62, %cst_41 {dimension_numbers = #tpu.dot_dimension_numbers<[1], [0], [0], [1], [0, 0, 1, 1], [], []>} : vector<24x24xf32>, vector<24x16xf32>, vector<24x16xf32> -> vector<24x16xf32>
    %79 = arith.addf %59, %78 : vector<24x16xf32>
    %cst_42 = arith.constant 5.000000e-01 : f32
    %80 = vector.broadcast %cst_42 : f32 to vector<24x16xf32>
    %81 = arith.mulf %80, %79 : vector<24x16xf32>
    %c0_43 = arith.constant 0 : index
    %c0_44 = arith.constant 0 : index
    %82 = vector.load %arg19[%c0_43, %c0_44] : memref<24x64xf32, #tpu.memory_space<vmem>>, vector<24x16xf32>
    tpu.vector_store %arg19[%c0_43, %c0_44], %81 {strides = array<i32>} : memref<24x64xf32, #tpu.memory_space<vmem>>, vector<24x16xf32>,
    %83 = vector.extract_strided_slice %28 {offsets = [0, 16], sizes = [24, 16], strides = [1, 1]} : vector<24x64xf32> to vector<24x16xf32>
    %84 = vector.extract_strided_slice %30 {offsets = [0, 16], sizes = [24, 16], strides = [1, 1]} : vector<24x64xf32> to vector<24x16xf32>
    %85 = vector.extract_strided_slice %32 {offsets = [0, 16], sizes = [24, 16], strides = [1, 1]} : vector<24x64xf32> to vector<24x16xf32>
    %86 = tpu.transpose %84, [1, 0] : vector<24x16xf32> -> vector<16x24xf32>
    %cst_45 = arith.constant dense<0.000000e+00> : vector<24x24xf32>
    %87 = tpu.matmul %83, %86, %cst_45 {dimension_numbers = #tpu.dot_dimension_numbers<[1], [0], [0], [1], [0, 0, 1, 1], [], []>} : vector<24x16xf32>, vector<16x24xf32>, vector<24x24xf32> -> vector<24x24xf32>
    %cst_46 = arith.constant 2.500000e-01 : f32
    %88 = vector.broadcast %cst_46 : f32 to vector<24x24xf32>
    %89 = arith.mulf %87, %88 : vector<24x24xf32>
    %90 = arith.addf %89, %39 : vector<24x24xf32>
    %cst_47 = arith.constant dense<0xFF800000> : vector<24xf32>
    %91 = vector.multi_reduction <maximumf>, %90, %cst_47 [1] : vector<24x24xf32> to vector<24xf32>
    %92 = vector.shape_cast %91 : vector<24xf32> to vector<24x1xf32>
    %93 = vector.broadcast %92 : vector<24x1xf32> to vector<24x24xf32>
    %94 = arith.subf %90, %93 : vector<24x24xf32>
    %95 = math.exp %94 : vector<24x24xf32>
    %cst_48 = arith.constant dense<0.000000e+00> : vector<24xf32>
    %96 = vector.multi_reduction <add>, %95, %cst_48 [1] : vector<24x24xf32> to vector<24xf32>
    %97 = vector.shape_cast %96 : vector<24xf32> to vector<24x1xf32>
    %98 = tpu.reciprocal %97 {approx = true} : vector<24x1xf32> -> vector<24x1xf32>
    %99 = vector.broadcast %98 : vector<24x1xf32> to vector<24x24xf32>
    %100 = arith.mulf %95, %99 : vector<24x24xf32>
    %cst_49 = arith.constant dense<0.000000e+00> : vector<24x16xf32>
    %101 = tpu.matmul %100, %85, %cst_49 {dimension_numbers = #tpu.dot_dimension_numbers<[1], [0], [0], [1], [0, 0, 1, 1], [], []>} : vector<24x24xf32>, vector<24x16xf32>, vector<24x16xf32> -> vector<24x16xf32>
    %102 = vector.extract_strided_slice %34 {offsets = [0, 16], sizes = [24, 16], strides = [1, 1]} : vector<24x64xf32> to vector<24x16xf32>
    %103 = vector.extract_strided_slice %36 {offsets = [0, 16], sizes = [24, 16], strides = [1, 1]} : vector<24x64xf32> to vector<24x16xf32>
    %104 = vector.extract_strided_slice %38 {offsets = [0, 16], sizes = [24, 16], strides = [1, 1]} : vector<24x64xf32> to vector<24x16xf32>
    %105 = tpu.transpose %103, [1, 0] : vector<24x16xf32> -> vector<16x24xf32>
    %cst_50 = arith.constant dense<0.000000e+00> : vector<24x24xf32>
    %106 = tpu.matmul %102, %105, %cst_50 {dimension_numbers = #tpu.dot_dimension_numbers<[1], [0], [0], [1], [0, 0, 1, 1], [], []>} : vector<24x16xf32>, vector<16x24xf32>, vector<24x24xf32> -> vector<24x24xf32>
    %cst_51 = arith.constant 2.500000e-01 : f32
    %107 = vector.broadcast %cst_51 : f32 to vector<24x24xf32>
    %108 = arith.mulf %106, %107 : vector<24x24xf32>
    %109 = arith.addf %108, %40 : vector<24x24xf32>
    %cst_52 = arith.constant dense<0xFF800000> : vector<24xf32>
    %110 = vector.multi_reduction <maximumf>, %109, %cst_52 [1] : vector<24x24xf32> to vector<24xf32>
    %111 = vector.shape_cast %110 : vector<24xf32> to vector<24x1xf32>
    %112 = vector.broadcast %111 : vector<24x1xf32> to vector<24x24xf32>
    %113 = arith.subf %109, %112 : vector<24x24xf32>
    %114 = math.exp %113 : vector<24x24xf32>
    %cst_53 = arith.constant dense<0.000000e+00> : vector<24xf32>
    %115 = vector.multi_reduction <add>, %114, %cst_53 [1] : vector<24x24xf32> to vector<24xf32>
    %116 = vector.shape_cast %115 : vector<24xf32> to vector<24x1xf32>
    %117 = tpu.reciprocal %116 {approx = true} : vector<24x1xf32> -> vector<24x1xf32>
    %118 = vector.broadcast %117 : vector<24x1xf32> to vector<24x24xf32>
    %119 = arith.mulf %114, %118 : vector<24x24xf32>
    %cst_54 = arith.constant dense<0.000000e+00> : vector<24x16xf32>
    %120 = tpu.matmul %119, %104, %cst_54 {dimension_numbers = #tpu.dot_dimension_numbers<[1], [0], [0], [1], [0, 0, 1, 1], [], []>} : vector<24x24xf32>, vector<24x16xf32>, vector<24x16xf32> -> vector<24x16xf32>
    %121 = arith.addf %101, %120 : vector<24x16xf32>
    %cst_55 = arith.constant 5.000000e-01 : f32
    %122 = vector.broadcast %cst_55 : f32 to vector<24x16xf32>
    %123 = arith.mulf %122, %121 : vector<24x16xf32>
    %c0_56 = arith.constant 0 : index
    %c16 = arith.constant 16 : index
    %124 = vector.load %arg19[%c0_56, %c16] : memref<24x64xf32, #tpu.memory_space<vmem>>, vector<24x16xf32>
    tpu.vector_store %arg19[%c0_56, %c16], %123 {strides = array<i32>} : memref<24x64xf32, #tpu.memory_space<vmem>>, vector<24x16xf32>,
    %125 = vector.extract_strided_slice %28 {offsets = [0, 32], sizes = [24, 16], strides = [1, 1]} : vector<24x64xf32> to vector<24x16xf32>
    %126 = vector.extract_strided_slice %30 {offsets = [0, 32], sizes = [24, 16], strides = [1, 1]} : vector<24x64xf32> to vector<24x16xf32>
    %127 = vector.extract_strided_slice %32 {offsets = [0, 32], sizes = [24, 16], strides = [1, 1]} : vector<24x64xf32> to vector<24x16xf32>
    %128 = tpu.transpose %126, [1, 0] : vector<24x16xf32> -> vector<16x24xf32>
    %cst_57 = arith.constant dense<0.000000e+00> : vector<24x24xf32>
    %129 = tpu.matmul %125, %128, %cst_57 {dimension_numbers = #tpu.dot_dimension_numbers<[1], [0], [0], [1], [0, 0, 1, 1], [], []>} : vector<24x16xf32>, vector<16x24xf32>, vector<24x24xf32> -> vector<24x24xf32>
    %cst_58 = arith.constant 2.500000e-01 : f32
    %130 = vector.broadcast %cst_58 : f32 to vector<24x24xf32>
    %131 = arith.mulf %129, %130 : vector<24x24xf32>
    %132 = arith.addf %131, %39 : vector<24x24xf32>
    %cst_59 = arith.constant dense<0xFF800000> : vector<24xf32>
    %133 = vector.multi_reduction <maximumf>, %132, %cst_59 [1] : vector<24x24xf32> to vector<24xf32>
    %134 = vector.shape_cast %133 : vector<24xf32> to vector<24x1xf32>
    %135 = vector.broadcast %134 : vector<24x1xf32> to vector<24x24xf32>
    %136 = arith.subf %132, %135 : vector<24x24xf32>
    %137 = math.exp %136 : vector<24x24xf32>
    %cst_60 = arith.constant dense<0.000000e+00> : vector<24xf32>
    %138 = vector.multi_reduction <add>, %137, %cst_60 [1] : vector<24x24xf32> to vector<24xf32>
    %139 = vector.shape_cast %138 : vector<24xf32> to vector<24x1xf32>
    %140 = tpu.reciprocal %139 {approx = true} : vector<24x1xf32> -> vector<24x1xf32>
    %141 = vector.broadcast %140 : vector<24x1xf32> to vector<24x24xf32>
    %142 = arith.mulf %137, %141 : vector<24x24xf32>
    %cst_61 = arith.constant dense<0.000000e+00> : vector<24x16xf32>
    %143 = tpu.matmul %142, %127, %cst_61 {dimension_numbers = #tpu.dot_dimension_numbers<[1], [0], [0], [1], [0, 0, 1, 1], [], []>} : vector<24x24xf32>, vector<24x16xf32>, vector<24x16xf32> -> vector<24x16xf32>
    %144 = vector.extract_strided_slice %34 {offsets = [0, 32], sizes = [24, 16], strides = [1, 1]} : vector<24x64xf32> to vector<24x16xf32>
    %145 = vector.extract_strided_slice %36 {offsets = [0, 32], sizes = [24, 16], strides = [1, 1]} : vector<24x64xf32> to vector<24x16xf32>
    %146 = vector.extract_strided_slice %38 {offsets = [0, 32], sizes = [24, 16], strides = [1, 1]} : vector<24x64xf32> to vector<24x16xf32>
    %147 = tpu.transpose %145, [1, 0] : vector<24x16xf32> -> vector<16x24xf32>
    %cst_62 = arith.constant dense<0.000000e+00> : vector<24x24xf32>
    %148 = tpu.matmul %144, %147, %cst_62 {dimension_numbers = #tpu.dot_dimension_numbers<[1], [0], [0], [1], [0, 0, 1, 1], [], []>} : vector<24x16xf32>, vector<16x24xf32>, vector<24x24xf32> -> vector<24x24xf32>
    %cst_63 = arith.constant 2.500000e-01 : f32
    %149 = vector.broadcast %cst_63 : f32 to vector<24x24xf32>
    %150 = arith.mulf %148, %149 : vector<24x24xf32>
    %151 = arith.addf %150, %40 : vector<24x24xf32>
    %cst_64 = arith.constant dense<0xFF800000> : vector<24xf32>
    %152 = vector.multi_reduction <maximumf>, %151, %cst_64 [1] : vector<24x24xf32> to vector<24xf32>
    %153 = vector.shape_cast %152 : vector<24xf32> to vector<24x1xf32>
    %154 = vector.broadcast %153 : vector<24x1xf32> to vector<24x24xf32>
    %155 = arith.subf %151, %154 : vector<24x24xf32>
    %156 = math.exp %155 : vector<24x24xf32>
    %cst_65 = arith.constant dense<0.000000e+00> : vector<24xf32>
    %157 = vector.multi_reduction <add>, %156, %cst_65 [1] : vector<24x24xf32> to vector<24xf32>
    %158 = vector.shape_cast %157 : vector<24xf32> to vector<24x1xf32>
    %159 = tpu.reciprocal %158 {approx = true} : vector<24x1xf32> -> vector<24x1xf32>
    %160 = vector.broadcast %159 : vector<24x1xf32> to vector<24x24xf32>
    %161 = arith.mulf %156, %160 : vector<24x24xf32>
    %cst_66 = arith.constant dense<0.000000e+00> : vector<24x16xf32>
    %162 = tpu.matmul %161, %146, %cst_66 {dimension_numbers = #tpu.dot_dimension_numbers<[1], [0], [0], [1], [0, 0, 1, 1], [], []>} : vector<24x24xf32>, vector<24x16xf32>, vector<24x16xf32> -> vector<24x16xf32>
    %163 = arith.addf %143, %162 : vector<24x16xf32>
    %cst_67 = arith.constant 5.000000e-01 : f32
    %164 = vector.broadcast %cst_67 : f32 to vector<24x16xf32>
    %165 = arith.mulf %164, %163 : vector<24x16xf32>
    %c0_68 = arith.constant 0 : index
    %c32 = arith.constant 32 : index
    %166 = vector.load %arg19[%c0_68, %c32] : memref<24x64xf32, #tpu.memory_space<vmem>>, vector<24x16xf32>
    tpu.vector_store %arg19[%c0_68, %c32], %165 {strides = array<i32>} : memref<24x64xf32, #tpu.memory_space<vmem>>, vector<24x16xf32>,
    %167 = vector.extract_strided_slice %28 {offsets = [0, 48], sizes = [24, 16], strides = [1, 1]} : vector<24x64xf32> to vector<24x16xf32>
    %168 = vector.extract_strided_slice %30 {offsets = [0, 48], sizes = [24, 16], strides = [1, 1]} : vector<24x64xf32> to vector<24x16xf32>
    %169 = vector.extract_strided_slice %32 {offsets = [0, 48], sizes = [24, 16], strides = [1, 1]} : vector<24x64xf32> to vector<24x16xf32>
    %170 = tpu.transpose %168, [1, 0] : vector<24x16xf32> -> vector<16x24xf32>
    %cst_69 = arith.constant dense<0.000000e+00> : vector<24x24xf32>
    %171 = tpu.matmul %167, %170, %cst_69 {dimension_numbers = #tpu.dot_dimension_numbers<[1], [0], [0], [1], [0, 0, 1, 1], [], []>} : vector<24x16xf32>, vector<16x24xf32>, vector<24x24xf32> -> vector<24x24xf32>
    %cst_70 = arith.constant 2.500000e-01 : f32
    %172 = vector.broadcast %cst_70 : f32 to vector<24x24xf32>
    %173 = arith.mulf %171, %172 : vector<24x24xf32>
    %174 = arith.addf %173, %39 : vector<24x24xf32>
    %cst_71 = arith.constant dense<0xFF800000> : vector<24xf32>
    %175 = vector.multi_reduction <maximumf>, %174, %cst_71 [1] : vector<24x24xf32> to vector<24xf32>
    %176 = vector.shape_cast %175 : vector<24xf32> to vector<24x1xf32>
    %177 = vector.broadcast %176 : vector<24x1xf32> to vector<24x24xf32>
    %178 = arith.subf %174, %177 : vector<24x24xf32>
    %179 = math.exp %178 : vector<24x24xf32>
    %cst_72 = arith.constant dense<0.000000e+00> : vector<24xf32>
    %180 = vector.multi_reduction <add>, %179, %cst_72 [1] : vector<24x24xf32> to vector<24xf32>
    %181 = vector.shape_cast %180 : vector<24xf32> to vector<24x1xf32>
    %182 = tpu.reciprocal %181 {approx = true} : vector<24x1xf32> -> vector<24x1xf32>
    %183 = vector.broadcast %182 : vector<24x1xf32> to vector<24x24xf32>
    %184 = arith.mulf %179, %183 : vector<24x24xf32>
    %cst_73 = arith.constant dense<0.000000e+00> : vector<24x16xf32>
    %185 = tpu.matmul %184, %169, %cst_73 {dimension_numbers = #tpu.dot_dimension_numbers<[1], [0], [0], [1], [0, 0, 1, 1], [], []>} : vector<24x24xf32>, vector<24x16xf32>, vector<24x16xf32> -> vector<24x16xf32>
    %186 = vector.extract_strided_slice %34 {offsets = [0, 48], sizes = [24, 16], strides = [1, 1]} : vector<24x64xf32> to vector<24x16xf32>
    %187 = vector.extract_strided_slice %36 {offsets = [0, 48], sizes = [24, 16], strides = [1, 1]} : vector<24x64xf32> to vector<24x16xf32>
    %188 = vector.extract_strided_slice %38 {offsets = [0, 48], sizes = [24, 16], strides = [1, 1]} : vector<24x64xf32> to vector<24x16xf32>
    %189 = tpu.transpose %187, [1, 0] : vector<24x16xf32> -> vector<16x24xf32>
    %cst_74 = arith.constant dense<0.000000e+00> : vector<24x24xf32>
    %190 = tpu.matmul %186, %189, %cst_74 {dimension_numbers = #tpu.dot_dimension_numbers<[1], [0], [0], [1], [0, 0, 1, 1], [], []>} : vector<24x16xf32>, vector<16x24xf32>, vector<24x24xf32> -> vector<24x24xf32>
    %cst_75 = arith.constant 2.500000e-01 : f32
    %191 = vector.broadcast %cst_75 : f32 to vector<24x24xf32>
    %192 = arith.mulf %190, %191 : vector<24x24xf32>
    %193 = arith.addf %192, %40 : vector<24x24xf32>
    %cst_76 = arith.constant dense<0xFF800000> : vector<24xf32>
    %194 = vector.multi_reduction <maximumf>, %193, %cst_76 [1] : vector<24x24xf32> to vector<24xf32>
    %195 = vector.shape_cast %194 : vector<24xf32> to vector<24x1xf32>
    %196 = vector.broadcast %195 : vector<24x1xf32> to vector<24x24xf32>
    %197 = arith.subf %193, %196 : vector<24x24xf32>
    %198 = math.exp %197 : vector<24x24xf32>
    %cst_77 = arith.constant dense<0.000000e+00> : vector<24xf32>
    %199 = vector.multi_reduction <add>, %198, %cst_77 [1] : vector<24x24xf32> to vector<24xf32>
    %200 = vector.shape_cast %199 : vector<24xf32> to vector<24x1xf32>
    %201 = tpu.reciprocal %200 {approx = true} : vector<24x1xf32> -> vector<24x1xf32>
    %202 = vector.broadcast %201 : vector<24x1xf32> to vector<24x24xf32>
    %203 = arith.mulf %198, %202 : vector<24x24xf32>
    %cst_78 = arith.constant dense<0.000000e+00> : vector<24x16xf32>
    %204 = tpu.matmul %203, %188, %cst_78 {dimension_numbers = #tpu.dot_dimension_numbers<[1], [0], [0], [1], [0, 0, 1, 1], [], []>} : vector<24x24xf32>, vector<24x16xf32>, vector<24x16xf32> -> vector<24x16xf32>
    %205 = arith.addf %185, %204 : vector<24x16xf32>
    %cst_79 = arith.constant 5.000000e-01 : f32
    %206 = vector.broadcast %cst_79 : f32 to vector<24x16xf32>
    %207 = arith.mulf %206, %205 : vector<24x16xf32>
    %c0_80 = arith.constant 0 : index
    %c48 = arith.constant 48 : index
    %208 = vector.load %arg19[%c0_80, %c48] : memref<24x64xf32, #tpu.memory_space<vmem>>, vector<24x16xf32>
    tpu.vector_store %arg19[%c0_80, %c48], %207 {strides = array<i32>} : memref<24x64xf32, #tpu.memory_space<vmem>>, vector<24x16xf32>,
    %c0_81 = arith.constant 0 : index
    %c0_82 = arith.constant 0 : index
    %209 = vector.load %arg19[%c0_81, %c0_82] : memref<24x64xf32, #tpu.memory_space<vmem>>, vector<24x64xf32>
    %210 = arith.addf %209, %25 : vector<24x64xf32>
    %c0_83 = arith.constant 0 : index
    %c0_84 = arith.constant 0 : index
    %211 = vector.load %arg12[%c0_83, %c0_84] : memref<1x64xf32, #tpu.memory_space<vmem>>, vector<1x64xf32>
    %c0_85 = arith.constant 0 : index
    %c0_86 = arith.constant 0 : index
    %212 = vector.load %arg13[%c0_85, %c0_86] : memref<1x64xf32, #tpu.memory_space<vmem>>, vector<1x64xf32>
    %cst_87 = arith.constant dense<0.000000e+00> : vector<24xf32>
    %213 = vector.multi_reduction <add>, %210, %cst_87 [1] : vector<24x64xf32> to vector<24xf32>
    %214 = vector.shape_cast %213 : vector<24xf32> to vector<24x1xf32>
    %cst_88 = arith.constant 6.400000e+01 : f32
    %215 = vector.broadcast %cst_88 : f32 to vector<24x1xf32>
    %216 = arith.divf %214, %215 : vector<24x1xf32>
    %217 = vector.broadcast %216 : vector<24x1xf32> to vector<24x64xf32>
    %218 = arith.subf %210, %217 : vector<24x64xf32>
    %219 = arith.mulf %218, %218 : vector<24x64xf32>
    %cst_89 = arith.constant dense<0.000000e+00> : vector<24xf32>
    %220 = vector.multi_reduction <add>, %219, %cst_89 [1] : vector<24x64xf32> to vector<24xf32>
    %221 = vector.shape_cast %220 : vector<24xf32> to vector<24x1xf32>
    %cst_90 = arith.constant 6.400000e+01 : f32
    %222 = vector.broadcast %cst_90 : f32 to vector<24x1xf32>
    %223 = arith.divf %221, %222 : vector<24x1xf32>
    %224 = vector.broadcast %216 : vector<24x1xf32> to vector<24x64xf32>
    %225 = arith.subf %210, %224 : vector<24x64xf32>
    %cst_91 = arith.constant 9.99999997E-7 : f32
    %226 = vector.broadcast %cst_91 : f32 to vector<24x1xf32>
    %227 = arith.addf %223, %226 : vector<24x1xf32>
    %228 = math.rsqrt %227 : vector<24x1xf32>
    %229 = vector.broadcast %228 : vector<24x1xf32> to vector<24x64xf32>
    %230 = arith.mulf %225, %229 : vector<24x64xf32>
    %231 = vector.broadcast %211 : vector<1x64xf32> to vector<24x64xf32>
    %232 = arith.mulf %230, %231 : vector<24x64xf32>
    %233 = vector.broadcast %212 : vector<1x64xf32> to vector<24x64xf32>
    %234 = arith.addf %232, %233 : vector<24x64xf32>
    %235 = arith.truncf %234 : vector<24x64xf32> to vector<24x64xbf16>
    %c0_92 = arith.constant 0 : index
    %c0_93 = arith.constant 0 : index
    %236 = vector.load %arg14[%c0_92, %c0_93] : memref<64x128xbf16, #tpu.memory_space<vmem>>, vector<64x128xbf16>
    %cst_94 = arith.constant dense<0.000000e+00> : vector<24x128xf32>
    %237 = tpu.matmul %235, %236, %cst_94 {dimension_numbers = #tpu.dot_dimension_numbers<[1], [0], [0], [1], [0, 0, 1, 1], [], []>} : vector<24x64xbf16>, vector<64x128xbf16>, vector<24x128xf32> -> vector<24x128xf32>
    %c0_95 = arith.constant 0 : index
    %c0_96 = arith.constant 0 : index
    %238 = vector.load %arg15[%c0_95, %c0_96] : memref<1x128xf32, #tpu.memory_space<vmem>>, vector<1x128xf32>
    %239 = vector.broadcast %238 : vector<1x128xf32> to vector<24x128xf32>
    %240 = arith.addf %237, %239 : vector<24x128xf32>
    %241 = arith.mulf %240, %240 : vector<24x128xf32>
    %242 = arith.mulf %240, %241 : vector<24x128xf32>
    %cst_97 = arith.constant 4.471500e-02 : f32
    %243 = vector.broadcast %cst_97 : f32 to vector<24x128xf32>
    %244 = arith.mulf %243, %242 : vector<24x128xf32>
    %245 = arith.addf %240, %244 : vector<24x128xf32>
    %cst_98 = arith.constant 0.797884583 : f32
    %246 = vector.broadcast %cst_98 : f32 to vector<24x128xf32>
    %247 = arith.mulf %246, %245 : vector<24x128xf32>
    %248 = math.tanh %247 : vector<24x128xf32>
    %cst_99 = arith.constant 1.000000e+00 : f32
    %249 = vector.broadcast %cst_99 : f32 to vector<24x128xf32>
    %250 = arith.addf %249, %248 : vector<24x128xf32>
    %cst_100 = arith.constant 5.000000e-01 : f32
    %251 = vector.broadcast %cst_100 : f32 to vector<24x128xf32>
    %252 = arith.mulf %251, %250 : vector<24x128xf32>
    %253 = arith.mulf %240, %252 : vector<24x128xf32>
    %254 = arith.truncf %253 : vector<24x128xf32> to vector<24x128xbf16>
    %c0_101 = arith.constant 0 : index
    %c0_102 = arith.constant 0 : index
    %255 = vector.load %arg16[%c0_101, %c0_102] : memref<128x64xbf16, #tpu.memory_space<vmem>>, vector<128x64xbf16>
    %cst_103 = arith.constant dense<0.000000e+00> : vector<24x64xf32>
    %256 = tpu.matmul %254, %255, %cst_103 {dimension_numbers = #tpu.dot_dimension_numbers<[1], [0], [0], [1], [0, 0, 1, 1], [], []>} : vector<24x128xbf16>, vector<128x64xbf16>, vector<24x64xf32> -> vector<24x64xf32>
    %c0_104 = arith.constant 0 : index
    %c0_105 = arith.constant 0 : index
    %257 = vector.load %arg17[%c0_104, %c0_105] : memref<1x64xf32, #tpu.memory_space<vmem>>, vector<1x64xf32>
    %258 = vector.broadcast %257 : vector<1x64xf32> to vector<24x64xf32>
    %259 = arith.addf %256, %258 : vector<24x64xf32>
    %260 = arith.addf %259, %210 : vector<24x64xf32>
    %c0_106 = arith.constant 0 : index
    %c0_107 = arith.constant 0 : index
    %c0_108 = arith.constant 0 : index
    %261 = vector.load %arg18[%c0_106, %c0_107, %c0_108] : memref<1x24x64xf32, #tpu.memory_space<vmem>>, vector<1x24x64xf32>
    %262 = vector.shape_cast %261 : vector<1x24x64xf32> to vector<24x64xf32>
    %263 = vector.shape_cast %260 : vector<24x64xf32> to vector<1x24x64xf32>
    tpu.vector_store %arg18[%c0_106, %c0_107, %c0_108], %263 {strides = array<i32>} : memref<1x24x64xf32, #tpu.memory_space<vmem>>, vector<1x24x64xf32>,
    return
  }
  func.func @transform_0(%arg0: i32) -> (i32, i32, i32) {
    %c0_i32 = arith.constant 0 : i32
    %c0_i32_0 = arith.constant 0 : i32
    %c0_i32_1 = arith.constant 0 : i32
    return %arg0, %c0_i32, %c0_i32_0 : i32, i32, i32
  }
  func.func @transform_1(%arg0: i32) -> (i32, i32) {
    %c0_i32 = arith.constant 0 : i32
    %c0_i32_0 = arith.constant 0 : i32
    %c0_i32_1 = arith.constant 0 : i32
    return %c0_i32, %c0_i32_0 : i32, i32
  }
  func.func @transform_2(%arg0: i32) -> (i32, i32) {
    %c0_i32 = arith.constant 0 : i32
    %c0_i32_0 = arith.constant 0 : i32
    %c0_i32_1 = arith.constant 0 : i32
    return %c0_i32, %c0_i32_0 : i32, i32
  }
  func.func @transform_3(%arg0: i32) -> (i32, i32) {
    %c0_i32 = arith.constant 0 : i32
    %c0_i32_0 = arith.constant 0 : i32
    %c0_i32_1 = arith.constant 0 : i32
    return %c0_i32, %c0_i32_0 : i32, i32
  }
  func.func @transform_4(%arg0: i32) -> (i32, i32) {
    %c0_i32 = arith.constant 0 : i32
    %c0_i32_0 = arith.constant 0 : i32
    %c0_i32_1 = arith.constant 0 : i32
    return %c0_i32, %c0_i32_0 : i32, i32
  }
  func.func @transform_5(%arg0: i32) -> (i32, i32) {
    %c0_i32 = arith.constant 0 : i32
    %c0_i32_0 = arith.constant 0 : i32
    %c0_i32_1 = arith.constant 0 : i32
    return %c0_i32, %c0_i32_0 : i32, i32
  }
  func.func @transform_6(%arg0: i32) -> (i32, i32) {
    %c0_i32 = arith.constant 0 : i32
    %c0_i32_0 = arith.constant 0 : i32
    %c0_i32_1 = arith.constant 0 : i32
    return %c0_i32, %c0_i32_0 : i32, i32
  }
  func.func @transform_7(%arg0: i32) -> (i32, i32) {
    %c0_i32 = arith.constant 0 : i32
    %c0_i32_0 = arith.constant 0 : i32
    %c0_i32_1 = arith.constant 0 : i32
    return %c0_i32, %c0_i32_0 : i32, i32
  }
  func.func @transform_8(%arg0: i32) -> (i32, i32) {
    %c0_i32 = arith.constant 0 : i32
    %c0_i32_0 = arith.constant 0 : i32
    %c0_i32_1 = arith.constant 0 : i32
    return %c0_i32, %c0_i32_0 : i32, i32
  }
  func.func @transform_9(%arg0: i32) -> (i32, i32) {
    %c0_i32 = arith.constant 0 : i32
    %c0_i32_0 = arith.constant 0 : i32
    %c0_i32_1 = arith.constant 0 : i32
    return %c0_i32, %c0_i32_0 : i32, i32
  }
  func.func @transform_10(%arg0: i32) -> (i32, i32) {
    %c0_i32 = arith.constant 0 : i32
    %c0_i32_0 = arith.constant 0 : i32
    %c0_i32_1 = arith.constant 0 : i32
    return %c0_i32, %c0_i32_0 : i32, i32
  }
  func.func @transform_11(%arg0: i32) -> (i32, i32) {
    %c0_i32 = arith.constant 0 : i32
    %c0_i32_0 = arith.constant 0 : i32
    %c0_i32_1 = arith.constant 0 : i32
    return %c0_i32, %c0_i32_0 : i32, i32
  }
  func.func @transform_12(%arg0: i32) -> (i32, i32) {
    %c0_i32 = arith.constant 0 : i32
    %c0_i32_0 = arith.constant 0 : i32
    %c0_i32_1 = arith.constant 0 : i32
    return %c0_i32, %c0_i32_0 : i32, i32
  }
  func.func @transform_13(%arg0: i32) -> (i32, i32) {
    %c0_i32 = arith.constant 0 : i32
    %c0_i32_0 = arith.constant 0 : i32
    %c0_i32_1 = arith.constant 0 : i32
    return %c0_i32, %c0_i32_0 : i32, i32
  }
  func.func @transform_14(%arg0: i32) -> (i32, i32) {
    %c0_i32 = arith.constant 0 : i32
    %c0_i32_0 = arith.constant 0 : i32
    %c0_i32_1 = arith.constant 0 : i32
    return %c0_i32, %c0_i32_0 : i32, i32
  }
  func.func @transform_15(%arg0: i32) -> (i32, i32) {
    %c0_i32 = arith.constant 0 : i32
    %c0_i32_0 = arith.constant 0 : i32
    %c0_i32_1 = arith.constant 0 : i32
    return %c0_i32, %c0_i32_0 : i32, i32
  }
  func.func @transform_16(%arg0: i32) -> (i32, i32) {
    %c0_i32 = arith.constant 0 : i32
    %c0_i32_0 = arith.constant 0 : i32
    %c0_i32_1 = arith.constant 0 : i32
    return %c0_i32, %c0_i32_0 : i32, i32
  }
  func.func @transform_17(%arg0: i32) -> (i32, i32, i32) {
    %c0_i32 = arith.constant 0 : i32
    %c0_i32_0 = arith.constant 0 : i32
    %c0_i32_1 = arith.constant 0 : i32
    return %arg0, %c0_i32, %c0_i32_0 : i32, i32, i32
  }
}

module attributes {stable_mosaic.version = 11 : i64} {
  func.func @_out_proj_kernel(%arg0: i32, %arg1: memref<1x24x64xf32, #tpu.memory_space<vmem>>, %arg2: memref<64x32xbf16, #tpu.memory_space<vmem>>, %arg3: memref<1x32xf32, #tpu.memory_space<vmem>>, %arg4: memref<1x24x32xf32, #tpu.memory_space<vmem>>) attributes {dimension_semantics = [#tpu.dimension_semantics<parallel>], iteration_bounds = array<i64: 2>, scalar_prefetch = 0 : i64, scratch_operands = 0 : i64, tpu.core_type = #tpu.core_type<tc>, window_params = [{transform_indices = @transform_0, window_bounds = array<i64: 1, 24, 64>}, {pipeline_mode = #tpu.pipeline_mode<synchronous>, transform_indices = @transform_1, window_bounds = array<i64: 64, 32>}, {pipeline_mode = #tpu.pipeline_mode<synchronous>, transform_indices = @transform_2, window_bounds = array<i64: 1, 32>}, {transform_indices = @transform_3, window_bounds = array<i64: 1, 24, 32>}]} {
    %c0 = arith.constant 0 : index
    %c0_0 = arith.constant 0 : index
    %c0_1 = arith.constant 0 : index
    %0 = vector.load %arg1[%c0, %c0_0, %c0_1] : memref<1x24x64xf32, #tpu.memory_space<vmem>>, vector<1x24x64xf32>
    %1 = vector.shape_cast %0 : vector<1x24x64xf32> to vector<24x64xf32>
    %2 = arith.truncf %1 : vector<24x64xf32> to vector<24x64xbf16>
    %c0_2 = arith.constant 0 : index
    %c0_3 = arith.constant 0 : index
    %3 = vector.load %arg2[%c0_2, %c0_3] : memref<64x32xbf16, #tpu.memory_space<vmem>>, vector<64x32xbf16>
    %cst = arith.constant dense<0.000000e+00> : vector<24x32xf32>
    %4 = tpu.matmul %2, %3, %cst {dimension_numbers = #tpu.dot_dimension_numbers<[1], [0], [0], [1], [0, 0, 1, 1], [], []>} : vector<24x64xbf16>, vector<64x32xbf16>, vector<24x32xf32> -> vector<24x32xf32>
    %c0_4 = arith.constant 0 : index
    %c0_5 = arith.constant 0 : index
    %5 = vector.load %arg3[%c0_4, %c0_5] : memref<1x32xf32, #tpu.memory_space<vmem>>, vector<1x32xf32>
    %6 = vector.broadcast %5 : vector<1x32xf32> to vector<24x32xf32>
    %7 = arith.addf %4, %6 : vector<24x32xf32>
    %c0_6 = arith.constant 0 : index
    %c0_7 = arith.constant 0 : index
    %c0_8 = arith.constant 0 : index
    %8 = vector.load %arg4[%c0_6, %c0_7, %c0_8] : memref<1x24x32xf32, #tpu.memory_space<vmem>>, vector<1x24x32xf32>
    %9 = vector.shape_cast %8 : vector<1x24x32xf32> to vector<24x32xf32>
    %10 = vector.shape_cast %7 : vector<24x32xf32> to vector<1x24x32xf32>
    tpu.vector_store %arg4[%c0_6, %c0_7, %c0_8], %10 {strides = array<i32>} : memref<1x24x32xf32, #tpu.memory_space<vmem>>, vector<1x24x32xf32>,
    return
  }
  func.func @transform_0(%arg0: i32) -> (i32, i32, i32) {
    %c0_i32 = arith.constant 0 : i32
    %c0_i32_0 = arith.constant 0 : i32
    %c0_i32_1 = arith.constant 0 : i32
    return %arg0, %c0_i32, %c0_i32_0 : i32, i32, i32
  }
  func.func @transform_1(%arg0: i32) -> (i32, i32) {
    %c0_i32 = arith.constant 0 : i32
    %c0_i32_0 = arith.constant 0 : i32
    %c0_i32_1 = arith.constant 0 : i32
    return %c0_i32, %c0_i32_0 : i32, i32
  }
  func.func @transform_2(%arg0: i32) -> (i32, i32) {
    %c0_i32 = arith.constant 0 : i32
    %c0_i32_0 = arith.constant 0 : i32
    %c0_i32_1 = arith.constant 0 : i32
    return %c0_i32, %c0_i32_0 : i32, i32
  }
  func.func @transform_3(%arg0: i32) -> (i32, i32, i32) {
    %c0_i32 = arith.constant 0 : i32
    %c0_i32_0 = arith.constant 0 : i32
    %c0_i32_1 = arith.constant 0 : i32
    return %arg0, %c0_i32, %c0_i32_0 : i32, i32, i32
  }
}

</mosaic_0001>

<bundles_post_ra>
// kernel: ocvp_par_forward.4
= control target key start
LH: loop header
LB: loop body
LE: loop exit
PB: predicated region body
PF: predicated region fallthrough
CT: control target
= control target key end

     0   :  { %9 = vsyncpa [#allocation3], 0  ;;  %s461_s15 = smov 0   ;;  %s493_s0 = inlined_call_operand.vmem [shape: f32[2,24,32], index: 0, kind: input, shape index: {}]   ;;  %s494_s1 = inlined_call_operand.hbm [shape: bf16[32,64], index: 1, kind: input, shape index: {}]   ;;  %s495_s2 = inlined_call_operand.vmem [shape: f32[1,64], index: 2, kind: input, shape index: {}]   ;;  %s496_s3 = inlined_call_operand.vmem [shape: f32[24,64], index: 3, kind: input, shape index: {}]   ;;  %s497_s4 = inlined_call_operand.vmem [shape: f32[2,24,64], index: 4, kind: output, shape index: {}]  }
   0x1 LB: > { %s146_s18 = sshll.u32 %s494_s1, 4  ;;  %s343_s19 = sadd.s32 4294967295, %s431_s15   ;;  %s431_s15 = sphi %s461_s15, %s15_s15   ;;  %s147_s18 = int_to_ptr.hbm [resolvable:$true] %s146_s18 }
   0x2   : > { %p345_p0 = scmp.ge.s32.totalorder %s431_s15, 1  ;;  %p135_p1 = scmp.lt.s32.totalorder %s431_s15, 3 }
   0x3   : > { %p377_p2 = scmp.eq.s32.totalorder %s343_s19, 0  ;;  %s433_s20 = smov [#allocation2]  }
   0x4   : > { %p136_p3 = pnand %p345_p0, %p135_p1  ;;  %s148_s21 = sshll.u32 %s433_s20, 4  ;;  %s149_s21 = int_to_ptr.vmem [resolvable:$true] %s148_s21 }
   0x5   : > { %s434_s22 = smov 64   ;;  %s435_s23 = smov 4  }
   0x6   : > { %p373_p4 = pneg %p136_p3  ;;  %178 = sbr.rel (%p136_p3) target bundleno = 160 (0xa0), region = 36 }
   0x8   : > { %p374_p5 = pnand %p377_p2, %p373_p4 }
   0xa   : > { %376 = dma.hbm_to_vmem [thread:$0]  (!%p374_p5), %s147_s18, 256, %s149_s21, [#allocation3], %s434_s22, %s434_s22, %s435_s23  }
   0xb   : > { %426 = dma.done.wait (%p377_p2), [#allocation3], 256  }
   0xc   : > { %428 = vsyncadd (%p377_p2), [#allocation3], 4294967040  ;;  %p205_p6 = scmp.lt.s32.totalorder %s343_s19, 1  ;;  %v365_v0 = vld [vmem:[#allocation2 + $0x8] sm:$0xff]  ;;  %v364_v1 = vld [vmem:[#allocation2] sm:$0xff]  ;;  %vm241_vm0 = vcmask 261120  }
   0xd   : > { %254 = vmatpush.bf16.msra.mxu0 %v365_v0  ;;  %366 = vmatpush.bf16.msra.mxu1 %v365_v0  ;;  %v390_v7 = vld [vmem:[%s495_s2] ss:$0 sm:$0xff]  ;;  %v268_v11 = vld [vmem:[%s496_s3 + $0x10] sm:$0xff]  ;;  %vm272_vm1 = vcmask 523264   ;;  %v267_v17 = vld [vmem:[%s496_s3 + $0x8] sm:$0xff] }
   0xe   : > { %s499_s19 = smov (!%p205_p6, %s343_s19), 1  ;;  %v266_v9 = vld [vmem:[%s496_s3] sm:$0xff] }
   0xf   : > { %s368_s24 = smul.u32 24, %s499_s19 }
  0x11   : > { %s209_s27 = scalar_lea.vmem %s493_s0, %s368_s24  ;;  %255 = vmatpush.bf16.msra.mxu0 %v364_v1  ;;  %367 = vmatpush.bf16.msra.mxu1 %v364_v1  ;;  %s214_s10 = scalar_lea.vmem %s497_s4, %s368_s24 }
  0x12   : > { %v216_v2 = vld [vmem:[%s209_s27] sm:$0xff]  ;;  %v217_v3 = vld [vmem:[%s209_s27 + $0x8] sm:$0xff]  ;;  %v218_v4 = vld [vmem:[%s209_s27 + $0x10] sm:$0xff] }
  0x13   : > { %v219_v5 = vpack.c.bf16 %v217_v3, %v216_v2  ;;  %v220_v6 = vpack.c.bf16 %v218_v4, %v218_v4 }
  0x15   : > { %360 = vmatmul.msk.bf16.vlgmr.msra.gmra.mxu0 %vm241_vm0, %v219_v5  ;;  %361 = vmatmul.msk.bf16.vlgmr.msra.gmra.mxu1 %vm241_vm0, %v220_v6 }
  0x92   : > { %v257_v8 = vpop.f32.mrf.mxu0  ;;  %v262_v10 = vpop.f32.mrf.mxu1 }
  0x93   : > { %v258_v12 = vadd.f32 %v390_v7, %v257_v8  ;;  %v263_v13 = vadd.f32 %v390_v7, %v262_v10 }
  0x95   : > { %v269_v14 = vadd.f32 %v266_v9, %v258_v12  ;;  %v271_v15 = vadd.f32 %v268_v11, %v263_v13 }
  0x97   : > { %273 = vst.msk [vmem:[%s214_s10] sm:$0xff] %vm272_vm1, %v269_v14 }
  0x98   : > { %275 = vst.msk [vmem:[%s214_s10 + $0x10] sm:$0xff] %vm272_vm1, %v271_v15 }
  0x9a   : > { %v259_v16 = vpop.f32.mrf.mxu0  ;;  %v264_v18 = vpop.f32.mrf.mxu1 }
  0x9b   : > { %v260_v19 = vadd.f32 %v390_v7, %v259_v16 }
  0x9d   : > { %v270_v20 = vadd.f32 %v267_v17, %v260_v19 }
  0x9f   : > { %274 = vst.msk [vmem:[%s214_s10 + $0x8] sm:$0xff] %vm272_vm1, %v270_v20 }
  0xa0 PF: > { %s15_s15 = sadd.s32 1, %s431_s15  }
  0xa1   : > { %p12_p7 = scmp.ge.s32.totalorder %s15_s15, 4  }
  0xa3   :  { %14 = sbr.rel (!%p12_p7) target bundleno = 1 (0x1), region = 71 }
  0xa8   :  { %297 = vsyncpa [#allocation3], 1 }
  0xa9   :  { %299 = vsyncpa [#allocation3 + $0x1], 1 }

// kernel: ocvp_par_forward.7
= control target key start
LH: loop header
LB: loop body
LE: loop exit
PB: predicated region body
PF: predicated region fallthrough
CT: control target
= control target key end

     0   :  { %s370_s12 = smov 0   ;;  %s402_s0 = inlined_call_operand.vmem [shape: f32[2,24,64], index: 0, kind: input, shape index: {}]   ;;  %s403_s1 = inlined_call_operand.vmem [shape: bf16[64,32], index: 1, kind: input, shape index: {}]   ;;  %s404_s2 = inlined_call_operand.vmem [shape: f32[1,32], index: 2, kind: input, shape index: {}]   ;;  %s405_s3 = inlined_call_operand.vmem [shape: f32[2,24,32], index: 3, kind: output, shape index: {}]  }
   0x1 LB: > { %s297_s13 = sadd.s32 4294967295, %s348_s12   ;;  %p301_p0 = scmp.ge.s32.totalorder %s348_s12, 1  ;;  %s348_s12 = sphi %s370_s12, %s13_s12  }
   0x2   : > { %p137_p1 = scmp.lt.s32.totalorder %s348_s12, 3 }
   0x4   : > { %p138_p2 = pnand %p301_p0, %p137_p1 }
   0x5   : > { %p161_p3 = scmp.lt.s32.totalorder (!%p138_p2), %s297_s13, 1 }
   0x6   : > { %141 = sbr.rel (%p138_p2) target bundleno = 164 (0xa4), region = 32 }
   0xb   : > { %v327_v0 = vld [vmem:[%s403_s1 + $0x18] sm:$0xff]  ;;  %v326_v1 = vld [vmem:[%s403_s1 + $0x10] sm:$0xff]  ;;  %s407_s13 = smov (!%p161_p3, %s297_s13), 1  ;;  %v325_v2 = vld [vmem:[%s403_s1 + $0x8] sm:$0xff]  ;;  %vm213_vm0 = vcmask 523264   ;;  %vm238_vm1 = vcmask 261120  }
   0xc   : > { %224 = vmatpush.bf16.msra.mxu0 %v327_v0  ;;  %328 = vmatpush.bf16.msra.mxu1 %v327_v0  ;;  %s332_s18 = smul.u32 24, %s407_s13  ;;  %v324_v3 = vld [vmem:[%s403_s1] sm:$0xff] }
   0xd   : > { %v341_v9 = vld [vmem:[%s404_s2] ss:$0 sm:$0xff] }
   0xe   : > { %s165_s23 = scalar_lea.vmem %s402_s0, %s332_s18  ;;  %s170_s30 = scalar_lea.vmem %s405_s3, %s332_s18 }
   0xf   : > { %v172_v4 = vld [vmem:[%s165_s23] sm:$0xff]  ;;  %v173_v5 = vld [vmem:[%s165_s23 + $0x8] sm:$0xff]  ;;  %v174_v6 = vld [vmem:[%s165_s23 + $0x10] sm:$0xff] }
  0x10   : > { %225 = vmatpush.bf16.msra.mxu0 %v326_v1  ;;  %329 = vmatpush.bf16.msra.mxu1 %v326_v1  ;;  %v175_v7 = vpack.c.bf16 %v173_v5, %v172_v4  ;;  %v176_v8 = vpack.c.bf16 %v174_v6, %v174_v6 }
  0x14   : > { %226 = vmatpush.bf16.msra.mxu0 %v325_v2  ;;  %330 = vmatpush.bf16.msra.mxu1 %v325_v2 }
  0x18   : > { %227 = vmatpush.bf16.msra.mxu0 %v324_v3  ;;  %331 = vmatpush.bf16.msra.mxu1 %v324_v3 }
  0x1b   : > { %320 = vmatmul.msk.bf16.vlgmr.msra.gmra.mxu0 %vm213_vm0, %v175_v7  ;;  %321 = vmatmul.msk.bf16.vlgmr.msra.gmra.mxu1 %vm213_vm0, %v176_v8 }
  0x98   : > { %v229_v10 = vpop.f32.mrf.mxu0  ;;  %v234_v11 = vpop.f32.mrf.mxu1 }
  0x99   : > { %v230_v12 = vadd.f32 %v341_v9, %v229_v10  ;;  %v235_v13 = vadd.f32 %v341_v9, %v234_v11 }
  0x9b   : > { %239 = vst.msk [vmem:[%s170_s30] sm:$0xff] %vm238_vm1, %v230_v12 }
  0x9c   : > { %241 = vst.msk [vmem:[%s170_s30 + $0x10] sm:$0xff] %vm238_vm1, %v235_v13 }
  0xa0   : > { %v231_v14 = vpop.f32.mrf.mxu0  ;;  %v236_v15 = vpop.f32.mrf.mxu1 }
  0xa1   : > { %v232_v16 = vadd.f32 %v341_v9, %v231_v14 }
  0xa3   : > { %240 = vst.msk [vmem:[%s170_s30 + $0x8] sm:$0xff] %vm238_vm1, %v232_v16 }
  0xa4 PF: > { %s13_s12 = sadd.s32 1, %s348_s12  }
  0xa5   : > { %p10_p4 = scmp.ge.s32.totalorder %s13_s12, 4  }
  0xa7   :  { %12 = sbr.rel (!%p10_p4) target bundleno = 1 (0x1), region = 62 }

// kernel: ocvp_par_forward.6
= control target key start
LH: loop header
LB: loop body
LE: loop exit
PB: predicated region body
PF: predicated region fallthrough
CT: control target
= control target key end

     0   :  { %s3806_s0 = inlined_call_operand.vmem [shape: f32[2,24,64], index: 0, kind: input, shape index: {}]   ;;  %s3807_s1 = inlined_call_operand.vmem [shape: f32[1,64], index: 1, kind: input, shape index: {}]   ;;  %s3808_s2 = inlined_call_operand.vmem [shape: f32[1,64], index: 2, kind: input, shape index: {}]   ;;  %s3809_s3 = inlined_call_operand.vmem [shape: bf16[64,64], index: 3, kind: input, shape index: {}]   ;;  %s3810_s4 = inlined_call_operand.vmem [shape: bf16[64,64], index: 4, kind: input, shape index: {}]   ;;  %s3811_s5 = inlined_call_operand.vmem [shape: bf16[64,64], index: 5, kind: input, shape index: {}]   ;;  %s3812_s6 = inlined_call_operand.vmem [shape: bf16[64,64], index: 6, kind: input, shape index: {}]   ;;  %s3813_s7 = inlined_call_operand.vmem [shape: bf16[64,64], index: 7, kind: input, shape index: {}]   ;;  %s3814_s8 = inlined_call_operand.vmem [shape: bf16[64,64], index: 8, kind: input, shape index: {}]   ;;  %s3815_s9 = inlined_call_operand.vmem [shape: f32[24,24], index: 9, kind: input, shape index: {}]   ;;  %s3816_s10 = inlined_call_operand.vmem [shape: f32[24,24], index: 10, kind: input, shape index: {}]   ;;  %s3817_s11 = inlined_call_operand.vmem [shape: f32[1,64], index: 11, kind: input, shape index: {}]   ;;  %s3818_s12 = inlined_call_operand.vmem [shape: f32[1,64], index: 12, kind: input, shape index: {}]   ;;  %s3819_s13 = inlined_call_operand.hbm [shape: bf16[64,128], index: 13, kind: input, shape index: {}]   ;;  %s3820_s14 = inlined_call_operand.vmem [shape: f32[1,128], index: 14, kind: input, shape index: {}]   ;;  %s3821_s15 = inlined_call_operand.vmem [shape: bf16[128,64], index: 15, kind: input, shape index: {}]   ;;  %s3822_s16 = inlined_call_operand.vmem [shape: f32[1,64], index: 16, kind: input, shape index: {}]   ;;  %s3823_s17 = inlined_call_operand.vmem [shape: f32[2,24,64], index: 17, kind: output, shape index: {}]  }
   0x1   :  { %3824 = sst [smem:[#allocation6_spill]] %s3806_s0 }
   0x2   :  { %3825 = sst [smem:[#allocation7_spill]] %s3807_s1 }
   0x3   :  { %22 = vsyncpa [#allocation4], 0  ;;  %s3035_s24 = smov 0  }
   0x4 LB: > { %s468_s27 = sshll.u32 %s3819_s13, 4  ;;  %s2413_s28 = sadd.s32 4294967295, %s2933_s24   ;;  %s2933_s24 = sphi %s3035_s24, %s28_s24   ;;  %s469_s27 = int_to_ptr.hbm [resolvable:$true] %s468_s27 }
   0x5   : > { %p2415_p0 = scmp.ge.s32.totalorder %s2933_s24, 1  ;;  %p421_p1 = scmp.lt.s32.totalorder %s2933_s24, 3 }
   0x6   : > { %p2706_p2 = scmp.eq.s32.totalorder %s2413_s28, 0  ;;  %s2935_s29 = smov [#allocation3]  }
   0x7   : > { %p422_p3 = pnand %p2415_p0, %p421_p1  ;;  %s470_s0 = sshll.u32 %s2935_s29, 4  ;;  %s471_s0 = int_to_ptr.vmem [resolvable:$true] %s470_s0 }
   0x8   : > { %s2936_s30 = smov 64   ;;  %s2937_s18 = smov 4  }
   0x9   : > { %p2702_p4 = pneg %p422_p3  ;;  %503 = sbr.rel (%p422_p3) target bundleno = 2328 (0x918), region = 88 }
   0xb   : > { %p2703_p5 = pnand %p2706_p2, %p2702_p4 }
   0xd   : > { %2705 = dma.hbm_to_vmem [thread:$0]  (!%p2703_p5), %s469_s27, 512, %s471_s0, [#allocation4], %s2936_s30, %s2936_s30, %s2937_s18  }
   0xe   : > { %2928 = dma.done.wait (%p2706_p2), [#allocation4], 512  }
   0xf   : > { %2930 = vsyncadd (%p2706_p2), [#allocation4], 4294966784  ;;  %p556_p6 = scmp.lt.s32.totalorder %s2413_s28, 1  ;;  %vm572_vm0 = vcmask 523264   ;;  %s3826_s21 = sld [smem:[#allocation6_spill]]  ;;  %v2938_v6 = vmov 64.0  }
  0x10   : > { %2777 = vrcp.f32 %v2938_v6  ;;  %v2661_v28 = vld [vmem:[%s3810_s4 + $0x18] sm:$0xff]  ;;  %v2660_v29 = vld [vmem:[%s3810_s4 + $0x10] sm:$0xff]  ;;  %v2659_v30 = vld [vmem:[%s3810_s4 + $0x8] sm:$0xff]  ;;  %s3827_s26 = sld [smem:[#allocation7_spill]]  ;;  %vm972_vm11 = vcmask 130048   ;;  %s2939_s0 = smov 96  }
  0x11   : > { %s3829_s28 = smov (!%p556_p6, %s2413_s28), 1  ;;  %2690 = vmatpush.bf16.msra.mxu2 %v2661_v28  ;;  %752 = vmatpush.bf16.msra.mxu1 %v2661_v28  ;;  %v2658_v31 = vld [vmem:[%s3810_s4] sm:$0xff]  ;;  %v2657_v32 = vld [vmem:[%s3809_s3 + $0x18] sm:$0xff]  ;;  %v2656_v37 = vld [vmem:[%s3809_s3 + $0x10] sm:$0xff]  ;;  %s2940_s30 = smov 112   ;;  %vm1023_vm12 = vcmask 195584  }
  0x12   : > { %s2697_s19 = smul.u32 24, %s3829_s28  ;;  %v2665_v33 = vld [vmem:[%s3811_s5 + $0x18] sm:$0xff]  ;;  %702 = vmatpush.bf16.msra.mxu0 %v2657_v32  ;;  %v2664_v38 = vld [vmem:[%s3811_s5 + $0x10] sm:$0xff]  ;;  %v2655_v41 = vld [vmem:[%s3809_s3 + $0x8] sm:$0xff]  ;;  %s2941_s25 = smov 80   ;;  %vm1503_vm13 = vcmask 261248  }
  0x13   : > { %v2669_v34 = vld [vmem:[%s3812_s6 + $0x18] sm:$0xff]  ;;  %v2668_v39 = vld [vmem:[%s3812_s6 + $0x10] sm:$0xff]  ;;  %v2663_v42 = vld [vmem:[%s3811_s5 + $0x8] sm:$0xff]  ;;  %vm1788_vm14 = vcmask 392448   ;;  %vm2073_vm15 = vcmask 523648  }
  0x14   : > { %852 = vmatpush.bf16.msra.mxu3 %v2669_v34  ;;  %v2667_v43 = vld [vmem:[%s3812_s6 + $0x8] sm:$0xff]  ;;  %v2654_v46 = vld [vmem:[%s3809_s3] sm:$0xff]  ;;  %v2677_v53 = vld [vmem:[%s3814_s8 + $0x18] sm:$0xff] }
  0x15   : > { %s560_s22 = scalar_lea.vmem %s3826_s21, %s2697_s19  ;;  %2691 = vmatpush.bf16.msra.mxu2 %v2660_v29  ;;  %753 = vmatpush.bf16.msra.mxu1 %v2660_v29  ;;  %v2662_v47 = vld [vmem:[%s3811_s5] sm:$0xff]  ;;  %v2676_v57 = vld [vmem:[%s3814_s8 + $0x10] sm:$0xff]  ;;  %s2944_s21 = smov 48  }
  0x16   : > { %v569_v0 = vld [vmem:[%s560_s22 + $0x10] sm:$0xff]  ;;  %v568_v1 = vld [vmem:[%s560_s22 + $0x8] sm:$0xff]  ;;  %v567_v4 = vld [vmem:[%s560_s22] sm:$0xff]  ;;  %v2778_v7 = vpop.eup %2777  ;;  %703 = vmatpush.bf16.msra.mxu0 %v2656_v37 }
  0x17   : > { %v579_v2 = vsel %vm572_vm0, %v569_v0, 0.0  ;;  %v576_v3 = vsel %vm572_vm0, %v568_v1, 0.0  ;;  %v573_v5 = vsel %vm572_vm0, %v567_v4, 0.0  ;;  %v583_v8 = vmul.f32 64.0, %v2778_v7  ;;  %v2666_v48 = vld [vmem:[%s3812_s6] sm:$0xff] }
  0x18   : > { %580 = vadd.xlane.f32.xlu0 %v579_v2  ;;  %577 = vadd.xlane.f32.xlu1 %v576_v3  ;;  %vm587_vm1 = vweird.f32 %v2778_v7  ;;  %v2771_v63 = vld [vmem:[%s3827_s26] ss:$0 sm:$0xff] }
  0x19   : > { %v584_v9 = vsub.f32 1.0, %v583_v8  ;;  %2692 = vmatpush.bf16.msra.mxu2 %v2659_v30  ;;  %754 = vmatpush.bf16.msra.mxu1 %v2659_v30  ;;  %v2772_v3 = vld [vmem:[%s3808_s2] ss:$0 sm:$0xff] }
  0x1a   : > { %853 = vmatpush.bf16.msra.mxu3 %v2668_v39  ;;  %704 = vmatpush.bf16.msra.mxu0 %v2655_v41  ;;  %v2670_v30 = vld [vmem:[%s3813_s7] sm:$0xff] }
  0x1b   : > { %v585_v10 = vmul.f32 %v2778_v7, %v584_v9 }
  0x1d   : > { %v586_v11 = vadd.f32 %v2778_v7, %v585_v10  ;;  %2693 = vmatpush.bf16.msra.mxu2 %v2658_v31  ;;  %755 = vmatpush.bf16.msra.mxu1 %v2658_v31 }
  0x1e   : > { %854 = vmatpush.bf16.msra.mxu3 %v2667_v43  ;;  %705 = vmatpush.bf16.msra.mxu0 %v2654_v46 }
  0x1f   : > { %v3057_v12 = vsel %vm587_vm1, %v2778_v7, %v586_v11  ;;  %v2674_v7 = vld [vmem:[%s3814_s8] sm:$0xff] }
  0x20   : > { %574 = vadd.xlane.f32.xlu0 %v573_v5 }
  0x21   : > { %802 = vmatpush.bf16.msrb.mxu2 %v2665_v33  ;;  %952 = vmatpush.bf16.msrb.mxu1 %v2677_v53 }
  0x22   : > { %855 = vmatpush.bf16.msra.mxu3 %v2666_v48 }
  0x25   : > { %803 = vmatpush.bf16.msrb.mxu2 %v2664_v38  ;;  %953 = vmatpush.bf16.msrb.mxu1 %v2676_v57 }
  0x29   : > { %804 = vmatpush.bf16.msrb.mxu2 %v2663_v42 }
  0x2d   : > { %805 = vmatpush.bf16.msrb.mxu2 %v2662_v47 }
  0x8b   : > { %v581_v13 = vpop.xlane.xlu0 %580  ;;  %v578_v17 = vpop.xlane.xlu1 %577 }
  0x8c   : > { %v591_v14 = vmul.f32 %v3057_v12, %v581_v13  ;;  %v590_v21 = vmul.f32 %v3057_v12, %v578_v17 }
  0x8e   : > { %v3060_v15 = vsub.f32 %v569_v0, %v591_v14  ;;  %v3069_v23 = vsub.f32 %v568_v1, %v590_v21  ;;  %v2675_v0 = vld [vmem:[%s3814_s8 + $0x8] sm:$0xff] }
  0x8f   : > { %954 = vmatpush.bf16.msrb.mxu1 %v2675_v0 }
  0x90   : > { %v597_v16 = vmul.f32 %v3060_v15, %v3060_v15  ;;  %v596_v26 = vmul.f32 %v3069_v23, %v3069_v23 }
  0x92   : > { %v604_v18 = vsel %vm572_vm0, %v597_v16, 0.0  ;;  %v601_v27 = vsel %vm572_vm0, %v596_v26, 0.0  ;;  %v2673_v16 = vld [vmem:[%s3813_s7 + $0x18] sm:$0xff] }
  0x93   : > { %605 = vadd.xlane.f32.xlu1 %v604_v18  ;;  %v575_v19 = vpop.xlane.xlu0 %574  ;;  %955 = vmatpush.bf16.msrb.mxu1 %v2674_v7  ;;  %v3284_v7 = vld [vmem:[%s3815_s9] sm:$0xff] }
  0x94   : > { %v589_v20 = vmul.f32 %v3057_v12, %v575_v19  ;;  %902 = vmatpush.bf16.msrb.mxu0 %v2673_v16  ;;  %v2672_v19 = vld [vmem:[%s3813_s7 + $0x10] sm:$0xff] }
  0x96   : > { %v3067_v22 = vsub.f32 %v567_v4, %v589_v20 }
  0x98   : > { %v595_v24 = vmul.f32 %v3067_v22, %v3067_v22  ;;  %903 = vmatpush.bf16.msrb.mxu0 %v2672_v19 }
  0x9a   : > { %v598_v25 = vsel %vm572_vm0, %v595_v24, 0.0 }
  0x9b   : > { %599 = vadd.xlane.f32.xlu2 %v598_v25  ;;  %v2671_v25 = vld [vmem:[%s3813_s7 + $0x8] sm:$0xff] }
  0x9c   : > { %904 = vmatpush.bf16.msrb.mxu0 %v2671_v25 }
  0xa0   : > { %905 = vmatpush.bf16.msrb.mxu0 %v2670_v30 }
  0xa3   : > { %602 = vadd.xlane.f32.xlu2 %v601_v27 }
 0x106   : > { %v606_v35 = vpop.xlane.xlu1 %605 }
 0x107   : > { %v609_v36 = vmul.f32 %v606_v35, %v3057_v12 }
 0x109   : > { %v612_v40 = vadd.f32 1e-06, %v609_v36 }
 0x10b   : > { %2779 = vrsqrt.f32 %v612_v40  ;;  %vm639_vm3 = vweird.f32 %v612_v40 }
 0x10e   : > { %v600_v44 = vpop.xlane.xlu2 %599 }
 0x10f   : > { %v607_v45 = vmul.f32 %v600_v44, %v3057_v12 }
 0x111   : > { %v2780_v49 = vpop.eup %2779  ;;  %v610_v50 = vadd.f32 1e-06, %v607_v45 }
 0x112   : > { %v634_v51 = vmul.f32 %v2780_v49, %v612_v40  ;;  %vm640_vm2 = vweird.f32 %v2780_v49 }
 0x113   : > { %2781 = vrsqrt.f32 %v610_v50  ;;  %vm641_vm4 = vmor %vm639_vm3, %vm640_vm2  ;;  %vm619_vm6 = vweird.f32 %v610_v50 }
 0x114   : > { %v635_v52 = vmul.f32 %v2780_v49, %v634_v51 }
 0x116   : > { %v636_v54 = vmul.f32 0.5, %v635_v52  ;;  %v603_v55 = vpop.xlane.xlu2 %602 }
 0x117   : > { %v608_v56 = vmul.f32 %v603_v55, %v3057_v12 }
 0x118   : > { %v637_v58 = vsub.f32 1.5, %v636_v54 }
 0x119   : > { %v2782_v59 = vpop.eup %2781  ;;  %v611_v60 = vadd.f32 1e-06, %v608_v56 }
 0x11a   : > { %v638_v61 = vmul.f32 %v2780_v49, %v637_v58  ;;  %v614_v62 = vmul.f32 %v2782_v59, %v610_v50  ;;  %vm620_vm5 = vweird.f32 %v2782_v59 }
 0x11b   : > { %2783 = vrsqrt.f32 %v611_v60  ;;  %vm621_vm7 = vmor %vm619_vm6, %vm620_vm5  ;;  %vm629_vm9 = vweird.f32 %v611_v60 }
 0x11c   : > { %v642_v1 = vsel %vm641_vm4, %v2780_v49, %v638_v61  ;;  %v615_v2 = vmul.f32 %v2782_v59, %v614_v62 }
 0x11d   : > { %v645_v4 = vmul.f32 %v642_v1, %v3060_v15 }
 0x11e   : > { %v616_v5 = vmul.f32 0.5, %v615_v2 }
 0x11f   : > { %v651_v6 = vmul.f32 %v2771_v63, %v645_v4 }
 0x120   : > { %v617_v8 = vsub.f32 1.5, %v616_v5 }
 0x121   : > { %v2784_v9 = vpop.eup %2783  ;;  %v3147_v10 = vadd.f32 %v2772_v3, %v651_v6 }
 0x122   : > { %v618_v11 = vmul.f32 %v2782_v59, %v617_v8  ;;  %v624_v13 = vmul.f32 %v2784_v9, %v611_v60  ;;  %vm630_vm8 = vweird.f32 %v2784_v9 }
 0x123   : > { %v659_v14 = vpack.c.bf16 %v3147_v10, %v3147_v10  ;;  %vm631_vm10 = vmor %vm629_vm9, %vm630_vm8 }
 0x124   : > { %v625_v15 = vmul.f32 %v2784_v9, %v624_v13  ;;  %v622_v17 = vsel %vm621_vm7, %v2782_v59, %v618_v11 }
 0x125   : > { %2457 = vmatmul.msk.bf16.vlgmr.msra.gmra.mxu2 %vm572_vm0, %v659_v14  ;;  %v643_v21 = vmul.f32 %v622_v17, %v3067_v22 }
 0x126   : > { %v626_v18 = vmul.f32 0.5, %v625_v15  ;;  %v3291_v15 = vld [vmem:[%s3815_s9 + $0x8] sm:$0xff] }
 0x127   : > { %v649_v27 = vmul.f32 %v2771_v63, %v643_v21 }
 0x128   : > { %v627_v20 = vsub.f32 1.5, %v626_v18 }
 0x129   : > { %v3166_v31 = vadd.f32 %v2772_v3, %v649_v27 }
 0x12a   : > { %v628_v24 = vmul.f32 %v2784_v9, %v627_v20 }
 0x12c   : > { %v632_v26 = vsel %vm631_vm10, %v2784_v9, %v628_v24  ;;  %v3298_v24 = vld [vmem:[%s3815_s9 + $0x10] sm:$0xff] }
 0x12d   : > { %v644_v28 = vmul.f32 %v632_v26, %v3069_v23 }
 0x12f   : > { %v650_v29 = vmul.f32 %v2771_v63, %v644_v28 }
 0x131   : > { %v3168_v22 = vadd.f32 %v2772_v3, %v650_v29 }
 0x133   : > { %v658_v32 = vpack.c.bf16 %v3168_v22, %v3166_v31 }
 0x135   : > { %2438 = vmatmul.msk.bf16.vlgmr.msra.gmra.mxu0 %vm572_vm0, %v658_v32  ;;  %2456 = vmatmul.msk.bf16.vlgmr.msra.gmra.mxu1 %vm572_vm0, %v658_v32 }
 0x136   : > { %2474 = vmatmul.msk.bf16.vlgmr.msrb.gmra.mxu2 %vm572_vm0, %v658_v32  ;;  %2492 = vmatmul.msk.bf16.vlgmr.msra.gmra.mxu3 %vm572_vm0, %v658_v32 }
 0x145   : > { %2439 = vmatmul.msk.bf16.gmra.mxu0 %vm572_vm0, %v659_v14  ;;  %2528 = vmatmul.msk.bf16.vlgmr.msrb.gmra.mxu1 %vm572_vm0, %v658_v32 }
 0x146   : > { %2475 = vmatmul.msk.bf16.gmra.mxu2 %vm572_vm0, %v659_v14  ;;  %2493 = vmatmul.msk.bf16.gmra.mxu3 %vm572_vm0, %v659_v14 }
 0x155   : > { %2510 = vmatmul.msk.bf16.vlgmr.msrb.gmra.mxu0 %vm572_vm0, %v658_v32  ;;  %2529 = vmatmul.msk.bf16.gmra.mxu1 %vm572_vm0, %v659_v14 }
 0x165   : > { %2511 = vmatmul.msk.bf16.gmra.mxu0 %vm572_vm0, %v659_v14 }
 0x1a8   : > { %v3183_v23 = vpop.f32.mrf.mxu2 }
 0x1a9   : > { %1517 = vrot.lane.b32.xlu1 %v3183_v23, %s2939_s0  ;;  %2530 = vmatpush.xpose.msk.msra.mxu2 %vm972_vm11, %v3183_v23 }
 0x1aa   : > { %1226 = vrot.lane.b32.xlu2 %v3183_v23, %s2940_s30 }
 0x1b0   : > { %v764_v33 = vpop.f32.mrf.mxu2 }
 0x1b2   : > { %v3191_v34 = vpop.f32.mrf.mxu0  ;;  %v3193_v35 = vpop.f32.mrf.mxu1 }
 0x1b3   : > { %1222 = vrot.lane.b32.xlu0 %v3193_v35, %s2940_s30 }
 0x1b9   : > { %v807_v36 = vpop.f32.mrf.mxu2  ;;  %v3197_v37 = vpop.f32.mrf.mxu3 }
 0x1ba   : > { %1305 = vrot.lane.b32.xlu2 %v3197_v37, %s2940_s30  ;;  %v3201_v38 = vpop.f32.mrf.mxu0  ;;  %v3203_v39 = vpop.f32.mrf.mxu1 }
 0x1bb   : > { %1224 = vrot.lane.b32.xlu1 %v3203_v39, %s2940_s30  ;;  %2531 = vmatpush.xpose.msk.msra.mxu2 %vm972_vm11, %v3203_v39 }
 0x1bc   : > { %1216 = vrot.lane.b32.xlu0 %v3191_v34, %s2940_s30 }
 0x1bf   : > { %2532 = vmatpush.xpose.msk.msra.mxu2 %vm972_vm11, %v3193_v35 }
 0x1c1   : > { %v809_v40 = vpop.f32.mrf.mxu2  ;;  %v3213_v41 = vpop.f32.mrf.mxu3 }
 0x1c2   : > { %v3215_v42 = vpop.f32.mrf.mxu0  ;;  %v957_v43 = vpop.f32.mrf.mxu1  ;;  %2533 = vmatmul.msk.f32.vlgmr.msra.gmra.mxu2 %vm972_vm11, %v3191_v34 }
 0x1c3   : > { %1218 = vrot.lane.b32.xlu1 %v3201_v38, %s2940_s30  ;;  %1220 = vrot.lane.b32.xlu2 %v3215_v42, %s2940_s30  ;;  %v3223_v44 = vpack.i.bf16 %v807_v36, %v957_v43 }
 0x1c4   : > { %1307 = vrot.lane.b32.xlu0 %v3213_v41, %s2940_s30 }
 0x1c9   : > { %v812_v45 = vpop.f32.mrf.mxu2  ;;  %v3227_v46 = vpop.f32.mrf.mxu3 }
 0x1ca   : > { %v714_v47 = vpop.f32.mrf.mxu0  ;;  %v959_v48 = vpop.f32.mrf.mxu1  ;;  %2534 = vmatmul.msk.f32.gmra.mxu2 %vm972_vm11, %v3201_v38 }
 0x1cb   : > { %1515 = vrot.lane.b32.xlu1 %v3203_v39, %s2939_s0  ;;  %1309 = vrot.lane.b32.xlu2 %v3227_v46, %s2940_s30  ;;  %v3235_v49 = vpack.i.bf16 %v809_v40, %v959_v48 }
 0x1d1   : > { %v814_v50 = vpop.f32.mrf.mxu2  ;;  %v864_v51 = vpop.f32.mrf.mxu3 }
 0x1d2   : > { %v3237_v52 = vpop.f32.mrf.mxu0  ;;  %v962_v53 = vpop.f32.mrf.mxu1  ;;  %2535 = vmatmul.msk.f32.gmra.mxu2 %vm972_vm11, %v3215_v42 }
 0x1d3   : > { %1162 = vmatpush.msrb.mxu2 %v962_v53  ;;  %1311 = vrot.lane.b32.xlu2 %v3237_v52, %s2940_s30  ;;  %v3243_v54 = vpack.i.bf16 %v812_v45, %v962_v53 }
 0x1d5   : > { %1163 = vmatpush.msrb.mxu2 %v959_v48 }
 0x1d7   : > { %1164 = vmatpush.msrb.mxu2 %v957_v43 }
 0x1da   : > { %v3245_v55 = vpop.f32.mrf.mxu0  ;;  %v964_v56 = vpop.f32.mrf.mxu1 }
 0x1db   : > { %1604 = vrot.lane.b32.xlu0 %v3245_v55, %s2939_s0  ;;  %1313 = vrot.lane.b32.xlu2 %v3245_v55, %s2940_s30 }
 0x1e2   : > { %v3251_v57 = vpop.f32.mrf.mxu0 }
 0x1e3   : > { %1315 = vrot.lane.b32.xlu0 %v3251_v57, %s2940_s30  ;;  %2536 = vmatpush.xpose.msk.msrb.mxu3 %vm972_vm11, %v3251_v57 }
 0x1e7   : > { %2537 = vmatpush.xpose.msk.msrb.mxu3 %vm972_vm11, %v3245_v55 }
 0x1ea   : > { %v914_v58 = vpop.f32.mrf.mxu0 }
 0x1eb   : > { %1606 = vrot.lane.b32.xlu0 %v3251_v57, %s2939_s0  ;;  %2538 = vmatpush.xpose.msk.msrb.mxu3 %vm972_vm11, %v3237_v52 }
 0x1ee   : > { %2539 = vmatmul.msk.f32.vlgmr.msrb.gmra.mxu3 %vm972_vm11, %v3197_v37 }
 0x1ef   : > { %1197 = vmatpush.msra.mxu3 %v812_v45 }
 0x1f1   : > { %1198 = vmatpush.msra.mxu3 %v809_v40 }
 0x1f3   : > { %1199 = vmatpush.msra.mxu3 %v807_v36 }
 0x1f6   : > { %2540 = vmatmul.msk.f32.gmra.mxu3 %vm972_vm11, %v3213_v41 }
 0x1fe   : > { %2541 = vmatmul.msk.f32.gmra.mxu3 %vm972_vm11, %v3227_v46 }
 0x204   : > { %v1227_v59 = vpop.permute.xlu2 %1226 }
 0x205   : > { %2548 = vmatpush.xpose.msk.msra.mxu0 %vm972_vm11, %v1227_v59  ;;  %2694 = vmatpush.xpose.msk.msrb.mxu3 %vm972_vm11, %v1227_v59 }
 0x214   : > { %v1306_v63 = vpop.permute.xlu2 %1305 }
 0x21b   : > { %v1518_v60 = vpop.permute.xlu1 %1517 }
 0x21d   : > { %v3277_v2 = vpop.permute.xlu2 %1220 }
 0x225   : > { %v1223_v61 = vpop.permute.xlu0 %1222  ;;  %v1310_v4 = vpop.permute.xlu2 %1309 }
 0x22d   : > { %v1225_v62 = vpop.permute.xlu1 %1224  ;;  %v1312_v17 = vpop.permute.xlu2 %1311 }
 0x22e   : > { %2549 = vmatpush.xpose.msk.msra.mxu0 %vm972_vm11, %v1225_v62  ;;  %2695 = vmatpush.xpose.msk.msrb.mxu3 %vm972_vm11, %v1225_v62  ;;  %v1217_v0 = vpop.permute.xlu0 %1216 }
 0x232   : > { %2550 = vmatpush.xpose.msk.msra.mxu0 %vm972_vm11, %v1223_v61  ;;  %2696 = vmatpush.xpose.msk.msrb.mxu3 %vm972_vm11, %v1223_v61 }
 0x235   : > { %v1219_v1 = vpop.permute.xlu1 %1218  ;;  %2551 = vmatmul.msk.f32.vlgmr.msra.gmra.mxu0 %vm972_vm11, %v1217_v0  ;;  %v1314_v27 = vpop.permute.xlu2 %1313 }
 0x236   : > { %2566 = vmatpush.xpose.msk.msrb.mxu0 %vm972_vm11, %v1518_v60  ;;  %v1308_v5 = vpop.permute.xlu0 %1307 }
 0x23d   : > { %v1516_v3 = vpop.permute.xlu1 %1515  ;;  %2552 = vmatmul.msk.f32.gmra.mxu0 %vm972_vm11, %v1219_v1 }
 0x23e   : > { %2567 = vmatpush.xpose.msk.msrb.mxu0 %vm972_vm11, %v1516_v3 }
 0x245   : > { %v1008_v6 = vpop.f32.mrf.mxu2 }
 0x246   : > { %v1017_v8 = vmul.f32 0.25, %v1008_v6 }
 0x248   : > { %v1020_v9 = vadd.f32 %v1017_v8, %v3284_v7 }
 0x24a   : > { %v1024_v11 = vsel %vm1023_vm12, %v1020_v9, -inf }
 0x24b   : > { %1025 = vmax.xlane.f32.xlu0 %v1024_v11 }
 0x24d   : > { %v1011_v13 = vpop.f32.mrf.mxu2  ;;  %v1605_v14 = vpop.permute.xlu0 %1604 }
 0x24e   : > { %v1018_v16 = vmul.f32 0.25, %v1011_v13 }
 0x250   : > { %v1021_v18 = vadd.f32 %v1018_v16, %v3291_v15 }
 0x252   : > { %v1027_v19 = vsel %vm1023_vm12, %v1021_v18, -inf }
 0x253   : > { %1028 = vmax.xlane.f32.xlu1 %v1027_v19 }
 0x255   : > { %v1014_v20 = vpop.f32.mrf.mxu2  ;;  %v1316_v21 = vpop.permute.xlu0 %1315 }
 0x256   : > { %v1019_v25 = vmul.f32 0.25, %v1014_v20  ;;  %2554 = vmatpush.xpose.msk.msra.mxu1 %vm972_vm11, %v1316_v21 }
 0x258   : > { %v1022_v26 = vadd.f32 %v1019_v25, %v3298_v24 }
 0x25a   : > { %2555 = vmatpush.xpose.msk.msra.mxu1 %vm972_vm11, %v1314_v27  ;;  %v1030_v28 = vsel %vm1023_vm12, %v1022_v26, -inf }
 0x25b   : > { %1031 = vmax.xlane.f32.xlu2 %v1030_v28 }
 0x25d   : > { %v1607_v29 = vpop.permute.xlu0 %1606 }
 0x25e   : > { %2556 = vmatpush.xpose.msk.msra.mxu1 %vm972_vm11, %v1312_v17  ;;  %v3402_v17 = vld [vmem:[%s3816_s10 + $0x10] sm:$0xff] }
 0x25f   : > { %1507 = vrot.lane.b32.xlu0 %v3191_v34, %s2939_s0 }
 0x261   : > { %2557 = vmatmul.msk.f32.vlgmr.msra.gmra.mxu1 %vm972_vm11, %v1306_v63 }
 0x262   : > { %2572 = vmatpush.xpose.msk.msrb.mxu1 %vm972_vm11, %v1607_v29 }
 0x266   : > { %2573 = vmatpush.xpose.msk.msrb.mxu1 %vm972_vm11, %v1605_v14 }
 0x267   : > { %1598 = vrot.lane.b32.xlu0 %v3213_v41, %s2939_s0 }
 0x269   : > { %2558 = vmatmul.msk.f32.gmra.mxu1 %vm972_vm11, %v1308_v5 }
 0x26c   : > { %1602 = vrot.lane.b32.xlu1 %v3237_v52, %s2939_s0 }
 0x26f   : > { %1511 = vrot.lane.b32.xlu0 %v3215_v42, %s2939_s0 }
 0x271   : > { %2559 = vmatmul.msk.f32.gmra.mxu1 %vm972_vm11, %v1310_v4  ;;  %v1092_v30 = vpop.f32.mrf.mxu3 }
 0x273   : > { %1513 = vrot.lane.b32.xlu2 %v3193_v35, %s2939_s0 }
 0x274   : > { %1509 = vrot.lane.b32.xlu1 %v3201_v38, %s2939_s0 }
 0x279   : > { %v1095_v33 = vpop.f32.mrf.mxu3 }
 0x27b   : > { %1596 = vrot.lane.b32.xlu2 %v3197_v37, %s2939_s0 }
 0x27c   : > { %1891 = vrot.lane.b32.xlu1 %v3251_v57, %s2941_s25 }
 0x281   : > { %v1098_v13 = vpop.f32.mrf.mxu3 }
 0x282   : > { %v1103_v16 = vmul.f32 0.25, %v1098_v13 }
 0x283   : > { %1802 = vrot.lane.b32.xlu2 %v3183_v23, %s2941_s25 }
 0x284   : > { %1800 = vrot.lane.b32.xlu1 %v3203_v39, %s2941_s25  ;;  %v1102_v39 = vmul.f32 0.25, %v1095_v33  ;;  %v3407_v20 = vadd.f32 %v1103_v16, %v3402_v17 }
 0x286   : > { %v1113_v27 = vsel %vm1023_vm12, %v3407_v20, -inf }
 0x28b   : > { %1600 = vrot.lane.b32.xlu2 %v3227_v46, %s2939_s0 }
 0x28c   : > { %1887 = vrot.lane.b32.xlu1 %v3237_v52, %s2941_s25 }
 0x293   : > { %1798 = vrot.lane.b32.xlu2 %v3193_v35, %s2941_s25  ;;  %v3345_v35 = vld [vmem:[%s3816_s10 + $0x8] sm:$0xff] }
 0x294   : > { %1794 = vrot.lane.b32.xlu1 %v3201_v38, %s2941_s25  ;;  %v3348_v43 = vadd.f32 %v1102_v39, %v3345_v35 }
 0x296   : > { %v1110_v47 = vsel %vm1023_vm12, %v3348_v43, -inf }
 0x29b   : > { %1881 = vrot.lane.b32.xlu2 %v3197_v37, %s2941_s25 }
 0x2a3   : > { %1796 = vrot.lane.b32.xlu2 %v3215_v42, %s2941_s25 }
 0x2b2   : > { %v1257_v11 = vpop.f32.mrf.mxu0 }
 0x2ba   : > { %v1260_v21 = vpop.f32.mrf.mxu0 }
 0x2be   : > { %v1026_v32 = vpop.xlane.xlu0 %1025 }
 0x2bf   : > { %v1033_v23 = vsub.f32 %v1020_v9, %v1026_v32 }
 0x2c1   : > { %v1036_v36 = vmul.f32 1.442695, %v1033_v23 }
 0x2c3   : > { %2785 = vpow2.f32 %v1036_v36 }
 0x2c6   : > { %v1029_v40 = vpop.xlane.xlu1 %1028 }
 0x2c7   : > { %v1034_v38 = vsub.f32 %v1021_v18, %v1029_v40  ;;  %v1266_v18 = vmul.f32 0.25, %v1257_v11 }
 0x2c9   : > { %v3350_v37 = vpop.eup %2785  ;;  %v1038_v42 = vmul.f32 1.442695, %v1034_v38  ;;  %v3410_v25 = vadd.f32 %v1266_v18, %v3284_v7 }
 0x2ca   : > { %v1042_v45 = vsel %vm1023_vm12, %v3350_v37, 0.0 }
 0x2cb   : > { %2787 = vpow2.f32 %v1038_v42  ;;  %1043 = vadd.xlane.f32.xlu0 %v1042_v45  ;;  %v1272_v28 = vsel %vm1023_vm12, %v3410_v25, -inf }
 0x2cc   : > { %1111 = vmax.xlane.f32.xlu2 %v1110_v47 }
 0x2ce   : > { %v1032_v48 = vpop.xlane.xlu2 %1031 }
 0x2cf   : > { %v1035_v50 = vsub.f32 %v1022_v26, %v1032_v48  ;;  %v1267_v26 = vmul.f32 0.25, %v1260_v21 }
 0x2d1   : > { %v3356_v51 = vpop.eup %2787  ;;  %v1040_v52 = vmul.f32 1.442695, %v1035_v50  ;;  %v1508_v58 = vpop.permute.xlu0 %1507  ;;  %v3417_v29 = vadd.f32 %v1267_v26, %v3291_v15 }
 0x2d2   : > { %v1045_v53 = vsel %vm1023_vm12, %v3356_v51, 0.0 }
 0x2d3   : > { %2789 = vpow2.f32 %v1040_v52  ;;  %1046 = vadd.xlane.f32.xlu1 %v1045_v53 }
 0x2d6   : > { %v1514_v56 = vpop.permute.xlu2 %1513 }
 0x2d7   : > { %2568 = vmatpush.xpose.msk.msrb.mxu0 %vm972_vm11, %v1514_v56 }
 0x2d9   : > { %v3361_v57 = vpop.eup %2789  ;;  %v1599_v62 = vpop.permute.xlu0 %1598 }
 0x2da   : > { %2569 = vmatmul.msk.f32.vlgmr.msrb.gmra.mxu0 %vm972_vm11, %v1508_v58  ;;  %v1048_v59 = vsel %vm1023_vm12, %v3361_v57, 0.0 }
 0x2db   : > { %1049 = vadd.xlane.f32.xlu1 %v1048_v59 }
 0x2de   : > { %v1603_v60 = vpop.permute.xlu1 %1602  ;;  %v1597_v61 = vpop.permute.xlu2 %1596 }
 0x2df   : > { %1889 = vrot.lane.b32.xlu0 %v3245_v55, %s2941_s25  ;;  %2574 = vmatpush.xpose.msk.msrb.mxu1 %vm972_vm11, %v1603_v60  ;;  %v1346_v5 = vpop.f32.mrf.mxu1 }
 0x2e0   : > { %v1355_v6 = vmul.f32 0.25, %v1346_v5 }
 0x2e1   : > { %v1512_v55 = vpop.permute.xlu0 %1511 }
 0x2e2   : > { %2575 = vmatmul.msk.f32.vlgmr.msrb.gmra.mxu1 %vm972_vm11, %v1597_v61 }
 0x2e4   : > { %2732 = vrot.lane.b32.xlu2 %v3235_v49, %s2940_s30 }
 0x2e6   : > { %v1510_v63 = vpop.permute.xlu1 %1509  ;;  %v1803_v0 = vpop.permute.xlu2 %1802 }
 0x2e7   : > { %1792 = vrot.lane.b32.xlu0 %v3191_v34, %s2941_s25  ;;  %2570 = vmatmul.msk.f32.gmra.mxu0 %vm972_vm11, %v1510_v63 }
 0x2e8   : > { %2584 = vmatpush.xpose.msk.msra.mxu0 %vm972_vm11, %v1803_v0 }
 0x2ea   : > { %2576 = vmatmul.msk.f32.gmra.mxu1 %vm972_vm11, %v1599_v62 }
 0x2ee   : > { %v1892_v1 = vpop.permute.xlu1 %1891  ;;  %v1601_v3 = vpop.permute.xlu2 %1600 }
 0x2ef   : > { %1883 = vrot.lane.b32.xlu0 %v3213_v41, %s2941_s25  ;;  %2571 = vmatmul.msk.f32.gmra.mxu0 %vm972_vm11, %v1512_v55  ;;  %v3389_v41 = vld [vmem:[%s3816_s10] sm:$0xff] }
 0x2f0   : > { %2590 = vmatpush.xpose.msk.msra.mxu1 %vm972_vm11, %v1892_v1  ;;  %v3392_v8 = vadd.f32 %v1355_v6, %v3389_v41 }
 0x2f2   : > { %2577 = vmatmul.msk.f32.gmra.mxu1 %vm972_vm11, %v1601_v3  ;;  %v1361_v9 = vsel %vm1023_vm12, %v3392_v8, -inf }
 0x2f4   : > { %1885 = vrot.lane.b32.xlu1 %v3227_v46, %s2941_s25  ;;  %v1101_v46 = vmul.f32 0.25, %v1092_v30  ;;  %v1275_v30 = vsel %vm1023_vm12, %v3417_v29, -inf }
 0x2f6   : > { %v1801_v34 = vpop.permute.xlu1 %1800  ;;  %v1799_v4 = vpop.permute.xlu2 %1798  ;;  %v3397_v14 = vadd.f32 %v1101_v46, %v3389_v41 }
 0x2f7   : > { %2585 = vmatpush.xpose.msk.msra.mxu0 %vm972_vm11, %v1801_v34 }
 0x2f8   : > { %v1107_v19 = vsel %vm1023_vm12, %v3397_v14, -inf }
 0x2fb   : > { %2586 = vmatpush.xpose.msk.msra.mxu0 %vm972_vm11, %v1799_v4  ;;  %v1349_v4 = vpop.f32.mrf.mxu1 }
 0x2fc   : > { %v1356_v21 = vmul.f32 0.25, %v1349_v4 }
 0x2fe   : > { %v1888_v32 = vpop.permute.xlu1 %1887  ;;  %v1882_v52 = vpop.permute.xlu2 %1881 }
 0x306   : > { %v1795_v23 = vpop.permute.xlu1 %1794  ;;  %v1797_v62 = vpop.permute.xlu2 %1796 }
 0x30d   : > { %1362 = vmax.xlane.f32.xlu2 %v1361_v9  ;;  %v1352_v9 = vpop.f32.mrf.mxu1 }
 0x319   : > { %1108 = vmax.xlane.f32.xlu0 %v1107_v19 }
 0x31e   : > { %1114 = vmax.xlane.f32.xlu1 %v1113_v27 }
 0x321   : > { %1273 = vmax.xlane.f32.xlu0 %v1272_v28 }
 0x326   : > { %1276 = vmax.xlane.f32.xlu1 %v1275_v30 }
 0x33e   : > { %v1044_v33 = vpop.xlane.xlu0 %1043 }
 0x33f   : > { %2791 = vrcp.f32 %v1044_v33  ;;  %2742 = vrot.lane.b32.xlu1 %v3243_v54, %s2939_s0  ;;  %v3452_v5 = vpop.xlane.xlu2 %1111  ;;  %v3464_v33 = vadd.f32 %v1356_v21, %v3345_v35 }
 0x345   : > { %v2792_v36 = vpop.eup %2791 }
 0x346   : > { %v1054_v39 = vmul.f32 %v2792_v36, %v3350_v37  ;;  %v1047_v40 = vpop.xlane.xlu1 %1046 }
 0x347   : > { %2793 = vrcp.f32 %v1047_v40  ;;  %v3456_v11 = vpop.permute.xlu2 %2732  ;;  %v1364_v40 = vsel %vm1023_vm12, %v3464_v33, -inf }
 0x348   : > { %2545 = vmatmul.msk.f32.vlgmr.msra.gmra.mxu3 %vm1023_vm12, %v1054_v39 }
 0x34d   : > { %v2794_v38 = vpop.eup %2793 }
 0x34e   : > { %v1050_v42 = vpop.xlane.xlu1 %1049  ;;  %v1055_v45 = vmul.f32 %v2794_v38, %v3356_v51 }
 0x34f   : > { %2795 = vrcp.f32 %v1050_v42 }
 0x350   : > { %2546 = vmatmul.msk.f32.gmra.mxu3 %vm1023_vm12, %v1055_v45 }
 0x351   : > { %v1890_v47 = vpop.permute.xlu0 %1889 }
 0x352   : > { %2591 = vmatpush.xpose.msk.msra.mxu1 %vm972_vm11, %v1890_v47 }
 0x355   : > { %v2796_v48 = vpop.eup %2795 }
 0x356   : > { %2592 = vmatpush.xpose.msk.msra.mxu1 %vm972_vm11, %v1888_v32  ;;  %v1056_v50 = vmul.f32 %v2796_v48, %v3361_v57 }
 0x357   : > { %v1548_v37 = vpop.f32.mrf.mxu0 }
 0x358   : > { %v1557_v53 = vmul.f32 0.25, %v1548_v37  ;;  %2547 = vmatmul.msk.f32.gmra.mxu3 %vm1023_vm12, %v1056_v50 }
 0x359   : > { %v1793_v56 = vpop.permute.xlu0 %1792  ;;  %2593 = vmatmul.msk.f32.vlgmr.msra.gmra.mxu1 %vm972_vm11, %v1882_v52 }
 0x35a   : > { %2587 = vmatmul.msk.f32.vlgmr.msra.gmra.mxu0 %vm972_vm11, %v1793_v56  ;;  %v1560_v51 = vadd.f32 %v1557_v53, %v3284_v7 }
 0x35c   : > { %v1563_v58 = vsel %vm1023_vm12, %v1560_v51, -inf }
 0x35d   : > { %1564 = vmax.xlane.f32.xlu0 %v1563_v58 }
 0x35f   : > { %v1637_v27 = vpop.f32.mrf.mxu1 }
 0x360   : > { %2553 = vmatmul.msk.f32.vlgmr.msrb.gmra.mxu3 %vm972_vm11, %v3277_v2  ;;  %v1646_v39 = vmul.f32 0.25, %v1637_v27 }
 0x361   : > { %v1884_v59 = vpop.permute.xlu0 %1883 }
 0x362   : > { %2588 = vmatmul.msk.f32.gmra.mxu0 %vm972_vm11, %v1795_v23  ;;  %2594 = vmatmul.msk.f32.gmra.mxu1 %vm972_vm11, %v1884_v59  ;;  %v3475_v50 = vadd.f32 %v1646_v39, %v3389_v41 }
 0x364   : > { %v1551_v57 = vpop.f32.mrf.mxu0  ;;  %v1652_v53 = vsel %vm1023_vm12, %v3475_v50, -inf }
 0x365   : > { %v1558_v60 = vmul.f32 0.25, %v1551_v57  ;;  %v1357_v57 = vmul.f32 0.25, %v1352_v9 }
 0x366   : > { %v1886_v0 = vpop.permute.xlu1 %1885 }
 0x367   : > { %v1561_v61 = vadd.f32 %v1558_v60, %v3291_v15  ;;  %v1640_v45 = vpop.f32.mrf.mxu1 }
 0x368   : > { %v1647_v56 = vmul.f32 0.25, %v1640_v45 }
 0x369   : > { %v1566_v63 = vsel %vm1023_vm12, %v1561_v61, -inf }
 0x36a   : > { %1567 = vmax.xlane.f32.xlu0 %v1566_v63  ;;  %2589 = vmatmul.msk.f32.gmra.mxu0 %vm972_vm11, %v1797_v62 }
 0x36b   : > { %2595 = vmatmul.msk.f32.gmra.mxu1 %vm972_vm11, %v1886_v0  ;;  %v3492_v0 = vadd.f32 %v1647_v56, %v3345_v35 }
 0x36c   : > { %v1554_v55 = vpop.f32.mrf.mxu0 }
 0x36d   : > { %v1559_v2 = vmul.f32 0.25, %v1554_v55  ;;  %v1655_v4 = vsel %vm1023_vm12, %v3492_v0, -inf }
 0x36f   : > { %v3444_v1 = vadd.f32 %v1559_v2, %v3298_v24  ;;  %v3497_v2 = vadd.f32 %v1357_v57, %v3402_v17 }
 0x371   : > { %v1569_v3 = vsel %vm1023_vm12, %v3444_v1, -inf }
 0x372   : > { %1570 = vmax.xlane.f32.xlu0 %v1569_v3  ;;  %v1117_v3 = vsub.f32 %v3348_v43, %v3452_v5 }
 0x380   : > { %v1363_v32 = vpop.xlane.xlu2 %1362 }
 0x386   : > { %2727 = vrot.lane.b32.xlu0 %v3243_v54, %s2940_s30 }
 0x38c   : > { %v1109_v34 = vpop.xlane.xlu0 %1108 }
 0x38e   : > { %2737 = vrot.lane.b32.xlu0 %v3223_v44, %s2940_s30  ;;  %s2943_s30 = smov 32  }
 0x391   : > { %v1115_v60 = vpop.xlane.xlu1 %1114 }
 0x394   : > { %v3454_v6 = vpop.xlane.xlu0 %1273 }
 0x3d0   : > { %v1565_v13 = vpop.xlane.xlu0 %1564 }
 0x3d1   : > { %v1572_v19 = vsub.f32 %v1560_v51, %v1565_v13  ;;  %v1116_v51 = vsub.f32 %v3397_v14, %v1109_v34  ;;  %v1643_v14 = vpop.f32.mrf.mxu1  ;;  %v1121_v13 = vmul.f32 1.442695, %v1117_v3 }
 0x3d2   : > { %v1648_v34 = vmul.f32 0.25, %v1643_v14 }
 0x3d3   : > { %v1575_v28 = vmul.f32 1.442695, %v1572_v19  ;;  %v1119_v63 = vmul.f32 1.442695, %v1116_v51 }
 0x3d4   : > { %v3508_v43 = vadd.f32 %v1648_v34, %v3402_v17 }
 0x3d5   : > { %2797 = vpow2.f32 %v1575_v28 }
 0x3d6   : > { %v1658_v39 = vsel %vm1023_vm12, %v3508_v43, -inf }
 0x3d7   : > { %v1833_v46 = vpop.f32.mrf.mxu0 }
 0x3d8   : > { %v1842_v16 = vmul.f32 0.25, %v1833_v46  ;;  %v1367_v46 = vsel %vm1023_vm12, %v3497_v2, -inf }
 0x3d9   : > { %v1922_v21 = vpop.f32.mrf.mxu1 }
 0x3da   : > { %v3459_v18 = vadd.f32 %v1842_v16, %v3284_v7  ;;  %v1370_v7 = vsub.f32 %v3392_v8, %v1363_v32  ;;  %v1277_v16 = vpop.xlane.xlu1 %1276  ;;  %v1118_v32 = vsub.f32 %v3407_v20, %v1115_v60 }
 0x3db   : > { %v3477_v37 = vpop.eup %2797 }
 0x3dc   : > { %v1848_v26 = vsel %vm1023_vm12, %v3459_v18, -inf  ;;  %v1373_v47 = vmul.f32 1.442695, %v1370_v7  ;;  %v1581_v58 = vsel %vm1023_vm12, %v3477_v37, 0.0  ;;  %v1123_v20 = vmul.f32 1.442695, %v1118_v32 }
 0x3dd   : > { %1849 = vmax.xlane.f32.xlu0 %v1848_v26  ;;  %v1568_v42 = vpop.xlane.xlu0 %1567 }
 0x3de   : > { %2799 = vpow2.f32 %v1373_v47  ;;  %v1573_v52 = vsub.f32 %v1561_v61, %v1568_v42 }
 0x3df   : > { %v1836_v30 = vpop.f32.mrf.mxu0 }
 0x3e0   : > { %v1843_v23 = vmul.f32 0.25, %v1836_v30  ;;  %v1577_v62 = vmul.f32 1.442695, %v1573_v52  ;;  %v2734_v30 = vunpack.i.l.bf16 %v3456_v11 }
 0x3e2   : > { %v3467_v36 = vadd.f32 %v1843_v23, %v3291_v15  ;;  %2801 = vpow2.f32 %v1577_v62  ;;  %v1931_v23 = vmul.f32 0.25, %v1922_v21  ;;  %v3523_v42 = vpop.permute.xlu1 %2742  ;;  %v1281_v62 = vsub.f32 %v3410_v25, %v3454_v6 }
 0x3e3   : > { %2803 = vpow2.f32 %v1119_v63 }
 0x3e4   : > { %v1851_v38 = vsel %vm1023_vm12, %v3467_v36, -inf  ;;  %v3494_v55 = vpop.eup %2799  ;;  %2805 = vpow2.f32 %v1121_v13  ;;  %v3526_v47 = vadd.f32 %v1931_v23, %v3389_v41  ;;  %v1925_v41 = vpop.f32.mrf.mxu1  ;;  %v1284_v3 = vmul.f32 1.442695, %v1281_v62 }
 0x3e5   : > { %1365 = vmax.xlane.f32.xlu0 %v1364_v40  ;;  %1852 = vmax.xlane.f32.xlu2 %v1851_v38  ;;  %v3489_v61 = vpop.xlane.xlu0 %1570  ;;  %v1379_v9 = vsel %vm1023_vm12, %v3494_v55, 0.0  ;;  %v2735_v40 = vunpack.i.h.bf16 %v3456_v11  ;;  %v2745_v11 = vunpack.i.h.bf16 %v3523_v42  ;;  %2807 = vpow2.f32 %v1123_v20 }
 0x3e6   : > { %2809 = vpow2.f32 %v1284_v3 }
 0x3e7   : > { %v1839_v48 = vpop.f32.mrf.mxu0 }
 0x3e8   : > { %v1844_v15 = vmul.f32 0.25, %v1839_v48  ;;  %v3510_v5 = vpop.eup %2801 }
 0x3e9   : > { %v3512_v28 = vpop.eup %2803  ;;  %v1584_v7 = vsel %vm1023_vm12, %v3510_v5, 0.0 }
 0x3ea   : > { %v3480_v8 = vadd.f32 %v1844_v15, %v3298_v24  ;;  %v1125_v38 = vsel %vm1023_vm12, %v3512_v28, 0.0  ;;  %v3528_v48 = vpop.eup %2805 }
 0x3eb   : > { %v1128_v56 = vsel %vm1023_vm12, %v3528_v48, 0.0  ;;  %v3535_v51 = vpop.eup %2807 }
 0x3ec   : > { %v1854_v59 = vsel %vm1023_vm12, %v3480_v8, -inf  ;;  %v1928_v60 = vpop.f32.mrf.mxu1 }
 0x3ed   : > { %1582 = vadd.xlane.f32.xlu0 %v1581_v58  ;;  %1653 = vmax.xlane.f32.xlu2 %v1652_v53  ;;  %v1937_v53 = vsel %vm1023_vm12, %v3526_v47, -inf  ;;  %v1932_v58 = vmul.f32 0.25, %v1925_v41  ;;  %v1933_v63 = vmul.f32 0.25, %v1928_v60 }
 0x3ee   : > { %1855 = vmax.xlane.f32.xlu1 %v1854_v59  ;;  %v1131_v59 = vsel %vm1023_vm12, %v3535_v51, 0.0 }
 0x3ef   : > { %v3540_v57 = vadd.f32 %v1932_v58, %v3345_v35  ;;  %v3547_v34 = vadd.f32 %v1933_v63, %v3402_v17 }
 0x3f1   : > { %v1940_v14 = vsel %vm1023_vm12, %v3540_v57, -inf  ;;  %v1943_v35 = vsel %vm1023_vm12, %v3547_v34, -inf }
 0x3f5   : > { %1656 = vmax.xlane.f32.xlu2 %v1655_v4  ;;  %1380 = vadd.xlane.f32.xlu0 %v1379_v9  ;;  %v1282_v4 = vsub.f32 %v3417_v29, %v1277_v16  ;;  %v3562_v29 = vpop.f32.mrf.mxu3 }
 0x3f6   : > { %1368 = vmax.xlane.f32.xlu1 %v1367_v46  ;;  %v3552_v46 = vpop.eup %2809 }
 0x3f7   : > { %v1286_v9 = vmul.f32 1.442695, %v1282_v4  ;;  %v1290_v25 = vsel %vm1023_vm12, %v3552_v46, 0.0 }
 0x3f8   : > { %v2728_v19 = vpop.permute.xlu0 %2727 }
 0x3f9   : > { %v2730_v26 = vunpack.i.h.bf16 %v2728_v19  ;;  %v2729_v27 = vunpack.i.l.bf16 %v2728_v19  ;;  %2811 = vpow2.f32 %v1286_v9 }
 0x3fb   : > { %1428 = vmatpush.msra.mxu2 %v2729_v27  ;;  %1475 = vmatpush.msra.mxu3 %v2730_v26 }
 0x3fd   : > { %1659 = vmax.xlane.f32.xlu2 %v1658_v39  ;;  %1585 = vadd.xlane.f32.xlu0 %v1584_v7  ;;  %v3567_v27 = vpop.f32.mrf.mxu3 }
 0x3fe   : > { %1126 = vadd.xlane.f32.xlu1 %v1125_v38  ;;  %1429 = vmatpush.msra.mxu2 %v2734_v30 }
 0x3ff   : > { %1476 = vmatpush.msra.mxu3 %v2735_v40  ;;  %v3556_v6 = vpop.eup %2811 }
 0x400   : > { %v2738_v45 = vpop.permute.xlu0 %2737  ;;  %v1293_v17 = vsel %vm1023_vm12, %v3556_v6, 0.0 }
 0x401   : > { %v2740_v15 = vunpack.i.h.bf16 %v2738_v45  ;;  %v2739_v52 = vunpack.i.l.bf16 %v2738_v45 }
 0x403   : > { %1430 = vmatpush.msra.mxu2 %v2739_v52  ;;  %1477 = vmatpush.msra.mxu3 %v2740_v15 }
 0x405   : > { %1760 = vmatpush.msrb.mxu3 %v2745_v11  ;;  %1938 = vmax.xlane.f32.xlu2 %v1937_v53  ;;  %v3576_v38 = vpop.f32.mrf.mxu3 }
 0x406   : > { %1129 = vadd.xlane.f32.xlu1 %v1128_v56 }
 0x40e   : > { %1132 = vadd.xlane.f32.xlu1 %v1131_v59 }
 0x416   : > { %1941 = vmax.xlane.f32.xlu1 %v1940_v14 }
 0x41e   : > { %1944 = vmax.xlane.f32.xlu1 %v1943_v35 }
 0x426   : > { %1291 = vadd.xlane.f32.xlu1 %v1290_v25 }
 0x42e   : > { %1294 = vadd.xlane.f32.xlu1 %v1293_v17  ;;  %v2744_v17 = vunpack.i.l.bf16 %v3523_v42 }
 0x450   : > { %v3560_v13 = vpop.xlane.xlu0 %1849 }
 0x458   : > { %v1366_v16 = vpop.xlane.xlu0 %1365  ;;  %v3564_v19 = vpop.xlane.xlu2 %1852 }
 0x459   : > { %v1371_v21 = vsub.f32 %v3464_v33, %v1366_v16 }
 0x45b   : > { %v1375_v26 = vmul.f32 1.442695, %v1371_v21 }
 0x45d   : > { %2813 = vpow2.f32 %v1375_v26 }
 0x460   : > { %v1654_v30 = vpop.xlane.xlu2 %1653  ;;  %v3604_v16 = vpop.xlane.xlu0 %1582 }
 0x461   : > { %v3569_v32 = vpop.xlane.xlu1 %1855  ;;  %v1661_v23 = vsub.f32 %v3475_v50, %v1654_v30  ;;  %v1574_v50 = vsub.f32 %v3444_v1, %v3489_v61 }
 0x463   : > { %v3572_v39 = vpop.eup %2813  ;;  %v1664_v7 = vmul.f32 1.442695, %v1661_v23  ;;  %v1579_v41 = vmul.f32 1.442695, %v1574_v50 }
 0x464   : > { %v1382_v40 = vsel %vm1023_vm12, %v3572_v39, 0.0 }
 0x465   : > { %2815 = vpow2.f32 %v1664_v7  ;;  %1383 = vadd.xlane.f32.xlu1 %v1382_v40 }
 0x468   : > { %v1657_v33 = vpop.xlane.xlu2 %1656  ;;  %v1381_v7 = vpop.xlane.xlu0 %1380 }
 0x469   : > { %v1369_v20 = vpop.xlane.xlu1 %1368  ;;  %v1662_v45 = vsub.f32 %v3492_v0, %v1657_v33  ;;  %v1263_v0 = vpop.f32.mrf.mxu3 }
 0x46a   : > { %v1372_v15 = vsub.f32 %v3497_v2, %v1369_v20  ;;  %v1268_v61 = vmul.f32 0.25, %v1263_v0 }
 0x46b   : > { %v3580_v52 = vpop.eup %2815  ;;  %v1666_v11 = vmul.f32 1.442695, %v1662_v45 }
 0x46c   : > { %v1377_v53 = vmul.f32 1.442695, %v1372_v15  ;;  %v1670_v56 = vsel %vm1023_vm12, %v3580_v52, 0.0  ;;  %v3601_v25 = vadd.f32 %v1268_v61, %v3298_v24 }
 0x46d   : > { %2817 = vpow2.f32 %v1666_v11  ;;  %1671 = vadd.xlane.f32.xlu1 %v1670_v56 }
 0x46e   : > { %2819 = vpow2.f32 %v1377_v53 }
 0x470   : > { %v3586_v58 = vpop.xlane.xlu2 %1659 }
 0x471   : > { %v1127_v59 = vpop.xlane.xlu1 %1126 }
 0x472   : > { %2821 = vrcp.f32 %v1127_v59 }
 0x473   : > { %v3588_v2 = vpop.eup %2817  ;;  %2823 = vpow2.f32 %v1579_v41  ;;  %v1857_v41 = vsub.f32 %v3459_v18, %v3560_v13 }
 0x474   : > { %v3590_v60 = vpop.eup %2819  ;;  %v1673_v1 = vsel %vm1023_vm12, %v3588_v2, 0.0 }
 0x475   : > { %v1385_v62 = vsel %vm1023_vm12, %v3590_v60, 0.0  ;;  %1674 = vadd.xlane.f32.xlu0 %v1673_v1 }
 0x476   : > { %1386 = vadd.xlane.f32.xlu2 %v1385_v62 }
 0x478   : > { %v2822_v63 = vpop.eup %2821  ;;  %v1939_v14 = vpop.xlane.xlu2 %1938 }
 0x479   : > { %v3596_v3 = vpop.eup %2823  ;;  %v1137_v4 = vmul.f32 %v2822_v63, %v3512_v28  ;;  %v1130_v35 = vpop.xlane.xlu1 %1129  ;;  %v1946_v9 = vsub.f32 %v3526_v47, %v1939_v14  ;;  %v1278_v28 = vsel %vm1023_vm12, %v3601_v25, -inf }
 0x47a   : > { %2825 = vrcp.f32 %v1130_v35  ;;  %v1587_v26 = vsel %vm1023_vm12, %v3596_v3, 0.0 }
 0x47b   : > { %v1949_v21 = vmul.f32 1.442695, %v1946_v9  ;;  %2542 = vmatmul.msk.f32.vlgmr.msrb.gmra.mxu2 %vm1023_vm12, %v1137_v4 }
 0x47c   : > { %1716 = vmatpush.msrb.mxu2 %v2744_v17 }
 0x47d   : > { %2827 = vpow2.f32 %v1949_v21  ;;  %1588 = vadd.xlane.f32.xlu0 %v1587_v26 }
 0x47e   : > { %1279 = vmax.xlane.f32.xlu2 %v1278_v28 }
 0x480   : > { %v2826_v24 = vpop.eup %2825 }
 0x481   : > { %v1133_v47 = vpop.xlane.xlu1 %1132  ;;  %v1138_v42 = vmul.f32 %v2826_v24, %v3528_v48 }
 0x482   : > { %2829 = vrcp.f32 %v1133_v47 }
 0x483   : > { %v3612_v30 = vpop.eup %2827  ;;  %2543 = vmatmul.msk.f32.gmra.mxu2 %vm1023_vm12, %v1138_v42  ;;  %2831 = vrcp.f32 %v1381_v7 }
 0x484   : > { %v1955_v23 = vsel %vm1023_vm12, %v3612_v30, 0.0 }
 0x485   : > { %1956 = vadd.xlane.f32.xlu0 %v1955_v23 }
 0x488   : > { %v2830_v40 = vpop.eup %2829 }
 0x489   : > { %v1942_v33 = vpop.xlane.xlu1 %1941  ;;  %v1139_v20 = vmul.f32 %v2830_v40, %v3535_v51  ;;  %v2832_v45 = vpop.eup %2831 }
 0x48a   : > { %v1391_v48 = vmul.f32 %v2832_v45, %v3494_v55  ;;  %v1947_v59 = vsub.f32 %v3540_v57, %v1942_v33 }
 0x48b   : > { %2544 = vmatmul.msk.f32.gmra.mxu2 %vm1023_vm12, %v1139_v20  ;;  %v1858_v20 = vsub.f32 %v3467_v36, %v3564_v19 }
 0x48c   : > { %v1951_v0 = vmul.f32 1.442695, %v1947_v59 }
 0x491   : > { %v3620_v15 = vpop.xlane.xlu1 %1944 }
 0x493   : > { %2560 = vmatmul.msk.f32.vlgmr.msra.gmra.mxu2 %vm1023_vm12, %v1391_v48 }
 0x496   : > { %2747 = vrot.lane.b32.xlu2 %v3235_v49, %s2939_s0 }
 0x499   : > { %v1292_v50 = vpop.xlane.xlu1 %1291  ;;  %2757 = vrot.lane.b32.xlu0 %v3243_v54, %s2941_s25  ;;  %v1860_v54 = vmul.f32 1.442695, %v1857_v41 }
 0x49a   : > { %2833 = vrcp.f32 %v1292_v50 }
 0x4a0   : > { %v2834_v11 = vpop.eup %2833 }
 0x4a1   : > { %v1302_v51 = vmul.f32 %v2834_v11, %v3552_v46  ;;  %v1295_v53 = vpop.xlane.xlu1 %1294  ;;  %2762 = vrot.lane.b32.xlu0 %v3235_v49, %s2941_s25 }
 0x4a2   : > { %2835 = vrcp.f32 %v1295_v53 }
 0x4a3   : > { %2563 = vmatmul.msk.f32.vlgmr.msra.gmra.mxu3 %vm1023_vm12, %v1302_v51  ;;  %2837 = vpow2.f32 %v1860_v54 }
 0x4a4   : > { %2839 = vpow2.f32 %v1951_v0 }
 0x4a8   : > { %v2836_v55 = vpop.eup %2835 }
 0x4a9   : > { %v1303_v56 = vmul.f32 %v2836_v55, %v3556_v6  ;;  %v3636_v46 = vpop.eup %2837 }
 0x4aa   : > { %v1866_v49 = vsel %vm1023_vm12, %v3636_v46, 0.0  ;;  %v3640_v1 = vpop.eup %2839 }
 0x4ab   : > { %2564 = vmatmul.msk.f32.gmra.mxu3 %vm1023_vm12, %v1303_v56  ;;  %v1958_v6 = vsel %vm1023_vm12, %v3640_v1, 0.0 }
 0x4bf   : > { %1867 = vadd.xlane.f32.xlu2 %v1866_v49 }
 0x4cb   : > { %1959 = vadd.xlane.f32.xlu0 %v1958_v6 }
 0x4d7   : > { %2767 = vrot.lane.b32.xlu2 %v3223_v44, %s2941_s25  ;;  %s565_s25 = scalar_lea.vmem %s3823_s17, %s2697_s19 }
 0x4d8   : > { %v1384_v18 = vpop.xlane.xlu1 %1383 }
 0x4d9   : > { %2841 = vrcp.f32 %v1384_v18 }
 0x4df   : > { %v2842_v57 = vpop.eup %2841 }
 0x4e0   : > { %v1392_v13 = vmul.f32 %v2842_v57, %v3572_v39  ;;  %v1672_v59 = vpop.xlane.xlu1 %1671 }
 0x4e2   : > { %2561 = vmatmul.msk.f32.gmra.mxu2 %vm1023_vm12, %v1392_v13 }
 0x4e9   : > { %v1387_v61 = vpop.xlane.xlu2 %1386 }
 0x4ea   : > { %2843 = vrcp.f32 %v1387_v61 }
 0x4f0   : > { %v2844_v62 = vpop.eup %2843 }
 0x4f1   : > { %v1280_v63 = vpop.xlane.xlu2 %1279  ;;  %v1393_v14 = vmul.f32 %v2844_v62, %v3590_v60 }
 0x4f2   : > { %v1283_v4 = vsub.f32 %v3601_v25, %v1280_v63 }
 0x4f3   : > { %2562 = vmatmul.msk.f32.gmra.mxu2 %vm1023_vm12, %v1393_v14 }
 0x4f4   : > { %v1288_v35 = vmul.f32 1.442695, %v1283_v4 }
 0x4f6   : > { %2845 = vpow2.f32 %v1288_v35 }
 0x4f9   : > { %v2748_v9 = vpop.permute.xlu2 %2747 }
 0x4fa   : > { %v2750_v17 = vunpack.i.h.bf16 %v2748_v9  ;;  %v2749_v21 = vunpack.i.l.bf16 %v2748_v9 }
 0x4fc   : > { %v2846_v26 = vpop.eup %2845  ;;  %1717 = vmatpush.msrb.mxu2 %v2749_v21  ;;  %1761 = vmatpush.msrb.mxu3 %v2750_v17 }
 0x4fd   : > { %v1296_v39 = vsel %vm1023_vm12, %v2846_v26, 0.0 }
 0x4fe   : > { %v1166_v28 = vpop.f32.mrf.mxu2  ;;  %1297 = vadd.xlane.f32.xlu1 %v1296_v39 }
 0x4ff   : > { %v1202_v24 = vadd.f32 %v3562_v29, %v1166_v28  ;;  %v1663_v29 = vsub.f32 %v3508_v43, %v3586_v58  ;;  %v1948_v43 = vsub.f32 %v3547_v34, %v3620_v15  ;;  %v1586_v34 = vpop.xlane.xlu0 %1585 }
 0x501   : > { %v1210_v47 = vmul.f32 0.5, %v1202_v24  ;;  %v1668_v33 = vmul.f32 1.442695, %v1663_v29  ;;  %v1953_v19 = vmul.f32 1.442695, %v1948_v43 }
 0x503   : > { %1213 = vst.msk [vmem:[#allocation2] sm:$0xff] %vm972_vm11, %v1210_v47  ;;  %2847 = vpow2.f32 %v1668_v33 }
 0x506   : > { %v1169_v60 = vpop.f32.mrf.mxu2 }
 0x507   : > { %v1205_v25 = vadd.f32 %v3567_v27, %v1169_v60  ;;  %v1862_v27 = vmul.f32 1.442695, %v1858_v20  ;;  %v1675_v53 = vpop.xlane.xlu0 %1674 }
 0x509   : > { %v1211_v42 = vmul.f32 0.5, %v1205_v25  ;;  %v3664_v45 = vpop.eup %2847  ;;  %2849 = vpow2.f32 %v1862_v27 }
 0x50a   : > { %v1676_v48 = vsel %vm1023_vm12, %v3664_v45, 0.0 }
 0x50b   : > { %1214 = vst.msk [vmem:[#allocation2 + $0x8] sm:$0xff] %vm972_vm11, %v1211_v42 }
 0x50e   : > { %v1172_v23 = vpop.f32.mrf.mxu2 }
 0x50f   : > { %v1208_v7 = vadd.f32 %v3576_v38, %v1172_v23  ;;  %v1859_v38 = vsub.f32 %v3480_v8, %v3569_v32  ;;  %v3670_v50 = vpop.eup %2849  ;;  %v1589_v49 = vpop.xlane.xlu0 %1588 }
 0x510   : > { %v1869_v36 = vsel %vm1023_vm12, %v3670_v50, 0.0 }
 0x511   : > { %v1212_v40 = vmul.f32 0.5, %v1208_v7 }
 0x513   : > { %1215 = vst.msk [vmem:[#allocation2 + $0x10] sm:$0xff] %vm972_vm11, %v1212_v40 }
 0x516   : > { %v1432_v15 = vpop.f32.mrf.mxu2 }
 0x517   : > { %2752 = vrot.lane.b32.xlu1 %v3223_v44, %s2939_s0  ;;  %v1864_v44 = vmul.f32 1.442695, %v1859_v38  ;;  %s2942_s0 = smov 16   ;;  %v1957_v13 = vpop.xlane.xlu0 %1956 }
 0x519   : > { %2851 = vpow2.f32 %v1864_v44 }
 0x51a   : > { %2853 = vpow2.f32 %v1953_v19 }
 0x51f   : > { %v3676_v58 = vpop.eup %2851  ;;  %v2758_v62 = vpop.permute.xlu0 %2757 }
 0x520   : > { %v1872_v8 = vsel %vm1023_vm12, %v3676_v58, 0.0  ;;  %v3680_v32 = vpop.eup %2853  ;;  %v2759_v24 = vunpack.i.l.bf16 %v2758_v62 }
 0x521   : > { %v1961_v11 = vsel %vm1023_vm12, %v3680_v32, 0.0 }
 0x526   : > { %v1479_v51 = vpop.f32.mrf.mxu3 }
 0x527   : > { %v1480_v0 = vadd.f32 %v1479_v51, %v1432_v15  ;;  %v2763_v28 = vpop.permute.xlu0 %2762 }
 0x528   : > { %v2765_v47 = vunpack.i.h.bf16 %v2763_v28  ;;  %v2764_v60 = vunpack.i.l.bf16 %v2763_v28 }
 0x529   : > { %v1488_v6 = vmul.f32 0.5, %v1480_v0 }
 0x52e   : > { %v1482_v55 = vpop.f32.mrf.mxu3 }
 0x532   : > { %v1868_v63 = vpop.xlane.xlu2 %1867 }
 0x541   : > { %1677 = vadd.xlane.f32.xlu1 %v1676_v48  ;;  %v1960_v48 = vpop.xlane.xlu0 %1959 }
 0x549   : > { %1870 = vadd.xlane.f32.xlu1 %v1869_v36 }
 0x551   : > { %1873 = vadd.xlane.f32.xlu1 %v1872_v8 }
 0x559   : > { %1962 = vadd.xlane.f32.xlu1 %v1961_v11 }
 0x565   : > { %v1435_v56 = vpop.f32.mrf.mxu2 }
 0x566   : > { %v1483_v41 = vadd.f32 %v1482_v55, %v1435_v56 }
 0x568   : > { %v1489_v54 = vmul.f32 0.5, %v1483_v41 }
 0x56a   : > { %1496 = vrot.lane.b32.xlu2 %v1489_v54, %s2942_s0 }
 0x571   : > { %v1298_v18 = vpop.xlane.xlu1 %1297 }
 0x572   : > { %2855 = vrcp.f32 %v1298_v18  ;;  %1494 = vrot.lane.b32.xlu1 %v1488_v6, %s2942_s0 }
 0x573   : > { %2857 = vrcp.f32 %v3604_v16  ;;  %v2768_v16 = vpop.permute.xlu2 %2767 }
 0x574   : > { %2859 = vrcp.f32 %v1672_v59  ;;  %v2770_v23 = vunpack.i.h.bf16 %v2768_v16 }
 0x575   : > { %2861 = vrcp.f32 %v1586_v34 }
 0x576   : > { %2863 = vrcp.f32 %v1675_v53  ;;  %v1438_v53 = vpop.f32.mrf.mxu2 }
 0x577   : > { %2865 = vrcp.f32 %v1589_v49 }
 0x578   : > { %v2856_v57 = vpop.eup %2855  ;;  %2867 = vrcp.f32 %v1868_v63 }
 0x579   : > { %v1304_v61 = vmul.f32 %v2856_v57, %v2846_v26  ;;  %v2858_v14 = vpop.eup %2857  ;;  %v2760_v26 = vunpack.i.h.bf16 %v2758_v62 }
 0x57a   : > { %v2860_v4 = vpop.eup %2859  ;;  %v1593_v21 = vmul.f32 %v2858_v14, %v3477_v37  ;;  %v2769_v37 = vunpack.i.l.bf16 %v2768_v16 }
 0x57b   : > { %2565 = vmatmul.msk.f32.gmra.mxu3 %vm1023_vm12, %v1304_v61  ;;  %v1682_v39 = vmul.f32 %v2860_v4, %v3580_v52  ;;  %v2862_v25 = vpop.eup %2861 }
 0x57c   : > { %v2864_v42 = vpop.eup %2863  ;;  %v1594_v7 = vmul.f32 %v2862_v25, %v3510_v5 }
 0x57d   : > { %v1683_v52 = vmul.f32 %v2864_v42, %v3588_v2  ;;  %v2866_v40 = vpop.eup %2865 }
 0x57e   : > { %v1595_v29 = vmul.f32 %v2866_v40, %v3596_v3  ;;  %v2868_v33 = vpop.eup %2867 }
 0x57f   : > { %v1878_v20 = vmul.f32 %v2868_v33, %v3636_v46 }
 0x589   : > { %v2753_v35 = vpop.permute.xlu1 %2752 }
 0x58a   : > { %v2755_v9 = vunpack.i.h.bf16 %v2753_v35  ;;  %v2754_v17 = vunpack.i.l.bf16 %v2753_v35 }
 0x58c   : > { %1718 = vmatpush.msrb.mxu2 %v2754_v17  ;;  %1762 = vmatpush.msrb.mxu3 %v2755_v9 }
 0x58d   : > { %2578 = vmatmul.msk.f32.vlgmr.msrb.gmra.mxu2 %vm1023_vm12, %v1682_v39  ;;  %2581 = vmatmul.msk.f32.vlgmr.msrb.gmra.mxu3 %vm1023_vm12, %v1593_v21 }
 0x58e   : > { %2001 = vmatpush.msra.mxu2 %v2759_v24  ;;  %2045 = vmatpush.msra.mxu3 %v2760_v26 }
 0x590   : > { %2002 = vmatpush.msra.mxu2 %v2764_v60  ;;  %2046 = vmatpush.msra.mxu3 %v2765_v47 }
 0x592   : > { %2003 = vmatpush.msra.mxu2 %v2769_v37  ;;  %2047 = vmatpush.msra.mxu3 %v2770_v23 }
 0x595   : > { %2579 = vmatmul.msk.f32.gmra.mxu2 %vm1023_vm12, %v1683_v52  ;;  %2582 = vmatmul.msk.f32.gmra.mxu3 %vm1023_vm12, %v1594_v7 }
 0x59d   : > { %2583 = vmatmul.msk.f32.gmra.mxu3 %vm1023_vm12, %v1595_v29 }
 0x5a5   : > { %2599 = vmatmul.msk.f32.vlgmr.msra.gmra.mxu3 %vm1023_vm12, %v1878_v20 }
 0x5b4   : > { %v1678_v27 = vpop.xlane.xlu1 %1677 }
 0x5b5   : > { %2869 = vrcp.f32 %v1678_v27 }
 0x5b6   : > { %2871 = vrcp.f32 %v1957_v13 }
 0x5bb   : > { %v2870_v2 = vpop.eup %2869 }
 0x5bc   : > { %v1871_v5 = vpop.xlane.xlu1 %1870  ;;  %v1684_v38 = vmul.f32 %v2870_v2, %v3664_v45  ;;  %v2872_v44 = vpop.eup %2871 }
 0x5bd   : > { %2873 = vrcp.f32 %v1871_v5  ;;  %v1967_v43 = vmul.f32 %v2872_v44, %v3612_v30 }
 0x5be   : > { %2580 = vmatmul.msk.f32.gmra.mxu2 %vm1023_vm12, %v1684_v38  ;;  %2875 = vrcp.f32 %v1960_v48 }
 0x5c3   : > { %v2874_v3 = vpop.eup %2873 }
 0x5c4   : > { %v1874_v46 = vpop.xlane.xlu1 %1873  ;;  %v1497_v36 = vpop.permute.xlu2 %1496  ;;  %v1879_v19 = vmul.f32 %v2874_v3, %v3670_v50 }
 0x5c5   : > { %2877 = vrcp.f32 %v1874_v46  ;;  %1505 = vst.msk [vmem:[#allocation2 + $0x8] sm:$0xff] %vm1503_vm13, %v1497_v36  ;;  %v2876_v45 = vpop.eup %2875 }
 0x5c6   : > { %2596 = vmatmul.msk.f32.vlgmr.msra.gmra.mxu2 %vm1023_vm12, %v1967_v43  ;;  %2600 = vmatmul.msk.f32.gmra.mxu3 %vm1023_vm12, %v1879_v19  ;;  %v1968_v51 = vmul.f32 %v2876_v45, %v3640_v1 }
 0x5cb   : > { %v2878_v8 = vpop.eup %2877 }
 0x5cc   : > { %v1963_v11 = vpop.xlane.xlu1 %1962  ;;  %v1880_v34 = vmul.f32 %v2878_v8, %v3676_v58 }
 0x5cd   : > { %2879 = vrcp.f32 %v1963_v11 }
 0x5ce   : > { %2597 = vmatmul.msk.f32.gmra.mxu2 %vm1023_vm12, %v1968_v51  ;;  %2601 = vmatmul.msk.f32.gmra.mxu3 %vm1023_vm12, %v1880_v34 }
 0x5d3   : > { %v2880_v30 = vpop.eup %2879 }
 0x5d4   : > { %v1969_v50 = vmul.f32 %v2880_v30, %v3680_v32 }
 0x5d6   : > { %2598 = vmatmul.msk.f32.gmra.mxu2 %vm1023_vm12, %v1969_v50 }
 0x5e4   : > { %v1495_v15 = vpop.permute.xlu1 %1494 }
 0x5e5   : > { %1504 = vst.msk [vmem:[#allocation2] sm:$0xff] %vm1503_vm13, %v1495_v15  ;;  %v2681_v15 = vld [vmem:[#allocation3 + $0x18] sm:$0xff] }
 0x5e6   : > { %2211 = vmatpush.bf16.msrb.mxu0 %v2681_v15 }
 0x5fe   : > { %v1485_v55 = vpop.f32.mrf.mxu3 }
 0x5ff   : > { %v1486_v56 = vadd.f32 %v1485_v55, %v1438_v53  ;;  %v2680_v53 = vld [vmem:[#allocation3 + $0x10] sm:$0xff]  ;;  %v2679_v55 = vld [vmem:[#allocation3 + $0x8] sm:$0xff] }
 0x600   : > { %2212 = vmatpush.bf16.msrb.mxu0 %v2680_v53 }
 0x601   : > { %v1490_v35 = vmul.f32 0.5, %v1486_v56 }
 0x604   : > { %2213 = vmatpush.bf16.msrb.mxu0 %v2679_v55 }
 0x610   : > { %v1720_v41 = vpop.f32.mrf.mxu2  ;;  %v1764_v1 = vpop.f32.mrf.mxu3 }
 0x611   : > { %v1765_v54 = vadd.f32 %v1764_v1, %v1720_v41  ;;  %v2678_v41 = vld [vmem:[#allocation3] sm:$0xff] }
 0x612   : > { %2214 = vmatpush.bf16.msrb.mxu0 %v2678_v41 }
 0x613   : > { %v1773_v58 = vmul.f32 0.5, %v1765_v54 }
 0x615   : > { %1779 = vrot.lane.b32.xlu2 %v1773_v58, %s2943_s30 }
 0x618   : > { %v1723_v59 = vpop.f32.mrf.mxu2  ;;  %v1767_v0 = vpop.f32.mrf.mxu3 }
 0x619   : > { %v1768_v49 = vadd.f32 %v1767_v0, %v1723_v59 }
 0x61b   : > { %v1774_v6 = vmul.f32 0.5, %v1768_v49 }
 0x61d   : > { %1781 = vrot.lane.b32.xlu0 %v1774_v6, %s2943_s30 }
 0x620   : > { %v1770_v32 = vpop.f32.mrf.mxu3 }
 0x628   : > { %v2049_v57 = vpop.f32.mrf.mxu3 }
 0x641   : > { %v1726_v18 = vpop.f32.mrf.mxu2 }
 0x642   : > { %v1771_v17 = vadd.f32 %v1770_v32, %v1726_v18 }
 0x644   : > { %v1775_v26 = vmul.f32 0.5, %v1771_v17 }
 0x649   : > { %v2005_v13 = vpop.f32.mrf.mxu2  ;;  %v2052_v63 = vpop.f32.mrf.mxu3 }
 0x64a   : > { %v2050_v61 = vadd.f32 %v2049_v57, %v2005_v13 }
 0x64c   : > { %v2058_v62 = vmul.f32 0.5, %v2050_v61 }
 0x64e   : > { %2064 = vrot.lane.b32.xlu2 %v2058_v62, %s2944_s21 }
 0x651   : > { %v2008_v14 = vpop.f32.mrf.mxu2  ;;  %v2055_v21 = vpop.f32.mrf.mxu3 }
 0x652   : > { %v2053_v4 = vadd.f32 %v2052_v63, %v2008_v14 }
 0x654   : > { %v2059_v9 = vmul.f32 0.5, %v2053_v4 }
 0x656   : > { %2066 = vrot.lane.b32.xlu1 %v2059_v9, %s2944_s21  ;;  %1498 = vrot.lane.b32.xlu2 %v1490_v35, %s2942_s0  ;;  %v2773_v9 = vld [vmem:[%s3817_s11] ss:$0 sm:$0xff] }
 0x659   : > { %v2011_v39 = vpop.f32.mrf.mxu2 }
 0x65a   : > { %v2056_v28 = vadd.f32 %v2055_v21, %v2011_v39 }
 0x65c   : > { %v2060_v24 = vmul.f32 0.5, %v2056_v28 }
 0x65e   : > { %1783 = vrot.lane.b32.xlu1 %v1775_v26, %s2943_s30  ;;  %2068 = vrot.lane.b32.xlu2 %v2060_v24, %s2944_s21  ;;  %v2774_v26 = vld [vmem:[%s3818_s12] ss:$0 sm:$0xff] }
 0x66f   : > { %v1780_v16 = vpop.permute.xlu2 %1779 }
 0x670   : > { %1789 = vst.msk [vmem:[#allocation2] sm:$0xff] %vm1788_vm14, %v1780_v16 }
 0x68f   : > { %v1782_v47 = vpop.permute.xlu0 %1781 }
 0x690   : > { %1790 = vst.msk [vmem:[#allocation2 + $0x8] sm:$0xff] %vm1788_vm14, %v1782_v47 }
 0x6a8   : > { %v2065_v60 = vpop.permute.xlu2 %2064 }
 0x6a9   : > { %2074 = vst.msk [vmem:[#allocation2] sm:$0xff] %vm2073_vm15, %v2065_v60 }
 0x6b0   : > { %v1499_v25 = vpop.permute.xlu2 %1498  ;;  %v2077_v42 = vld [vmem:[#allocation2] sm:$0xff] }
 0x6b1   : > { %1506 = vst.msk [vmem:[#allocation2 + $0x10] sm:$0xff] %vm1503_vm13, %v1499_v25  ;;  %v3720_v23 = vadd.f32 %v2077_v42, %v3166_v31 }
 0x6b3   : > { %v2085_v37 = vsel %vm572_vm0, %v3720_v23, 0.0 }
 0x6b4   : > { %2086 = vadd.xlane.f32.xlu0 %v2085_v37 }
 0x6b8   : > { %v2069_v29 = vpop.permute.xlu2 %2068 }
 0x6c8   : > { %v2067_v52 = vpop.permute.xlu1 %2066 }
 0x6c9   : > { %2075 = vst.msk [vmem:[#allocation2 + $0x8] sm:$0xff] %vm2073_vm15, %v2067_v52 }
 0x6d0   : > { %v1784_v7 = vpop.permute.xlu1 %1783  ;;  %v2078_v40 = vld [vmem:[#allocation2 + $0x8] sm:$0xff] }
 0x6d1   : > { %1791 = vst.msk [vmem:[#allocation2 + $0x10] sm:$0xff] %vm1788_vm14, %v1784_v7  ;;  %v3727_v33 = vadd.f32 %v2078_v40, %v3168_v22 }
 0x6d2   : > { %2076 = vst.msk [vmem:[#allocation2 + $0x10] sm:$0xff] %vm2073_vm15, %v2069_v29 }
 0x6d3   : > { %v2088_v31 = vsel %vm572_vm0, %v3727_v33, 0.0 }
 0x6d4   : > { %2089 = vadd.xlane.f32.xlu1 %v2088_v31 }
 0x6d9   : > { %v2079_v20 = vld [vmem:[#allocation2 + $0x10] sm:$0xff] }
 0x6da   : > { %v3733_v27 = vadd.f32 %v2079_v20, %v3147_v10 }
 0x6dc   : > { %v2091_v2 = vsel %vm572_vm0, %v3733_v27, 0.0 }
 0x6dd   : > { %2092 = vadd.xlane.f32.xlu2 %v2091_v2 }
 0x727   : > { %v2087_v5 = vpop.xlane.xlu0 %2086 }
 0x728   : > { %v2094_v38 = vmul.f32 %v2087_v5, %v3057_v12 }
 0x72a   : > { %v2097_v22 = vsub.f32 %v3720_v23, %v2094_v38  ;;  %v2689_v38 = vld [vmem:[%s3821_s15 + $0x38] sm:$0xff] }
 0x72b   : > { %2322 = vmatpush.bf16.msrb.mxu1 %v2689_v38 }
 0x72c   : > { %v2100_v48 = vmul.f32 %v2097_v22, %v2097_v22 }
 0x72e   : > { %v2103_v44 = vsel %vm572_vm0, %v2100_v48, 0.0  ;;  %v2687_v48 = vld [vmem:[%s3821_s15 + $0x28] sm:$0xff] }
 0x72f   : > { %2104 = vadd.xlane.f32.xlu0 %v2103_v44  ;;  %v2686_v44 = vld [vmem:[%s3821_s15 + $0x20] sm:$0xff] }
 0x747   : > { %v2090_v3 = vpop.xlane.xlu1 %2089 }
 0x748   : > { %v2095_v43 = vmul.f32 %v2090_v3, %v3057_v12  ;;  %v2685_v3 = vld [vmem:[%s3821_s15 + $0x18] sm:$0xff] }
 0x74a   : > { %v2098_v46 = vsub.f32 %v3727_v33, %v2095_v43  ;;  %v2684_v43 = vld [vmem:[%s3821_s15 + $0x10] sm:$0xff] }
 0x74c   : > { %v2101_v10 = vmul.f32 %v2098_v46, %v2098_v46 }
 0x74e   : > { %v2106_v36 = vsel %vm572_vm0, %v2101_v10, 0.0  ;;  %v2775_v10 = vld [vmem:[%s3820_s14] ss:$0 sm:$0xff] }
 0x74f   : > { %2107 = vadd.xlane.f32.xlu1 %v2106_v36 }
 0x750   : > { %v2093_v19 = vpop.xlane.xlu2 %2092 }
 0x751   : > { %v2096_v45 = vmul.f32 %v2093_v19, %v3057_v12  ;;  %v2682_v19 = vld [vmem:[%s3821_s15] sm:$0xff] }
 0x753   : > { %v3745_v8 = vsub.f32 %v3733_v27, %v2096_v45 }
 0x755   : > { %v2102_v11 = vmul.f32 %v3745_v8, %v3745_v8 }
 0x757   : > { %v2109_v51 = vsel %vm572_vm0, %v2102_v11, 0.0 }
 0x758   : > { %2110 = vadd.xlane.f32.xlu2 %v2109_v51 }
 0x7a2   : > { %v2105_v34 = vpop.xlane.xlu0 %2104 }
 0x7a3   : > { %v2112_v30 = vmul.f32 %v2105_v34, %v3057_v12 }
 0x7a5   : > { %v2115_v50 = vadd.f32 1e-06, %v2112_v30 }
 0x7a7   : > { %2881 = vrsqrt.f32 %v2115_v50  ;;  %vm2124_vm2 = vweird.f32 %v2115_v50 }
 0x7ad   : > { %v2882_v56 = vpop.eup %2881 }
 0x7ae   : > { %v2119_v1 = vmul.f32 %v2882_v56, %v2115_v50  ;;  %vm2125_vm1 = vweird.f32 %v2882_v56 }
 0x7af   : > { %vm2126_vm3 = vmor %vm2124_vm2, %vm2125_vm1 }
 0x7b0   : > { %v2120_v54 = vmul.f32 %v2882_v56, %v2119_v1 }
 0x7b2   : > { %v2121_v49 = vmul.f32 0.5, %v2120_v54 }
 0x7b4   : > { %v2122_v6 = vsub.f32 1.5, %v2121_v49 }
 0x7b6   : > { %v2123_v13 = vmul.f32 %v2882_v56, %v2122_v6 }
 0x7b8   : > { %v2127_v14 = vsel %vm2126_vm3, %v2882_v56, %v2123_v13 }
 0x7b9   : > { %v2148_v17 = vmul.f32 %v2127_v14, %v2097_v22  ;;  %v2688_v22 = vld [vmem:[%s3821_s15 + $0x30] sm:$0xff] }
 0x7ba   : > { %2323 = vmatpush.bf16.msrb.mxu1 %v2688_v22 }
 0x7bb   : > { %v2154_v24 = vmul.f32 %v2773_v9, %v2148_v17 }
 0x7bd   : > { %v2160_v42 = vadd.f32 %v2774_v26, %v2154_v24 }
 0x7be   : > { %2324 = vmatpush.bf16.msrb.mxu1 %v2687_v48 }
 0x7c2   : > { %v2108_v58 = vpop.xlane.xlu1 %2107  ;;  %2325 = vmatpush.bf16.msrb.mxu1 %v2686_v44 }
 0x7c3   : > { %v2113_v59 = vmul.f32 %v2108_v58, %v3057_v12 }
 0x7c5   : > { %v2116_v0 = vadd.f32 1e-06, %v2113_v59 }
 0x7c6   : > { %2326 = vmatpush.bf16.msrb.mxu1 %v2685_v3 }
 0x7c7   : > { %2883 = vrsqrt.f32 %v2116_v0  ;;  %vm2134_vm5 = vweird.f32 %v2116_v0 }
 0x7ca   : > { %2327 = vmatpush.bf16.msrb.mxu1 %v2684_v43 }
 0x7cb   : > { %v2111_v32 = vpop.xlane.xlu2 %2110 }
 0x7cc   : > { %v2114_v18 = vmul.f32 %v2111_v32, %v3057_v12 }
 0x7cd   : > { %v2884_v57 = vpop.eup %2883 }
 0x7ce   : > { %v2129_v61 = vmul.f32 %v2884_v57, %v2116_v0  ;;  %v2117_v62 = vadd.f32 1e-06, %v2114_v18  ;;  %vm2135_vm4 = vweird.f32 %v2884_v57 }
 0x7cf   : > { %vm2136_vm6 = vmor %vm2134_vm5, %vm2135_vm4 }
 0x7d0   : > { %v2130_v63 = vmul.f32 %v2884_v57, %v2129_v61  ;;  %2885 = vrsqrt.f32 %v2117_v62  ;;  %vm2144_vm8 = vweird.f32 %v2117_v62 }
 0x7d2   : > { %v2131_v4 = vmul.f32 0.5, %v2130_v63 }
 0x7d4   : > { %v2132_v35 = vsub.f32 1.5, %v2131_v4 }
 0x7d6   : > { %v2886_v21 = vpop.eup %2885  ;;  %v2133_v12 = vmul.f32 %v2884_v57, %v2132_v35 }
 0x7d7   : > { %v2139_v39 = vmul.f32 %v2886_v21, %v2117_v62  ;;  %vm2145_vm7 = vweird.f32 %v2886_v21 }
 0x7d8   : > { %v2137_v28 = vsel %vm2136_vm6, %v2884_v57, %v2133_v12  ;;  %vm2146_vm9 = vmor %vm2144_vm8, %vm2145_vm7 }
 0x7d9   : > { %v2149_v16 = vmul.f32 %v2137_v28, %v2098_v46  ;;  %v2140_v47 = vmul.f32 %v2886_v21, %v2139_v39  ;;  %v2683_v46 = vld [vmem:[%s3821_s15 + $0x8] sm:$0xff] }
 0x7da   : > { %2328 = vmatpush.bf16.msrb.mxu1 %v2683_v46 }
 0x7db   : > { %v2155_v60 = vmul.f32 %v2773_v9, %v2149_v16  ;;  %v2141_v25 = vmul.f32 0.5, %v2140_v47 }
 0x7dd   : > { %v2161_v37 = vadd.f32 %v2774_v26, %v2155_v60  ;;  %v2142_v52 = vsub.f32 1.5, %v2141_v25 }
 0x7de   : > { %2329 = vmatpush.bf16.msrb.mxu1 %v2682_v19 }
 0x7df   : > { %v2143_v7 = vmul.f32 %v2886_v21, %v2142_v52  ;;  %v2163_v40 = vpack.c.bf16 %v2161_v37, %v2160_v42 }
 0x7e1   : > { %v2147_v29 = vsel %vm2146_vm9, %v2886_v21, %v2143_v7  ;;  %2618 = vmatmul.msk.bf16.vlgmr.msrb.gmra.mxu0 %vm572_vm0, %v2163_v40 }
 0x7e2   : > { %v2150_v31 = vmul.f32 %v2147_v29, %v3745_v8 }
 0x7e4   : > { %v2156_v20 = vmul.f32 %v2773_v9, %v2150_v31 }
 0x7e6   : > { %v2162_v2 = vadd.f32 %v2774_v26, %v2156_v20  ;;  %v2776_v26 = vld [vmem:[%s3822_s16] ss:$0 sm:$0xff] }
 0x7e8   : > { %v2164_v5 = vpack.c.bf16 %v2162_v2, %v2162_v2 }
 0x7f1   : > { %2619 = vmatmul.msk.bf16.gmra.mxu0 %vm572_vm0, %v2164_v5 }
 0x85e   : > { %v2216_v36 = vpop.f32.mrf.mxu0 }
 0x85f   : > { %v2217_v45 = vadd.f32 %v2775_v10, %v2216_v36 }
 0x861   : > { %v2225_v8 = vmul.f32 %v2217_v45, %v2217_v45 }
 0x863   : > { %v2228_v11 = vmul.f32 %v2225_v8, %v2217_v45 }
 0x865   : > { %v2231_v51 = vmul.f32 0.044715, %v2228_v11 }
 0x866   : > { %v2218_v34 = vpop.f32.mrf.mxu0 }
 0x867   : > { %v2234_v30 = vadd.f32 %v2231_v51, %v2217_v45  ;;  %v2219_v50 = vadd.f32 %v2775_v10, %v2218_v34 }
 0x869   : > { %v2237_v15 = vmul.f32 0.7978846, %v2234_v30  ;;  %v2226_v53 = vmul.f32 %v2219_v50, %v2219_v50 }
 0x86b   : > { %v2229_v55 = vmul.f32 %v2226_v53, %v2219_v50  ;;  %2887 = vtanh.f32 %v2237_v15 }
 0x86d   : > { %v2232_v56 = vmul.f32 0.044715, %v2229_v55 }
 0x86e   : > { %v2221_v41 = vpop.f32.mrf.mxu0 }
 0x86f   : > { %v2235_v1 = vadd.f32 %v2232_v56, %v2219_v50  ;;  %v2222_v54 = vadd.f32 %v2775_v10, %v2221_v41 }
 0x871   : > { %v2238_v58 = vmul.f32 0.7978846, %v2235_v1  ;;  %v2227_v59 = vmul.f32 %v2222_v54, %v2222_v54  ;;  %v2888_v0 = vpop.eup %2887 }
 0x872   : > { %v2243_v32 = vadd.f32 1.0, %v2888_v0 }
 0x873   : > { %2889 = vtanh.f32 %v2238_v58  ;;  %v2230_v49 = vmul.f32 %v2227_v59, %v2222_v54 }
 0x874   : > { %v2246_v62 = vmul.f32 0.5, %v2243_v32 }
 0x875   : > { %v2233_v6 = vmul.f32 0.044715, %v2230_v49 }
 0x876   : > { %v2223_v18 = vpop.f32.mrf.mxu0  ;;  %v2249_v4 = vmul.f32 %v2246_v62, %v2217_v45 }
 0x877   : > { %v2236_v57 = vadd.f32 %v2233_v6, %v2222_v54 }
 0x879   : > { %v2890_v13 = vpop.eup %2889  ;;  %v2239_v61 = vmul.f32 0.7978846, %v2236_v57 }
 0x87a   : > { %v2244_v63 = vadd.f32 1.0, %v2890_v13 }
 0x87b   : > { %2891 = vtanh.f32 %v2239_v61 }
 0x87c   : > { %v2247_v14 = vmul.f32 0.5, %v2244_v63 }
 0x87e   : > { %v2250_v35 = vmul.f32 %v2247_v14, %v2219_v50 }
 0x880   : > { %v2252_v9 = vpack.c.bf16 %v2250_v35, %v2249_v4 }
 0x881   : > { %v2892_v17 = vpop.eup %2891 }
 0x882   : > { %2330 = vmatmul.bf16.vlgmr.msrb.gmra.mxu1 %v2252_v9  ;;  %v2245_v21 = vadd.f32 1.0, %v2892_v17 }
 0x884   : > { %v2248_v12 = vmul.f32 0.5, %v2245_v21 }
 0x886   : > { %v2251_v39 = vmul.f32 %v2248_v12, %v2222_v54 }
 0x888   : > { %v2253_v28 = vpack.c.bf16 %v2251_v39, %v2251_v39 }
 0x892   : > { %2335 = vmatmul.bf16.gmra.mxu1 %v2253_v28 }
 0x8ff   : > { %v2331_v24 = vpop.f32.mrf.mxu1 }
 0x900   : > { %v2332_v16 = vadd.f32 %v2776_v26, %v2331_v24 }
 0x902   : > { %v2340_v47 = vadd.f32 %v2332_v16, %v3720_v23 }
 0x904   : > { %2343 = vst.msk [vmem:[%s565_s25] sm:$0xff] %vm572_vm0, %v2340_v47 }
 0x907   : > { %v2333_v60 = vpop.f32.mrf.mxu1 }
 0x908   : > { %v2334_v25 = vadd.f32 %v2776_v26, %v2333_v60 }
 0x90a   : > { %v2341_v42 = vadd.f32 %v2334_v25, %v3727_v33 }
 0x90c   : > { %2344 = vst.msk [vmem:[%s565_s25 + $0x8] sm:$0xff] %vm572_vm0, %v2341_v42 }
 0x90f   : > { %v2336_v37 = vpop.f32.mrf.mxu1 }
 0x910   : > { %v2337_v52 = vadd.f32 %v2776_v26, %v2336_v37 }
 0x912   : > { %v2342_v7 = vadd.f32 %v2337_v52, %v3733_v27 }
 0x914   : > { %2345 = vst.msk [vmem:[%s565_s25 + $0x10] sm:$0xff] %vm572_vm0, %v2342_v7 }
 0x917   : > { %v2338_v40 = vpop.f32.mrf.mxu1 }
 0x918 PF: > { %s28_s24 = sadd.s32 1, %s2933_s24  }
 0x919   : > { %p25_p7 = scmp.ge.s32.totalorder %s28_s24, 4  }
 0x91b   :  { %27 = sbr.rel (!%p25_p7) target bundleno = 4 (0x4), region = 123 }
 0x920   :  { %2367 = vsyncpa [#allocation4], 1 }
 0x921   :  { %2369 = vsyncpa [#allocation4 + $0x1], 1 }

// kernel: ocvp_par_forward.5
= control target key start
LH: loop header
LB: loop body
LE: loop exit
PB: predicated region body
PF: predicated region fallthrough
CT: control target
= control target key end

     0   :  { %s2954_s24 = smov 0   ;;  %s3734_s0 = inlined_call_operand.vmem [shape: f32[2,24,64], index: 0, kind: input, shape index: {}]   ;;  %s3735_s1 = inlined_call_operand.vmem [shape: f32[1,64], index: 1, kind: input, shape index: {}]   ;;  %s3736_s2 = inlined_call_operand.vmem [shape: f32[1,64], index: 2, kind: input, shape index: {}]   ;;  %s3737_s3 = inlined_call_operand.vmem [shape: bf16[64,64], index: 3, kind: input, shape index: {}]   ;;  %s3738_s4 = inlined_call_operand.vmem [shape: bf16[64,64], index: 4, kind: input, shape index: {}]   ;;  %s3739_s5 = inlined_call_operand.vmem [shape: bf16[64,64], index: 5, kind: input, shape index: {}]   ;;  %s3740_s6 = inlined_call_operand.vmem [shape: bf16[64,64], index: 6, kind: input, shape index: {}]   ;;  %s3741_s7 = inlined_call_operand.vmem [shape: bf16[64,64], index: 7, kind: input, shape index: {}]   ;;  %s3742_s8 = inlined_call_operand.vmem [shape: bf16[64,64], index: 8, kind: input, shape index: {}]   ;;  %s3743_s9 = inlined_call_operand.vmem [shape: f32[24,24], index: 9, kind: input, shape index: {}]   ;;  %s3744_s10 = inlined_call_operand.vmem [shape: f32[24,24], index: 10, kind: input, shape index: {}]   ;;  %s3745_s11 = inlined_call_operand.vmem [shape: f32[1,64], index: 11, kind: input, shape index: {}]   ;;  %s3746_s12 = inlined_call_operand.vmem [shape: f32[1,64], index: 12, kind: input, shape index: {}]   ;;  %s3747_s13 = inlined_call_operand.vmem [shape: bf16[64,128], index: 13, kind: input, shape index: {}]   ;;  %s3748_s14 = inlined_call_operand.vmem [shape: f32[1,128], index: 14, kind: input, shape index: {}]   ;;  %s3749_s15 = inlined_call_operand.vmem [shape: bf16[128,64], index: 15, kind: input, shape index: {}]   ;;  %s3750_s16 = inlined_call_operand.vmem [shape: f32[1,64], index: 16, kind: input, shape index: {}]   ;;  %s3751_s17 = inlined_call_operand.vmem [shape: f32[2,24,64], index: 17, kind: output, shape index: {}]  }
   0x1   :  { %3752 = sst [smem:[#allocation3_spill]] %s3734_s0 }
   0x2   :  { %3753 = sst [smem:[#allocation4_spill]] %s3735_s1 }
   0x3 LB: > { %s2384_s25 = sadd.s32 4294967295, %s2855_s24   ;;  %p2388_p0 = scmp.ge.s32.totalorder %s2855_s24, 1  ;;  %s2855_s24 = sphi %s2954_s24, %s27_s24  }
   0x4   : > { %p487_p1 = scmp.lt.s32.totalorder %s2855_s24, 3 }
   0x6   : > { %p488_p2 = pnand %p2388_p0, %p487_p1 }
   0x7   : > { %p539_p3 = scmp.lt.s32.totalorder (!%p488_p2), %s2384_s25, 1  ;;  %s3754_s29 = sld [smem:[#allocation3_spill]] (!%p488_p2) }
   0x8   : > { %491 = sbr.rel (%p488_p2) target bundleno = 2323 (0x913), region = 88  ;;  %s3755_s19 = sld [smem:[#allocation4_spill]] (!%p488_p2) }
   0x9   : > { %s2858_s21 = smov (!%p488_p2), 96   ;;  %s2859_s22 = smov (!%p488_p2), 112  }
   0xa   : > { %s2860_s18 = smov (!%p488_p2), 80  }
   0xd   : > { %s3757_s25 = smov (!%p539_p3, %s2384_s25), 1  ;;  %vm555_vm0 = vcmask 523264   ;;  %v2857_v6 = vmov 64.0   ;;  %v2630_v28 = vld [vmem:[%s3738_s4 + $0x18] sm:$0xff]  ;;  %v2629_v29 = vld [vmem:[%s3738_s4 + $0x10] sm:$0xff]  ;;  %v2628_v30 = vld [vmem:[%s3738_s4 + $0x8] sm:$0xff] }
   0xe   : > { %s2666_s26 = smul.u32 24, %s3757_s25  ;;  %2733 = vrcp.f32 %v2857_v6  ;;  %2659 = vmatpush.bf16.msra.mxu2 %v2630_v28  ;;  %735 = vmatpush.bf16.msra.mxu1 %v2630_v28  ;;  %v2627_v31 = vld [vmem:[%s3738_s4] sm:$0xff]  ;;  %v2626_v32 = vld [vmem:[%s3737_s3 + $0x18] sm:$0xff]  ;;  %v2625_v37 = vld [vmem:[%s3737_s3 + $0x10] sm:$0xff]  ;;  %vm955_vm11 = vcmask 130048   ;;  %vm1006_vm12 = vcmask 195584  }
   0xf   : > { %v2634_v33 = vld [vmem:[%s3739_s5 + $0x18] sm:$0xff]  ;;  %685 = vmatpush.bf16.msra.mxu0 %v2626_v32  ;;  %v2633_v38 = vld [vmem:[%s3739_s5 + $0x10] sm:$0xff]  ;;  %v2624_v41 = vld [vmem:[%s3737_s3 + $0x8] sm:$0xff]  ;;  %vm1486_vm13 = vcmask 261248   ;;  %vm1771_vm14 = vcmask 392448   ;;  %vm2056_vm15 = vcmask 523648  }
  0x10   : > { %s543_s0 = scalar_lea.vmem %s3754_s29, %s2666_s26  ;;  %v2638_v34 = vld [vmem:[%s3740_s6 + $0x18] sm:$0xff]  ;;  %v2637_v39 = vld [vmem:[%s3740_s6 + $0x10] sm:$0xff]  ;;  %v2632_v42 = vld [vmem:[%s3739_s5 + $0x8] sm:$0xff]  ;;  %s2863_s29 = smov 48  }
  0x11   : > { %v552_v0 = vld [vmem:[%s543_s0 + $0x10] sm:$0xff]  ;;  %v551_v1 = vld [vmem:[%s543_s0 + $0x8] sm:$0xff]  ;;  %v550_v4 = vld [vmem:[%s543_s0] sm:$0xff]  ;;  %835 = vmatpush.bf16.msra.mxu3 %v2638_v34 }
  0x12   : > { %v562_v2 = vsel %vm555_vm0, %v552_v0, 0.0  ;;  %v559_v3 = vsel %vm555_vm0, %v551_v1, 0.0  ;;  %v556_v5 = vsel %vm555_vm0, %v550_v4, 0.0  ;;  %2660 = vmatpush.bf16.msra.mxu2 %v2629_v29  ;;  %736 = vmatpush.bf16.msra.mxu1 %v2629_v29  ;;  %v2636_v43 = vld [vmem:[%s3740_s6 + $0x8] sm:$0xff]  ;;  %v2623_v46 = vld [vmem:[%s3737_s3] sm:$0xff]  ;;  %v2646_v53 = vld [vmem:[%s3742_s8 + $0x18] sm:$0xff] }
  0x13   : > { %563 = vadd.xlane.f32.xlu0 %v562_v2  ;;  %560 = vadd.xlane.f32.xlu1 %v559_v3  ;;  %v2631_v47 = vld [vmem:[%s3739_s5] sm:$0xff]  ;;  %v2645_v57 = vld [vmem:[%s3742_s8 + $0x10] sm:$0xff] }
  0x14   : > { %v2734_v7 = vpop.eup %2733  ;;  %686 = vmatpush.bf16.msra.mxu0 %v2625_v37  ;;  %v2635_v48 = vld [vmem:[%s3740_s6] sm:$0xff] }
  0x15   : > { %v566_v8 = vmul.f32 64.0, %v2734_v7  ;;  %vm570_vm1 = vweird.f32 %v2734_v7  ;;  %836 = vmatpush.bf16.msra.mxu3 %v2637_v39  ;;  %v2727_v63 = vld [vmem:[%s3755_s19] ss:$0 sm:$0xff] }
  0x16   : > { %2661 = vmatpush.bf16.msra.mxu2 %v2628_v30  ;;  %737 = vmatpush.bf16.msra.mxu1 %v2628_v30  ;;  %v2728_v3 = vld [vmem:[%s3736_s2] ss:$0 sm:$0xff] }
  0x17   : > { %v567_v9 = vsub.f32 1.0, %v566_v8  ;;  %v2639_v30 = vld [vmem:[%s3741_s7] sm:$0xff] }
  0x18   : > { %687 = vmatpush.bf16.msra.mxu0 %v2624_v41 }
  0x19   : > { %v568_v10 = vmul.f32 %v2734_v7, %v567_v9  ;;  %837 = vmatpush.bf16.msra.mxu3 %v2636_v43 }
  0x1a   : > { %2662 = vmatpush.bf16.msra.mxu2 %v2627_v31  ;;  %738 = vmatpush.bf16.msra.mxu1 %v2627_v31 }
  0x1b   : > { %557 = vadd.xlane.f32.xlu0 %v556_v5  ;;  %v569_v11 = vadd.f32 %v2734_v7, %v568_v10 }
  0x1c   : > { %688 = vmatpush.bf16.msra.mxu0 %v2623_v46 }
  0x1d   : > { %v2973_v12 = vsel %vm570_vm1, %v2734_v7, %v569_v11  ;;  %838 = vmatpush.bf16.msra.mxu3 %v2635_v48  ;;  %v2643_v7 = vld [vmem:[%s3742_s8] sm:$0xff] }
  0x1e   : > { %785 = vmatpush.bf16.msrb.mxu2 %v2634_v33  ;;  %935 = vmatpush.bf16.msrb.mxu1 %v2646_v53 }
  0x22   : > { %786 = vmatpush.bf16.msrb.mxu2 %v2633_v38  ;;  %936 = vmatpush.bf16.msrb.mxu1 %v2645_v57 }
  0x26   : > { %787 = vmatpush.bf16.msrb.mxu2 %v2632_v42 }
  0x2a   : > { %788 = vmatpush.bf16.msrb.mxu2 %v2631_v47 }
  0x86   : > { %v564_v13 = vpop.xlane.xlu0 %563  ;;  %v561_v17 = vpop.xlane.xlu1 %560 }
  0x87   : > { %v574_v14 = vmul.f32 %v2973_v12, %v564_v13  ;;  %v573_v21 = vmul.f32 %v2973_v12, %v561_v17 }
  0x89   : > { %v2976_v15 = vsub.f32 %v552_v0, %v574_v14  ;;  %v2985_v23 = vsub.f32 %v551_v1, %v573_v21  ;;  %v2644_v0 = vld [vmem:[%s3742_s8 + $0x8] sm:$0xff] }
  0x8a   : > { %937 = vmatpush.bf16.msrb.mxu1 %v2644_v0 }
  0x8b   : > { %v580_v16 = vmul.f32 %v2976_v15, %v2976_v15  ;;  %v579_v26 = vmul.f32 %v2985_v23, %v2985_v23 }
  0x8d   : > { %v587_v18 = vsel %vm555_vm0, %v580_v16, 0.0  ;;  %v584_v27 = vsel %vm555_vm0, %v579_v26, 0.0  ;;  %v2642_v16 = vld [vmem:[%s3741_s7 + $0x18] sm:$0xff] }
  0x8e   : > { %588 = vadd.xlane.f32.xlu1 %v587_v18  ;;  %v558_v19 = vpop.xlane.xlu0 %557  ;;  %938 = vmatpush.bf16.msrb.mxu1 %v2643_v7  ;;  %v3200_v7 = vld [vmem:[%s3743_s9] sm:$0xff] }
  0x8f   : > { %v572_v20 = vmul.f32 %v2973_v12, %v558_v19  ;;  %885 = vmatpush.bf16.msrb.mxu0 %v2642_v16  ;;  %v2641_v19 = vld [vmem:[%s3741_s7 + $0x10] sm:$0xff] }
  0x91   : > { %v2983_v22 = vsub.f32 %v550_v4, %v572_v20 }
  0x93   : > { %v578_v24 = vmul.f32 %v2983_v22, %v2983_v22  ;;  %886 = vmatpush.bf16.msrb.mxu0 %v2641_v19 }
  0x95   : > { %v581_v25 = vsel %vm555_vm0, %v578_v24, 0.0 }
  0x96   : > { %582 = vadd.xlane.f32.xlu2 %v581_v25  ;;  %v2640_v25 = vld [vmem:[%s3741_s7 + $0x8] sm:$0xff] }
  0x97   : > { %887 = vmatpush.bf16.msrb.mxu0 %v2640_v25 }
  0x9b   : > { %888 = vmatpush.bf16.msrb.mxu0 %v2639_v30 }
  0x9e   : > { %585 = vadd.xlane.f32.xlu2 %v584_v27 }
 0x101   : > { %v589_v35 = vpop.xlane.xlu1 %588 }
 0x102   : > { %v592_v36 = vmul.f32 %v589_v35, %v2973_v12 }
 0x104   : > { %v595_v40 = vadd.f32 1e-06, %v592_v36 }
 0x106   : > { %2735 = vrsqrt.f32 %v595_v40  ;;  %vm622_vm3 = vweird.f32 %v595_v40 }
 0x109   : > { %v583_v44 = vpop.xlane.xlu2 %582 }
 0x10a   : > { %v590_v45 = vmul.f32 %v583_v44, %v2973_v12 }
 0x10c   : > { %v2736_v49 = vpop.eup %2735  ;;  %v593_v50 = vadd.f32 1e-06, %v590_v45 }
 0x10d   : > { %v617_v51 = vmul.f32 %v2736_v49, %v595_v40  ;;  %vm623_vm2 = vweird.f32 %v2736_v49 }
 0x10e   : > { %2737 = vrsqrt.f32 %v593_v50  ;;  %vm624_vm4 = vmor %vm622_vm3, %vm623_vm2  ;;  %vm602_vm6 = vweird.f32 %v593_v50 }
 0x10f   : > { %v618_v52 = vmul.f32 %v2736_v49, %v617_v51 }
 0x111   : > { %v619_v54 = vmul.f32 0.5, %v618_v52  ;;  %v586_v55 = vpop.xlane.xlu2 %585 }
 0x112   : > { %v591_v56 = vmul.f32 %v586_v55, %v2973_v12 }
 0x113   : > { %v620_v58 = vsub.f32 1.5, %v619_v54 }
 0x114   : > { %v2738_v59 = vpop.eup %2737  ;;  %v594_v60 = vadd.f32 1e-06, %v591_v56 }
 0x115   : > { %v621_v61 = vmul.f32 %v2736_v49, %v620_v58  ;;  %v597_v62 = vmul.f32 %v2738_v59, %v593_v50  ;;  %vm603_vm5 = vweird.f32 %v2738_v59 }
 0x116   : > { %2739 = vrsqrt.f32 %v594_v60  ;;  %vm604_vm7 = vmor %vm602_vm6, %vm603_vm5  ;;  %vm612_vm9 = vweird.f32 %v594_v60 }
 0x117   : > { %v625_v1 = vsel %vm624_vm4, %v2736_v49, %v621_v61  ;;  %v598_v2 = vmul.f32 %v2738_v59, %v597_v62 }
 0x118   : > { %v628_v4 = vmul.f32 %v625_v1, %v2976_v15 }
 0x119   : > { %v599_v5 = vmul.f32 0.5, %v598_v2 }
 0x11a   : > { %v634_v6 = vmul.f32 %v2727_v63, %v628_v4 }
 0x11b   : > { %v600_v8 = vsub.f32 1.5, %v599_v5 }
 0x11c   : > { %v2740_v9 = vpop.eup %2739  ;;  %v3063_v10 = vadd.f32 %v2728_v3, %v634_v6 }
 0x11d   : > { %v601_v11 = vmul.f32 %v2738_v59, %v600_v8  ;;  %v607_v13 = vmul.f32 %v2740_v9, %v594_v60  ;;  %vm613_vm8 = vweird.f32 %v2740_v9 }
 0x11e   : > { %v642_v14 = vpack.c.bf16 %v3063_v10, %v3063_v10  ;;  %vm614_vm10 = vmor %vm612_vm9, %vm613_vm8 }
 0x11f   : > { %v608_v15 = vmul.f32 %v2740_v9, %v607_v13  ;;  %v605_v17 = vsel %vm604_vm7, %v2738_v59, %v601_v11 }
 0x120   : > { %2426 = vmatmul.msk.bf16.vlgmr.msra.gmra.mxu2 %vm555_vm0, %v642_v14  ;;  %v626_v21 = vmul.f32 %v605_v17, %v2983_v22 }
 0x121   : > { %v609_v18 = vmul.f32 0.5, %v608_v15  ;;  %v3207_v15 = vld [vmem:[%s3743_s9 + $0x8] sm:$0xff] }
 0x122   : > { %v632_v27 = vmul.f32 %v2727_v63, %v626_v21 }
 0x123   : > { %v610_v20 = vsub.f32 1.5, %v609_v18 }
 0x124   : > { %v3082_v31 = vadd.f32 %v2728_v3, %v632_v27 }
 0x125   : > { %v611_v24 = vmul.f32 %v2740_v9, %v610_v20 }
 0x127   : > { %v615_v26 = vsel %vm614_vm10, %v2740_v9, %v611_v24  ;;  %v3214_v24 = vld [vmem:[%s3743_s9 + $0x10] sm:$0xff] }
 0x128   : > { %v627_v28 = vmul.f32 %v615_v26, %v2985_v23 }
 0x12a   : > { %v633_v29 = vmul.f32 %v2727_v63, %v627_v28 }
 0x12c   : > { %v3084_v22 = vadd.f32 %v2728_v3, %v633_v29 }
 0x12e   : > { %v641_v32 = vpack.c.bf16 %v3084_v22, %v3082_v31 }
 0x130   : > { %2407 = vmatmul.msk.bf16.vlgmr.msra.gmra.mxu0 %vm555_vm0, %v641_v32  ;;  %2425 = vmatmul.msk.bf16.vlgmr.msra.gmra.mxu1 %vm555_vm0, %v641_v32 }
 0x131   : > { %2443 = vmatmul.msk.bf16.vlgmr.msrb.gmra.mxu2 %vm555_vm0, %v641_v32  ;;  %2461 = vmatmul.msk.bf16.vlgmr.msra.gmra.mxu3 %vm555_vm0, %v641_v32 }
 0x140   : > { %2408 = vmatmul.msk.bf16.gmra.mxu0 %vm555_vm0, %v642_v14  ;;  %2497 = vmatmul.msk.bf16.vlgmr.msrb.gmra.mxu1 %vm555_vm0, %v641_v32 }
 0x141   : > { %2444 = vmatmul.msk.bf16.gmra.mxu2 %vm555_vm0, %v642_v14  ;;  %2462 = vmatmul.msk.bf16.gmra.mxu3 %vm555_vm0, %v642_v14 }
 0x150   : > { %2479 = vmatmul.msk.bf16.vlgmr.msrb.gmra.mxu0 %vm555_vm0, %v641_v32  ;;  %2498 = vmatmul.msk.bf16.gmra.mxu1 %vm555_vm0, %v642_v14 }
 0x160   : > { %2480 = vmatmul.msk.bf16.gmra.mxu0 %vm555_vm0, %v642_v14 }
 0x1a3   : > { %v3099_v23 = vpop.f32.mrf.mxu2 }
 0x1a4   : > { %1500 = vrot.lane.b32.xlu1 %v3099_v23, %s2858_s21  ;;  %2499 = vmatpush.xpose.msk.msra.mxu2 %vm955_vm11, %v3099_v23 }
 0x1a5   : > { %1209 = vrot.lane.b32.xlu2 %v3099_v23, %s2859_s22 }
 0x1ab   : > { %v747_v33 = vpop.f32.mrf.mxu2 }
 0x1ad   : > { %v3107_v34 = vpop.f32.mrf.mxu0  ;;  %v3109_v35 = vpop.f32.mrf.mxu1 }
 0x1ae   : > { %1205 = vrot.lane.b32.xlu0 %v3109_v35, %s2859_s22 }
 0x1b4   : > { %v790_v36 = vpop.f32.mrf.mxu2  ;;  %v3113_v37 = vpop.f32.mrf.mxu3 }
 0x1b5   : > { %1288 = vrot.lane.b32.xlu2 %v3113_v37, %s2859_s22  ;;  %v3117_v38 = vpop.f32.mrf.mxu0  ;;  %v3119_v39 = vpop.f32.mrf.mxu1 }
 0x1b6   : > { %1207 = vrot.lane.b32.xlu1 %v3119_v39, %s2859_s22  ;;  %2500 = vmatpush.xpose.msk.msra.mxu2 %vm955_vm11, %v3119_v39 }
 0x1b7   : > { %1199 = vrot.lane.b32.xlu0 %v3107_v34, %s2859_s22 }
 0x1ba   : > { %2501 = vmatpush.xpose.msk.msra.mxu2 %vm955_vm11, %v3109_v35 }
 0x1bc   : > { %v792_v40 = vpop.f32.mrf.mxu2  ;;  %v3129_v41 = vpop.f32.mrf.mxu3 }
 0x1bd   : > { %v3131_v42 = vpop.f32.mrf.mxu0  ;;  %v940_v43 = vpop.f32.mrf.mxu1  ;;  %2502 = vmatmul.msk.f32.vlgmr.msra.gmra.mxu2 %vm955_vm11, %v3107_v34 }
 0x1be   : > { %1201 = vrot.lane.b32.xlu1 %v3117_v38, %s2859_s22  ;;  %1203 = vrot.lane.b32.xlu2 %v3131_v42, %s2859_s22  ;;  %v3139_v44 = vpack.i.bf16 %v790_v36, %v940_v43 }
 0x1bf   : > { %1290 = vrot.lane.b32.xlu0 %v3129_v41, %s2859_s22 }
 0x1c4   : > { %v795_v45 = vpop.f32.mrf.mxu2  ;;  %v3143_v46 = vpop.f32.mrf.mxu3 }
 0x1c5   : > { %v697_v47 = vpop.f32.mrf.mxu0  ;;  %v942_v48 = vpop.f32.mrf.mxu1  ;;  %2503 = vmatmul.msk.f32.gmra.mxu2 %vm955_vm11, %v3117_v38 }
 0x1c6   : > { %1498 = vrot.lane.b32.xlu1 %v3119_v39, %s2858_s21  ;;  %1292 = vrot.lane.b32.xlu2 %v3143_v46, %s2859_s22  ;;  %v3151_v49 = vpack.i.bf16 %v792_v40, %v942_v48 }
 0x1cc   : > { %v797_v50 = vpop.f32.mrf.mxu2  ;;  %v847_v51 = vpop.f32.mrf.mxu3 }
 0x1cd   : > { %v3153_v52 = vpop.f32.mrf.mxu0  ;;  %v945_v53 = vpop.f32.mrf.mxu1  ;;  %2504 = vmatmul.msk.f32.gmra.mxu2 %vm955_vm11, %v3131_v42 }
 0x1ce   : > { %1145 = vmatpush.msrb.mxu2 %v945_v53  ;;  %1294 = vrot.lane.b32.xlu2 %v3153_v52, %s2859_s22  ;;  %v3159_v54 = vpack.i.bf16 %v795_v45, %v945_v53 }
 0x1d0   : > { %1146 = vmatpush.msrb.mxu2 %v942_v48 }
 0x1d2   : > { %1147 = vmatpush.msrb.mxu2 %v940_v43 }
 0x1d5   : > { %v3161_v55 = vpop.f32.mrf.mxu0  ;;  %v947_v56 = vpop.f32.mrf.mxu1 }
 0x1d6   : > { %1587 = vrot.lane.b32.xlu0 %v3161_v55, %s2858_s21  ;;  %1296 = vrot.lane.b32.xlu2 %v3161_v55, %s2859_s22 }
 0x1dd   : > { %v3167_v57 = vpop.f32.mrf.mxu0 }
 0x1de   : > { %1298 = vrot.lane.b32.xlu0 %v3167_v57, %s2859_s22  ;;  %2505 = vmatpush.xpose.msk.msrb.mxu3 %vm955_vm11, %v3167_v57 }
 0x1e2   : > { %2506 = vmatpush.xpose.msk.msrb.mxu3 %vm955_vm11, %v3161_v55 }
 0x1e5   : > { %v897_v58 = vpop.f32.mrf.mxu0 }
 0x1e6   : > { %1589 = vrot.lane.b32.xlu0 %v3167_v57, %s2858_s21  ;;  %2507 = vmatpush.xpose.msk.msrb.mxu3 %vm955_vm11, %v3153_v52 }
 0x1e9   : > { %2508 = vmatmul.msk.f32.vlgmr.msrb.gmra.mxu3 %vm955_vm11, %v3113_v37 }
 0x1ea   : > { %1180 = vmatpush.msra.mxu3 %v795_v45 }
 0x1ec   : > { %1181 = vmatpush.msra.mxu3 %v792_v40 }
 0x1ee   : > { %1182 = vmatpush.msra.mxu3 %v790_v36 }
 0x1f1   : > { %2509 = vmatmul.msk.f32.gmra.mxu3 %vm955_vm11, %v3129_v41 }
 0x1f9   : > { %2510 = vmatmul.msk.f32.gmra.mxu3 %vm955_vm11, %v3143_v46 }
 0x1ff   : > { %v1210_v59 = vpop.permute.xlu2 %1209 }
 0x200   : > { %2517 = vmatpush.xpose.msk.msra.mxu0 %vm955_vm11, %v1210_v59  ;;  %2663 = vmatpush.xpose.msk.msrb.mxu3 %vm955_vm11, %v1210_v59 }
 0x20f   : > { %v1289_v63 = vpop.permute.xlu2 %1288 }
 0x216   : > { %v1501_v60 = vpop.permute.xlu1 %1500 }
 0x218   : > { %v3193_v2 = vpop.permute.xlu2 %1203 }
 0x220   : > { %v1206_v61 = vpop.permute.xlu0 %1205  ;;  %v1293_v4 = vpop.permute.xlu2 %1292 }
 0x228   : > { %v1208_v62 = vpop.permute.xlu1 %1207  ;;  %v1295_v17 = vpop.permute.xlu2 %1294 }
 0x229   : > { %2518 = vmatpush.xpose.msk.msra.mxu0 %vm955_vm11, %v1208_v62  ;;  %2664 = vmatpush.xpose.msk.msrb.mxu3 %vm955_vm11, %v1208_v62  ;;  %v1200_v0 = vpop.permute.xlu0 %1199 }
 0x22d   : > { %2519 = vmatpush.xpose.msk.msra.mxu0 %vm955_vm11, %v1206_v61  ;;  %2665 = vmatpush.xpose.msk.msrb.mxu3 %vm955_vm11, %v1206_v61 }
 0x230   : > { %v1202_v1 = vpop.permute.xlu1 %1201  ;;  %2520 = vmatmul.msk.f32.vlgmr.msra.gmra.mxu0 %vm955_vm11, %v1200_v0  ;;  %v1297_v27 = vpop.permute.xlu2 %1296 }
 0x231   : > { %2535 = vmatpush.xpose.msk.msrb.mxu0 %vm955_vm11, %v1501_v60  ;;  %v1291_v5 = vpop.permute.xlu0 %1290 }
 0x238   : > { %v1499_v3 = vpop.permute.xlu1 %1498  ;;  %2521 = vmatmul.msk.f32.gmra.mxu0 %vm955_vm11, %v1202_v1 }
 0x239   : > { %2536 = vmatpush.xpose.msk.msrb.mxu0 %vm955_vm11, %v1499_v3 }
 0x240   : > { %v991_v6 = vpop.f32.mrf.mxu2 }
 0x241   : > { %v1000_v8 = vmul.f32 0.25, %v991_v6 }
 0x243   : > { %v1003_v9 = vadd.f32 %v1000_v8, %v3200_v7 }
 0x245   : > { %v1007_v11 = vsel %vm1006_vm12, %v1003_v9, -inf }
 0x246   : > { %1008 = vmax.xlane.f32.xlu0 %v1007_v11 }
 0x248   : > { %v994_v13 = vpop.f32.mrf.mxu2  ;;  %v1588_v14 = vpop.permute.xlu0 %1587 }
 0x249   : > { %v1001_v16 = vmul.f32 0.25, %v994_v13 }
 0x24b   : > { %v1004_v18 = vadd.f32 %v1001_v16, %v3207_v15 }
 0x24d   : > { %v1010_v19 = vsel %vm1006_vm12, %v1004_v18, -inf }
 0x24e   : > { %1011 = vmax.xlane.f32.xlu1 %v1010_v19 }
 0x250   : > { %v997_v20 = vpop.f32.mrf.mxu2  ;;  %v1299_v21 = vpop.permute.xlu0 %1298 }
 0x251   : > { %v1002_v25 = vmul.f32 0.25, %v997_v20  ;;  %2523 = vmatpush.xpose.msk.msra.mxu1 %vm955_vm11, %v1299_v21 }
 0x253   : > { %v1005_v26 = vadd.f32 %v1002_v25, %v3214_v24 }
 0x255   : > { %2524 = vmatpush.xpose.msk.msra.mxu1 %vm955_vm11, %v1297_v27  ;;  %v1013_v28 = vsel %vm1006_vm12, %v1005_v26, -inf }
 0x256   : > { %1014 = vmax.xlane.f32.xlu2 %v1013_v28 }
 0x258   : > { %v1590_v29 = vpop.permute.xlu0 %1589 }
 0x259   : > { %2525 = vmatpush.xpose.msk.msra.mxu1 %vm955_vm11, %v1295_v17  ;;  %v3318_v17 = vld [vmem:[%s3744_s10 + $0x10] sm:$0xff] }
 0x25a   : > { %1490 = vrot.lane.b32.xlu0 %v3107_v34, %s2858_s21 }
 0x25c   : > { %2526 = vmatmul.msk.f32.vlgmr.msra.gmra.mxu1 %vm955_vm11, %v1289_v63 }
 0x25d   : > { %2541 = vmatpush.xpose.msk.msrb.mxu1 %vm955_vm11, %v1590_v29 }
 0x261   : > { %2542 = vmatpush.xpose.msk.msrb.mxu1 %vm955_vm11, %v1588_v14 }
 0x262   : > { %1581 = vrot.lane.b32.xlu0 %v3129_v41, %s2858_s21 }
 0x264   : > { %2527 = vmatmul.msk.f32.gmra.mxu1 %vm955_vm11, %v1291_v5 }
 0x267   : > { %1585 = vrot.lane.b32.xlu1 %v3153_v52, %s2858_s21 }
 0x26a   : > { %1494 = vrot.lane.b32.xlu0 %v3131_v42, %s2858_s21 }
 0x26c   : > { %2528 = vmatmul.msk.f32.gmra.mxu1 %vm955_vm11, %v1293_v4  ;;  %v1075_v30 = vpop.f32.mrf.mxu3 }
 0x26e   : > { %1496 = vrot.lane.b32.xlu2 %v3109_v35, %s2858_s21 }
 0x26f   : > { %1492 = vrot.lane.b32.xlu1 %v3117_v38, %s2858_s21 }
 0x274   : > { %v1078_v33 = vpop.f32.mrf.mxu3 }
 0x276   : > { %1579 = vrot.lane.b32.xlu2 %v3113_v37, %s2858_s21 }
 0x277   : > { %1874 = vrot.lane.b32.xlu1 %v3167_v57, %s2860_s18 }
 0x27c   : > { %v1081_v13 = vpop.f32.mrf.mxu3 }
 0x27d   : > { %v1086_v16 = vmul.f32 0.25, %v1081_v13 }
 0x27e   : > { %1785 = vrot.lane.b32.xlu2 %v3099_v23, %s2860_s18 }
 0x27f   : > { %1783 = vrot.lane.b32.xlu1 %v3119_v39, %s2860_s18  ;;  %v1085_v39 = vmul.f32 0.25, %v1078_v33  ;;  %v3323_v20 = vadd.f32 %v1086_v16, %v3318_v17 }
 0x281   : > { %v1096_v27 = vsel %vm1006_vm12, %v3323_v20, -inf }
 0x286   : > { %1583 = vrot.lane.b32.xlu2 %v3143_v46, %s2858_s21 }
 0x287   : > { %1870 = vrot.lane.b32.xlu1 %v3153_v52, %s2860_s18 }
 0x28e   : > { %1781 = vrot.lane.b32.xlu2 %v3109_v35, %s2860_s18  ;;  %v3261_v35 = vld [vmem:[%s3744_s10 + $0x8] sm:$0xff] }
 0x28f   : > { %1777 = vrot.lane.b32.xlu1 %v3117_v38, %s2860_s18  ;;  %v3264_v43 = vadd.f32 %v1085_v39, %v3261_v35 }
 0x291   : > { %v1093_v47 = vsel %vm1006_vm12, %v3264_v43, -inf }
 0x296   : > { %1864 = vrot.lane.b32.xlu2 %v3113_v37, %s2860_s18 }
 0x29e   : > { %1779 = vrot.lane.b32.xlu2 %v3131_v42, %s2860_s18 }
 0x2ad   : > { %v1240_v11 = vpop.f32.mrf.mxu0 }
 0x2b5   : > { %v1243_v21 = vpop.f32.mrf.mxu0 }
 0x2b9   : > { %v1009_v32 = vpop.xlane.xlu0 %1008 }
 0x2ba   : > { %v1016_v23 = vsub.f32 %v1003_v9, %v1009_v32 }
 0x2bc   : > { %v1019_v36 = vmul.f32 1.442695, %v1016_v23 }
 0x2be   : > { %2741 = vpow2.f32 %v1019_v36 }
 0x2c1   : > { %v1012_v40 = vpop.xlane.xlu1 %1011 }
 0x2c2   : > { %v1017_v38 = vsub.f32 %v1004_v18, %v1012_v40  ;;  %v1249_v18 = vmul.f32 0.25, %v1240_v11 }
 0x2c4   : > { %v3266_v37 = vpop.eup %2741  ;;  %v1021_v42 = vmul.f32 1.442695, %v1017_v38  ;;  %v3326_v25 = vadd.f32 %v1249_v18, %v3200_v7 }
 0x2c5   : > { %v1025_v45 = vsel %vm1006_vm12, %v3266_v37, 0.0 }
 0x2c6   : > { %2743 = vpow2.f32 %v1021_v42  ;;  %1026 = vadd.xlane.f32.xlu0 %v1025_v45  ;;  %v1255_v28 = vsel %vm1006_vm12, %v3326_v25, -inf }
 0x2c7   : > { %1094 = vmax.xlane.f32.xlu2 %v1093_v47 }
 0x2c9   : > { %v1015_v48 = vpop.xlane.xlu2 %1014 }
 0x2ca   : > { %v1018_v50 = vsub.f32 %v1005_v26, %v1015_v48  ;;  %v1250_v26 = vmul.f32 0.25, %v1243_v21 }
 0x2cc   : > { %v3272_v51 = vpop.eup %2743  ;;  %v1023_v52 = vmul.f32 1.442695, %v1018_v50  ;;  %v1491_v58 = vpop.permute.xlu0 %1490  ;;  %v3333_v29 = vadd.f32 %v1250_v26, %v3207_v15 }
 0x2cd   : > { %v1028_v53 = vsel %vm1006_vm12, %v3272_v51, 0.0 }
 0x2ce   : > { %2745 = vpow2.f32 %v1023_v52  ;;  %1029 = vadd.xlane.f32.xlu1 %v1028_v53 }
 0x2d1   : > { %v1497_v56 = vpop.permute.xlu2 %1496 }
 0x2d2   : > { %2537 = vmatpush.xpose.msk.msrb.mxu0 %vm955_vm11, %v1497_v56 }
 0x2d4   : > { %v3277_v57 = vpop.eup %2745  ;;  %v1582_v62 = vpop.permute.xlu0 %1581 }
 0x2d5   : > { %2538 = vmatmul.msk.f32.vlgmr.msrb.gmra.mxu0 %vm955_vm11, %v1491_v58  ;;  %v1031_v59 = vsel %vm1006_vm12, %v3277_v57, 0.0 }
 0x2d6   : > { %1032 = vadd.xlane.f32.xlu1 %v1031_v59 }
 0x2d9   : > { %v1586_v60 = vpop.permute.xlu1 %1585  ;;  %v1580_v61 = vpop.permute.xlu2 %1579 }
 0x2da   : > { %1872 = vrot.lane.b32.xlu0 %v3161_v55, %s2860_s18  ;;  %2543 = vmatpush.xpose.msk.msrb.mxu1 %vm955_vm11, %v1586_v60  ;;  %v1329_v5 = vpop.f32.mrf.mxu1 }
 0x2db   : > { %v1338_v6 = vmul.f32 0.25, %v1329_v5 }
 0x2dc   : > { %v1495_v55 = vpop.permute.xlu0 %1494 }
 0x2dd   : > { %2544 = vmatmul.msk.f32.vlgmr.msrb.gmra.mxu1 %vm955_vm11, %v1580_v61 }
 0x2df   : > { %2688 = vrot.lane.b32.xlu2 %v3151_v49, %s2859_s22 }
 0x2e1   : > { %v1493_v63 = vpop.permute.xlu1 %1492  ;;  %v1786_v0 = vpop.permute.xlu2 %1785 }
 0x2e2   : > { %1775 = vrot.lane.b32.xlu0 %v3107_v34, %s2860_s18  ;;  %2539 = vmatmul.msk.f32.gmra.mxu0 %vm955_vm11, %v1493_v63 }
 0x2e3   : > { %2553 = vmatpush.xpose.msk.msra.mxu0 %vm955_vm11, %v1786_v0 }
 0x2e5   : > { %2545 = vmatmul.msk.f32.gmra.mxu1 %vm955_vm11, %v1582_v62 }
 0x2e9   : > { %v1875_v1 = vpop.permute.xlu1 %1874  ;;  %v1584_v3 = vpop.permute.xlu2 %1583 }
 0x2ea   : > { %1866 = vrot.lane.b32.xlu0 %v3129_v41, %s2860_s18  ;;  %2540 = vmatmul.msk.f32.gmra.mxu0 %vm955_vm11, %v1495_v55  ;;  %v3305_v41 = vld [vmem:[%s3744_s10] sm:$0xff] }
 0x2eb   : > { %2559 = vmatpush.xpose.msk.msra.mxu1 %vm955_vm11, %v1875_v1  ;;  %v3308_v8 = vadd.f32 %v1338_v6, %v3305_v41 }
 0x2ed   : > { %2546 = vmatmul.msk.f32.gmra.mxu1 %vm955_vm11, %v1584_v3  ;;  %v1344_v9 = vsel %vm1006_vm12, %v3308_v8, -inf }
 0x2ef   : > { %1868 = vrot.lane.b32.xlu1 %v3143_v46, %s2860_s18  ;;  %v1084_v46 = vmul.f32 0.25, %v1075_v30  ;;  %v1258_v30 = vsel %vm1006_vm12, %v3333_v29, -inf }
 0x2f1   : > { %v1784_v34 = vpop.permute.xlu1 %1783  ;;  %v1782_v4 = vpop.permute.xlu2 %1781  ;;  %v3313_v14 = vadd.f32 %v1084_v46, %v3305_v41 }
 0x2f2   : > { %2554 = vmatpush.xpose.msk.msra.mxu0 %vm955_vm11, %v1784_v34 }
 0x2f3   : > { %v1090_v19 = vsel %vm1006_vm12, %v3313_v14, -inf }
 0x2f6   : > { %2555 = vmatpush.xpose.msk.msra.mxu0 %vm955_vm11, %v1782_v4  ;;  %v1332_v4 = vpop.f32.mrf.mxu1 }
 0x2f7   : > { %v1339_v21 = vmul.f32 0.25, %v1332_v4 }
 0x2f9   : > { %v1871_v32 = vpop.permute.xlu1 %1870  ;;  %v1865_v52 = vpop.permute.xlu2 %1864 }
 0x301   : > { %v1778_v23 = vpop.permute.xlu1 %1777  ;;  %v1780_v62 = vpop.permute.xlu2 %1779 }
 0x308   : > { %1345 = vmax.xlane.f32.xlu2 %v1344_v9  ;;  %v1335_v9 = vpop.f32.mrf.mxu1 }
 0x314   : > { %1091 = vmax.xlane.f32.xlu0 %v1090_v19 }
 0x319   : > { %1097 = vmax.xlane.f32.xlu1 %v1096_v27 }
 0x31c   : > { %1256 = vmax.xlane.f32.xlu0 %v1255_v28 }
 0x321   : > { %1259 = vmax.xlane.f32.xlu1 %v1258_v30 }
 0x339   : > { %v1027_v33 = vpop.xlane.xlu0 %1026 }
 0x33a   : > { %2747 = vrcp.f32 %v1027_v33  ;;  %2698 = vrot.lane.b32.xlu1 %v3159_v54, %s2858_s21  ;;  %v3368_v5 = vpop.xlane.xlu2 %1094  ;;  %v3380_v33 = vadd.f32 %v1339_v21, %v3261_v35 }
 0x340   : > { %v2748_v36 = vpop.eup %2747 }
 0x341   : > { %v1037_v39 = vmul.f32 %v2748_v36, %v3266_v37  ;;  %v1030_v40 = vpop.xlane.xlu1 %1029 }
 0x342   : > { %2749 = vrcp.f32 %v1030_v40  ;;  %v3372_v11 = vpop.permute.xlu2 %2688  ;;  %v1347_v40 = vsel %vm1006_vm12, %v3380_v33, -inf }
 0x343   : > { %2514 = vmatmul.msk.f32.vlgmr.msra.gmra.mxu3 %vm1006_vm12, %v1037_v39 }
 0x348   : > { %v2750_v38 = vpop.eup %2749 }
 0x349   : > { %v1033_v42 = vpop.xlane.xlu1 %1032  ;;  %v1038_v45 = vmul.f32 %v2750_v38, %v3272_v51 }
 0x34a   : > { %2751 = vrcp.f32 %v1033_v42 }
 0x34b   : > { %2515 = vmatmul.msk.f32.gmra.mxu3 %vm1006_vm12, %v1038_v45 }
 0x34c   : > { %v1873_v47 = vpop.permute.xlu0 %1872 }
 0x34d   : > { %2560 = vmatpush.xpose.msk.msra.mxu1 %vm955_vm11, %v1873_v47 }
 0x350   : > { %v2752_v48 = vpop.eup %2751 }
 0x351   : > { %2561 = vmatpush.xpose.msk.msra.mxu1 %vm955_vm11, %v1871_v32  ;;  %v1039_v50 = vmul.f32 %v2752_v48, %v3277_v57 }
 0x352   : > { %v1531_v37 = vpop.f32.mrf.mxu0 }
 0x353   : > { %v1540_v53 = vmul.f32 0.25, %v1531_v37  ;;  %2516 = vmatmul.msk.f32.gmra.mxu3 %vm1006_vm12, %v1039_v50 }
 0x354   : > { %v1776_v56 = vpop.permute.xlu0 %1775  ;;  %2562 = vmatmul.msk.f32.vlgmr.msra.gmra.mxu1 %vm955_vm11, %v1865_v52 }
 0x355   : > { %2556 = vmatmul.msk.f32.vlgmr.msra.gmra.mxu0 %vm955_vm11, %v1776_v56  ;;  %v1543_v51 = vadd.f32 %v1540_v53, %v3200_v7 }
 0x357   : > { %v1546_v58 = vsel %vm1006_vm12, %v1543_v51, -inf }
 0x358   : > { %1547 = vmax.xlane.f32.xlu0 %v1546_v58 }
 0x35a   : > { %v1620_v27 = vpop.f32.mrf.mxu1 }
 0x35b   : > { %2522 = vmatmul.msk.f32.vlgmr.msrb.gmra.mxu3 %vm955_vm11, %v3193_v2  ;;  %v1629_v39 = vmul.f32 0.25, %v1620_v27 }
 0x35c   : > { %v1867_v59 = vpop.permute.xlu0 %1866 }
 0x35d   : > { %2557 = vmatmul.msk.f32.gmra.mxu0 %vm955_vm11, %v1778_v23  ;;  %2563 = vmatmul.msk.f32.gmra.mxu1 %vm955_vm11, %v1867_v59  ;;  %v3391_v50 = vadd.f32 %v1629_v39, %v3305_v41 }
 0x35f   : > { %v1534_v57 = vpop.f32.mrf.mxu0  ;;  %v1635_v53 = vsel %vm1006_vm12, %v3391_v50, -inf }
 0x360   : > { %v1541_v60 = vmul.f32 0.25, %v1534_v57  ;;  %v1340_v57 = vmul.f32 0.25, %v1335_v9 }
 0x361   : > { %v1869_v0 = vpop.permute.xlu1 %1868 }
 0x362   : > { %v1544_v61 = vadd.f32 %v1541_v60, %v3207_v15  ;;  %v1623_v45 = vpop.f32.mrf.mxu1 }
 0x363   : > { %v1630_v56 = vmul.f32 0.25, %v1623_v45 }
 0x364   : > { %v1549_v63 = vsel %vm1006_vm12, %v1544_v61, -inf }
 0x365   : > { %1550 = vmax.xlane.f32.xlu0 %v1549_v63  ;;  %2558 = vmatmul.msk.f32.gmra.mxu0 %vm955_vm11, %v1780_v62 }
 0x366   : > { %2564 = vmatmul.msk.f32.gmra.mxu1 %vm955_vm11, %v1869_v0  ;;  %v3408_v0 = vadd.f32 %v1630_v56, %v3261_v35 }
 0x367   : > { %v1537_v55 = vpop.f32.mrf.mxu0 }
 0x368   : > { %v1542_v2 = vmul.f32 0.25, %v1537_v55  ;;  %v1638_v4 = vsel %vm1006_vm12, %v3408_v0, -inf }
 0x36a   : > { %v3360_v1 = vadd.f32 %v1542_v2, %v3214_v24  ;;  %v3413_v2 = vadd.f32 %v1340_v57, %v3318_v17 }
 0x36c   : > { %v1552_v3 = vsel %vm1006_vm12, %v3360_v1, -inf }
 0x36d   : > { %1553 = vmax.xlane.f32.xlu0 %v1552_v3  ;;  %v1100_v3 = vsub.f32 %v3264_v43, %v3368_v5 }
 0x37b   : > { %v1346_v32 = vpop.xlane.xlu2 %1345 }
 0x381   : > { %2683 = vrot.lane.b32.xlu0 %v3159_v54, %s2859_s22 }
 0x387   : > { %v1092_v34 = vpop.xlane.xlu0 %1091 }
 0x389   : > { %2693 = vrot.lane.b32.xlu0 %v3139_v44, %s2859_s22  ;;  %s2862_s22 = smov 32  }
 0x38c   : > { %v1098_v60 = vpop.xlane.xlu1 %1097 }
 0x38f   : > { %v3370_v6 = vpop.xlane.xlu0 %1256 }
 0x3cb   : > { %v1548_v13 = vpop.xlane.xlu0 %1547 }
 0x3cc   : > { %v1555_v19 = vsub.f32 %v1543_v51, %v1548_v13  ;;  %v1099_v51 = vsub.f32 %v3313_v14, %v1092_v34  ;;  %v1626_v14 = vpop.f32.mrf.mxu1  ;;  %v1104_v13 = vmul.f32 1.442695, %v1100_v3 }
 0x3cd   : > { %v1631_v34 = vmul.f32 0.25, %v1626_v14 }
 0x3ce   : > { %v1558_v28 = vmul.f32 1.442695, %v1555_v19  ;;  %v1102_v63 = vmul.f32 1.442695, %v1099_v51 }
 0x3cf   : > { %v3424_v43 = vadd.f32 %v1631_v34, %v3318_v17 }
 0x3d0   : > { %2753 = vpow2.f32 %v1558_v28 }
 0x3d1   : > { %v1641_v39 = vsel %vm1006_vm12, %v3424_v43, -inf }
 0x3d2   : > { %v1816_v46 = vpop.f32.mrf.mxu0 }
 0x3d3   : > { %v1825_v16 = vmul.f32 0.25, %v1816_v46  ;;  %v1350_v46 = vsel %vm1006_vm12, %v3413_v2, -inf }
 0x3d4   : > { %v1905_v21 = vpop.f32.mrf.mxu1 }
 0x3d5   : > { %v3375_v18 = vadd.f32 %v1825_v16, %v3200_v7  ;;  %v1353_v7 = vsub.f32 %v3308_v8, %v1346_v32  ;;  %v1260_v16 = vpop.xlane.xlu1 %1259  ;;  %v1101_v32 = vsub.f32 %v3323_v20, %v1098_v60 }
 0x3d6   : > { %v3393_v37 = vpop.eup %2753 }
 0x3d7   : > { %v1831_v26 = vsel %vm1006_vm12, %v3375_v18, -inf  ;;  %v1356_v47 = vmul.f32 1.442695, %v1353_v7  ;;  %v1564_v58 = vsel %vm1006_vm12, %v3393_v37, 0.0  ;;  %v1106_v20 = vmul.f32 1.442695, %v1101_v32 }
 0x3d8   : > { %1832 = vmax.xlane.f32.xlu0 %v1831_v26  ;;  %v1551_v42 = vpop.xlane.xlu0 %1550 }
 0x3d9   : > { %2755 = vpow2.f32 %v1356_v47  ;;  %v1556_v52 = vsub.f32 %v1544_v61, %v1551_v42 }
 0x3da   : > { %v1819_v30 = vpop.f32.mrf.mxu0 }
 0x3db   : > { %v1826_v23 = vmul.f32 0.25, %v1819_v30  ;;  %v1560_v62 = vmul.f32 1.442695, %v1556_v52  ;;  %v2690_v30 = vunpack.i.l.bf16 %v3372_v11 }
 0x3dd   : > { %v3383_v36 = vadd.f32 %v1826_v23, %v3207_v15  ;;  %2757 = vpow2.f32 %v1560_v62  ;;  %v1914_v23 = vmul.f32 0.25, %v1905_v21  ;;  %v3439_v42 = vpop.permute.xlu1 %2698  ;;  %v1264_v62 = vsub.f32 %v3326_v25, %v3370_v6 }
 0x3de   : > { %2759 = vpow2.f32 %v1102_v63 }
 0x3df   : > { %v1834_v38 = vsel %vm1006_vm12, %v3383_v36, -inf  ;;  %v3410_v55 = vpop.eup %2755  ;;  %2761 = vpow2.f32 %v1104_v13  ;;  %v3442_v47 = vadd.f32 %v1914_v23, %v3305_v41  ;;  %v1908_v41 = vpop.f32.mrf.mxu1  ;;  %v1267_v3 = vmul.f32 1.442695, %v1264_v62 }
 0x3e0   : > { %1348 = vmax.xlane.f32.xlu0 %v1347_v40  ;;  %1835 = vmax.xlane.f32.xlu2 %v1834_v38  ;;  %v3405_v61 = vpop.xlane.xlu0 %1553  ;;  %v1362_v9 = vsel %vm1006_vm12, %v3410_v55, 0.0  ;;  %v2691_v40 = vunpack.i.h.bf16 %v3372_v11  ;;  %v2701_v11 = vunpack.i.h.bf16 %v3439_v42  ;;  %2763 = vpow2.f32 %v1106_v20 }
 0x3e1   : > { %2765 = vpow2.f32 %v1267_v3 }
 0x3e2   : > { %v1822_v48 = vpop.f32.mrf.mxu0 }
 0x3e3   : > { %v1827_v15 = vmul.f32 0.25, %v1822_v48  ;;  %v3426_v5 = vpop.eup %2757 }
 0x3e4   : > { %v3428_v28 = vpop.eup %2759  ;;  %v1567_v7 = vsel %vm1006_vm12, %v3426_v5, 0.0 }
 0x3e5   : > { %v3396_v8 = vadd.f32 %v1827_v15, %v3214_v24  ;;  %v1108_v38 = vsel %vm1006_vm12, %v3428_v28, 0.0  ;;  %v3444_v48 = vpop.eup %2761 }
 0x3e6   : > { %v1111_v56 = vsel %vm1006_vm12, %v3444_v48, 0.0  ;;  %v3451_v51 = vpop.eup %2763 }
 0x3e7   : > { %v1837_v59 = vsel %vm1006_vm12, %v3396_v8, -inf  ;;  %v1911_v60 = vpop.f32.mrf.mxu1 }
 0x3e8   : > { %1565 = vadd.xlane.f32.xlu0 %v1564_v58  ;;  %1636 = vmax.xlane.f32.xlu2 %v1635_v53  ;;  %v1920_v53 = vsel %vm1006_vm12, %v3442_v47, -inf  ;;  %v1915_v58 = vmul.f32 0.25, %v1908_v41  ;;  %v1916_v63 = vmul.f32 0.25, %v1911_v60 }
 0x3e9   : > { %1838 = vmax.xlane.f32.xlu1 %v1837_v59  ;;  %v1114_v59 = vsel %vm1006_vm12, %v3451_v51, 0.0 }
 0x3ea   : > { %v3456_v57 = vadd.f32 %v1915_v58, %v3261_v35  ;;  %v3463_v34 = vadd.f32 %v1916_v63, %v3318_v17 }
 0x3ec   : > { %v1923_v14 = vsel %vm1006_vm12, %v3456_v57, -inf  ;;  %v1926_v35 = vsel %vm1006_vm12, %v3463_v34, -inf }
 0x3f0   : > { %1639 = vmax.xlane.f32.xlu2 %v1638_v4  ;;  %1363 = vadd.xlane.f32.xlu0 %v1362_v9  ;;  %v1265_v4 = vsub.f32 %v3333_v29, %v1260_v16  ;;  %v3478_v29 = vpop.f32.mrf.mxu3 }
 0x3f1   : > { %1351 = vmax.xlane.f32.xlu1 %v1350_v46  ;;  %v3468_v46 = vpop.eup %2765 }
 0x3f2   : > { %v1269_v9 = vmul.f32 1.442695, %v1265_v4  ;;  %v1273_v25 = vsel %vm1006_vm12, %v3468_v46, 0.0 }
 0x3f3   : > { %v2684_v19 = vpop.permute.xlu0 %2683 }
 0x3f4   : > { %v2686_v26 = vunpack.i.h.bf16 %v2684_v19  ;;  %v2685_v27 = vunpack.i.l.bf16 %v2684_v19  ;;  %2767 = vpow2.f32 %v1269_v9 }
 0x3f6   : > { %1411 = vmatpush.msra.mxu2 %v2685_v27  ;;  %1458 = vmatpush.msra.mxu3 %v2686_v26 }
 0x3f8   : > { %1642 = vmax.xlane.f32.xlu2 %v1641_v39  ;;  %1568 = vadd.xlane.f32.xlu0 %v1567_v7  ;;  %v3483_v27 = vpop.f32.mrf.mxu3 }
 0x3f9   : > { %1109 = vadd.xlane.f32.xlu1 %v1108_v38  ;;  %1412 = vmatpush.msra.mxu2 %v2690_v30 }
 0x3fa   : > { %1459 = vmatpush.msra.mxu3 %v2691_v40  ;;  %v3472_v6 = vpop.eup %2767 }
 0x3fb   : > { %v2694_v45 = vpop.permute.xlu0 %2693  ;;  %v1276_v17 = vsel %vm1006_vm12, %v3472_v6, 0.0 }
 0x3fc   : > { %v2696_v15 = vunpack.i.h.bf16 %v2694_v45  ;;  %v2695_v52 = vunpack.i.l.bf16 %v2694_v45 }
 0x3fe   : > { %1413 = vmatpush.msra.mxu2 %v2695_v52  ;;  %1460 = vmatpush.msra.mxu3 %v2696_v15 }
 0x400   : > { %1743 = vmatpush.msrb.mxu3 %v2701_v11  ;;  %1921 = vmax.xlane.f32.xlu2 %v1920_v53  ;;  %v3492_v38 = vpop.f32.mrf.mxu3 }
 0x401   : > { %1112 = vadd.xlane.f32.xlu1 %v1111_v56 }
 0x409   : > { %1115 = vadd.xlane.f32.xlu1 %v1114_v59 }
 0x411   : > { %1924 = vmax.xlane.f32.xlu1 %v1923_v14 }
 0x419   : > { %1927 = vmax.xlane.f32.xlu1 %v1926_v35 }
 0x421   : > { %1274 = vadd.xlane.f32.xlu1 %v1273_v25 }
 0x429   : > { %1277 = vadd.xlane.f32.xlu1 %v1276_v17  ;;  %v2700_v17 = vunpack.i.l.bf16 %v3439_v42 }
 0x44b   : > { %v3476_v13 = vpop.xlane.xlu0 %1832 }
 0x453   : > { %v1349_v16 = vpop.xlane.xlu0 %1348  ;;  %v3480_v19 = vpop.xlane.xlu2 %1835 }
 0x454   : > { %v1354_v21 = vsub.f32 %v3380_v33, %v1349_v16 }
 0x456   : > { %v1358_v26 = vmul.f32 1.442695, %v1354_v21 }
 0x458   : > { %2769 = vpow2.f32 %v1358_v26 }
 0x45b   : > { %v1637_v30 = vpop.xlane.xlu2 %1636  ;;  %v3520_v16 = vpop.xlane.xlu0 %1565 }
 0x45c   : > { %v3485_v32 = vpop.xlane.xlu1 %1838  ;;  %v1644_v23 = vsub.f32 %v3391_v50, %v1637_v30  ;;  %v1557_v50 = vsub.f32 %v3360_v1, %v3405_v61 }
 0x45e   : > { %v3488_v39 = vpop.eup %2769  ;;  %v1647_v7 = vmul.f32 1.442695, %v1644_v23  ;;  %v1562_v41 = vmul.f32 1.442695, %v1557_v50 }
 0x45f   : > { %v1365_v40 = vsel %vm1006_vm12, %v3488_v39, 0.0 }
 0x460   : > { %2771 = vpow2.f32 %v1647_v7  ;;  %1366 = vadd.xlane.f32.xlu1 %v1365_v40 }
 0x463   : > { %v1640_v33 = vpop.xlane.xlu2 %1639  ;;  %v1364_v7 = vpop.xlane.xlu0 %1363 }
 0x464   : > { %v1352_v20 = vpop.xlane.xlu1 %1351  ;;  %v1645_v45 = vsub.f32 %v3408_v0, %v1640_v33  ;;  %v1246_v0 = vpop.f32.mrf.mxu3 }
 0x465   : > { %v1355_v15 = vsub.f32 %v3413_v2, %v1352_v20  ;;  %v1251_v61 = vmul.f32 0.25, %v1246_v0 }
 0x466   : > { %v3496_v52 = vpop.eup %2771  ;;  %v1649_v11 = vmul.f32 1.442695, %v1645_v45 }
 0x467   : > { %v1360_v53 = vmul.f32 1.442695, %v1355_v15  ;;  %v1653_v56 = vsel %vm1006_vm12, %v3496_v52, 0.0  ;;  %v3517_v25 = vadd.f32 %v1251_v61, %v3214_v24 }
 0x468   : > { %2773 = vpow2.f32 %v1649_v11  ;;  %1654 = vadd.xlane.f32.xlu1 %v1653_v56 }
 0x469   : > { %2775 = vpow2.f32 %v1360_v53 }
 0x46b   : > { %v3502_v58 = vpop.xlane.xlu2 %1642 }
 0x46c   : > { %v1110_v59 = vpop.xlane.xlu1 %1109 }
 0x46d   : > { %2777 = vrcp.f32 %v1110_v59 }
 0x46e   : > { %v3504_v2 = vpop.eup %2773  ;;  %2779 = vpow2.f32 %v1562_v41  ;;  %v1840_v41 = vsub.f32 %v3375_v18, %v3476_v13 }
 0x46f   : > { %v3506_v60 = vpop.eup %2775  ;;  %v1656_v1 = vsel %vm1006_vm12, %v3504_v2, 0.0 }
 0x470   : > { %v1368_v62 = vsel %vm1006_vm12, %v3506_v60, 0.0  ;;  %1657 = vadd.xlane.f32.xlu0 %v1656_v1 }
 0x471   : > { %1369 = vadd.xlane.f32.xlu2 %v1368_v62 }
 0x473   : > { %v2778_v63 = vpop.eup %2777  ;;  %v1922_v14 = vpop.xlane.xlu2 %1921 }
 0x474   : > { %v3512_v3 = vpop.eup %2779  ;;  %v1120_v4 = vmul.f32 %v2778_v63, %v3428_v28  ;;  %v1113_v35 = vpop.xlane.xlu1 %1112  ;;  %v1929_v9 = vsub.f32 %v3442_v47, %v1922_v14  ;;  %v1261_v28 = vsel %vm1006_vm12, %v3517_v25, -inf }
 0x475   : > { %2781 = vrcp.f32 %v1113_v35  ;;  %v1570_v26 = vsel %vm1006_vm12, %v3512_v3, 0.0 }
 0x476   : > { %v1932_v21 = vmul.f32 1.442695, %v1929_v9  ;;  %2511 = vmatmul.msk.f32.vlgmr.msrb.gmra.mxu2 %vm1006_vm12, %v1120_v4 }
 0x477   : > { %1699 = vmatpush.msrb.mxu2 %v2700_v17 }
 0x478   : > { %2783 = vpow2.f32 %v1932_v21  ;;  %1571 = vadd.xlane.f32.xlu0 %v1570_v26 }
 0x479   : > { %1262 = vmax.xlane.f32.xlu2 %v1261_v28 }
 0x47b   : > { %v2782_v24 = vpop.eup %2781 }
 0x47c   : > { %v1116_v47 = vpop.xlane.xlu1 %1115  ;;  %v1121_v42 = vmul.f32 %v2782_v24, %v3444_v48 }
 0x47d   : > { %2785 = vrcp.f32 %v1116_v47 }
 0x47e   : > { %v3528_v30 = vpop.eup %2783  ;;  %2512 = vmatmul.msk.f32.gmra.mxu2 %vm1006_vm12, %v1121_v42  ;;  %2787 = vrcp.f32 %v1364_v7 }
 0x47f   : > { %v1938_v23 = vsel %vm1006_vm12, %v3528_v30, 0.0 }
 0x480   : > { %1939 = vadd.xlane.f32.xlu0 %v1938_v23 }
 0x483   : > { %v2786_v40 = vpop.eup %2785 }
 0x484   : > { %v1925_v33 = vpop.xlane.xlu1 %1924  ;;  %v1122_v20 = vmul.f32 %v2786_v40, %v3451_v51  ;;  %v2788_v45 = vpop.eup %2787 }
 0x485   : > { %v1374_v48 = vmul.f32 %v2788_v45, %v3410_v55  ;;  %v1930_v59 = vsub.f32 %v3456_v57, %v1925_v33 }
 0x486   : > { %2513 = vmatmul.msk.f32.gmra.mxu2 %vm1006_vm12, %v1122_v20  ;;  %v1841_v20 = vsub.f32 %v3383_v36, %v3480_v19 }
 0x487   : > { %v1934_v0 = vmul.f32 1.442695, %v1930_v59 }
 0x48c   : > { %v3536_v15 = vpop.xlane.xlu1 %1927 }
 0x48e   : > { %2529 = vmatmul.msk.f32.vlgmr.msra.gmra.mxu2 %vm1006_vm12, %v1374_v48 }
 0x491   : > { %2703 = vrot.lane.b32.xlu2 %v3151_v49, %s2858_s21 }
 0x494   : > { %v1275_v50 = vpop.xlane.xlu1 %1274  ;;  %2713 = vrot.lane.b32.xlu0 %v3159_v54, %s2860_s18  ;;  %v1843_v54 = vmul.f32 1.442695, %v1840_v41 }
 0x495   : > { %2789 = vrcp.f32 %v1275_v50 }
 0x49b   : > { %v2790_v11 = vpop.eup %2789 }
 0x49c   : > { %v1285_v51 = vmul.f32 %v2790_v11, %v3468_v46  ;;  %v1278_v53 = vpop.xlane.xlu1 %1277  ;;  %2718 = vrot.lane.b32.xlu0 %v3151_v49, %s2860_s18 }
 0x49d   : > { %2791 = vrcp.f32 %v1278_v53 }
 0x49e   : > { %2532 = vmatmul.msk.f32.vlgmr.msra.gmra.mxu3 %vm1006_vm12, %v1285_v51  ;;  %2793 = vpow2.f32 %v1843_v54 }
 0x49f   : > { %2795 = vpow2.f32 %v1934_v0 }
 0x4a3   : > { %v2792_v55 = vpop.eup %2791 }
 0x4a4   : > { %v1286_v56 = vmul.f32 %v2792_v55, %v3472_v6  ;;  %v3552_v46 = vpop.eup %2793 }
 0x4a5   : > { %v1849_v49 = vsel %vm1006_vm12, %v3552_v46, 0.0  ;;  %v3556_v1 = vpop.eup %2795 }
 0x4a6   : > { %2533 = vmatmul.msk.f32.gmra.mxu3 %vm1006_vm12, %v1286_v56  ;;  %v1941_v6 = vsel %vm1006_vm12, %v3556_v1, 0.0 }
 0x4ba   : > { %1850 = vadd.xlane.f32.xlu2 %v1849_v49 }
 0x4c6   : > { %1942 = vadd.xlane.f32.xlu0 %v1941_v6 }
 0x4d2   : > { %2723 = vrot.lane.b32.xlu2 %v3139_v44, %s2860_s18 }
 0x4d3   : > { %v1367_v18 = vpop.xlane.xlu1 %1366 }
 0x4d4   : > { %2797 = vrcp.f32 %v1367_v18 }
 0x4da   : > { %v2798_v57 = vpop.eup %2797 }
 0x4db   : > { %v1375_v13 = vmul.f32 %v2798_v57, %v3488_v39  ;;  %v1655_v59 = vpop.xlane.xlu1 %1654 }
 0x4dd   : > { %2530 = vmatmul.msk.f32.gmra.mxu2 %vm1006_vm12, %v1375_v13 }
 0x4e4   : > { %v1370_v61 = vpop.xlane.xlu2 %1369 }
 0x4e5   : > { %2799 = vrcp.f32 %v1370_v61 }
 0x4eb   : > { %v2800_v62 = vpop.eup %2799 }
 0x4ec   : > { %v1263_v63 = vpop.xlane.xlu2 %1262  ;;  %v1376_v14 = vmul.f32 %v2800_v62, %v3506_v60 }
 0x4ed   : > { %v1266_v4 = vsub.f32 %v3517_v25, %v1263_v63 }
 0x4ee   : > { %2531 = vmatmul.msk.f32.gmra.mxu2 %vm1006_vm12, %v1376_v14 }
 0x4ef   : > { %v1271_v35 = vmul.f32 1.442695, %v1266_v4 }
 0x4f1   : > { %2801 = vpow2.f32 %v1271_v35 }
 0x4f4   : > { %v2704_v9 = vpop.permute.xlu2 %2703 }
 0x4f5   : > { %v2706_v17 = vunpack.i.h.bf16 %v2704_v9  ;;  %v2705_v21 = vunpack.i.l.bf16 %v2704_v9 }
 0x4f7   : > { %v2802_v26 = vpop.eup %2801  ;;  %1700 = vmatpush.msrb.mxu2 %v2705_v21  ;;  %1744 = vmatpush.msrb.mxu3 %v2706_v17 }
 0x4f8   : > { %v1279_v39 = vsel %vm1006_vm12, %v2802_v26, 0.0 }
 0x4f9   : > { %v1149_v28 = vpop.f32.mrf.mxu2  ;;  %1280 = vadd.xlane.f32.xlu1 %v1279_v39 }
 0x4fa   : > { %v1185_v24 = vadd.f32 %v3478_v29, %v1149_v28  ;;  %v1646_v29 = vsub.f32 %v3424_v43, %v3502_v58  ;;  %v1931_v43 = vsub.f32 %v3463_v34, %v3536_v15  ;;  %v1569_v34 = vpop.xlane.xlu0 %1568 }
 0x4fc   : > { %v1193_v47 = vmul.f32 0.5, %v1185_v24  ;;  %v1651_v33 = vmul.f32 1.442695, %v1646_v29  ;;  %v1936_v19 = vmul.f32 1.442695, %v1931_v43 }
 0x4fe   : > { %1196 = vst.msk [vmem:[#allocation2] sm:$0xff] %vm955_vm11, %v1193_v47  ;;  %2803 = vpow2.f32 %v1651_v33 }
 0x501   : > { %v1152_v60 = vpop.f32.mrf.mxu2 }
 0x502   : > { %v1188_v25 = vadd.f32 %v3483_v27, %v1152_v60  ;;  %v1845_v27 = vmul.f32 1.442695, %v1841_v20  ;;  %v1658_v53 = vpop.xlane.xlu0 %1657 }
 0x504   : > { %v1194_v42 = vmul.f32 0.5, %v1188_v25  ;;  %v3580_v45 = vpop.eup %2803  ;;  %2805 = vpow2.f32 %v1845_v27 }
 0x505   : > { %v1659_v48 = vsel %vm1006_vm12, %v3580_v45, 0.0 }
 0x506   : > { %1197 = vst.msk [vmem:[#allocation2 + $0x8] sm:$0xff] %vm955_vm11, %v1194_v42 }
 0x509   : > { %v1155_v23 = vpop.f32.mrf.mxu2 }
 0x50a   : > { %v1191_v7 = vadd.f32 %v3492_v38, %v1155_v23  ;;  %v1842_v38 = vsub.f32 %v3396_v8, %v3485_v32  ;;  %v3586_v50 = vpop.eup %2805  ;;  %v1572_v49 = vpop.xlane.xlu0 %1571 }
 0x50b   : > { %v1852_v36 = vsel %vm1006_vm12, %v3586_v50, 0.0 }
 0x50c   : > { %v1195_v40 = vmul.f32 0.5, %v1191_v7 }
 0x50e   : > { %1198 = vst.msk [vmem:[#allocation2 + $0x10] sm:$0xff] %vm955_vm11, %v1195_v40 }
 0x511   : > { %v1415_v15 = vpop.f32.mrf.mxu2 }
 0x512   : > { %2708 = vrot.lane.b32.xlu1 %v3139_v44, %s2858_s21  ;;  %v1847_v44 = vmul.f32 1.442695, %v1842_v38  ;;  %s2861_s21 = smov 16   ;;  %v1940_v13 = vpop.xlane.xlu0 %1939 }
 0x514   : > { %2807 = vpow2.f32 %v1847_v44 }
 0x515   : > { %2809 = vpow2.f32 %v1936_v19 }
 0x51a   : > { %v3592_v58 = vpop.eup %2807  ;;  %v2714_v62 = vpop.permute.xlu0 %2713 }
 0x51b   : > { %v1855_v8 = vsel %vm1006_vm12, %v3592_v58, 0.0  ;;  %v3596_v32 = vpop.eup %2809  ;;  %v2715_v24 = vunpack.i.l.bf16 %v2714_v62 }
 0x51c   : > { %v1944_v11 = vsel %vm1006_vm12, %v3596_v32, 0.0 }
 0x521   : > { %v1462_v51 = vpop.f32.mrf.mxu3 }
 0x522   : > { %v1463_v0 = vadd.f32 %v1462_v51, %v1415_v15  ;;  %v2719_v28 = vpop.permute.xlu0 %2718 }
 0x523   : > { %v2721_v47 = vunpack.i.h.bf16 %v2719_v28  ;;  %v2720_v60 = vunpack.i.l.bf16 %v2719_v28 }
 0x524   : > { %v1471_v6 = vmul.f32 0.5, %v1463_v0 }
 0x529   : > { %v1465_v55 = vpop.f32.mrf.mxu3 }
 0x52d   : > { %v1851_v63 = vpop.xlane.xlu2 %1850 }
 0x53c   : > { %1660 = vadd.xlane.f32.xlu1 %v1659_v48  ;;  %v1943_v48 = vpop.xlane.xlu0 %1942 }
 0x544   : > { %1853 = vadd.xlane.f32.xlu1 %v1852_v36 }
 0x54c   : > { %1856 = vadd.xlane.f32.xlu1 %v1855_v8 }
 0x554   : > { %1945 = vadd.xlane.f32.xlu1 %v1944_v11 }
 0x560   : > { %v1418_v56 = vpop.f32.mrf.mxu2 }
 0x561   : > { %v1466_v41 = vadd.f32 %v1465_v55, %v1418_v56 }
 0x563   : > { %v1472_v54 = vmul.f32 0.5, %v1466_v41 }
 0x565   : > { %1479 = vrot.lane.b32.xlu2 %v1472_v54, %s2861_s21 }
 0x56c   : > { %v1281_v18 = vpop.xlane.xlu1 %1280 }
 0x56d   : > { %2811 = vrcp.f32 %v1281_v18  ;;  %1477 = vrot.lane.b32.xlu1 %v1471_v6, %s2861_s21 }
 0x56e   : > { %2813 = vrcp.f32 %v3520_v16  ;;  %v2724_v16 = vpop.permute.xlu2 %2723 }
 0x56f   : > { %2815 = vrcp.f32 %v1655_v59  ;;  %v2726_v23 = vunpack.i.h.bf16 %v2724_v16 }
 0x570   : > { %2817 = vrcp.f32 %v1569_v34 }
 0x571   : > { %2819 = vrcp.f32 %v1658_v53  ;;  %v1421_v53 = vpop.f32.mrf.mxu2 }
 0x572   : > { %2821 = vrcp.f32 %v1572_v49 }
 0x573   : > { %v2812_v57 = vpop.eup %2811  ;;  %2823 = vrcp.f32 %v1851_v63 }
 0x574   : > { %v1287_v61 = vmul.f32 %v2812_v57, %v2802_v26  ;;  %v2814_v14 = vpop.eup %2813  ;;  %v2716_v26 = vunpack.i.h.bf16 %v2714_v62 }
 0x575   : > { %v2816_v4 = vpop.eup %2815  ;;  %v1576_v21 = vmul.f32 %v2814_v14, %v3393_v37  ;;  %v2725_v37 = vunpack.i.l.bf16 %v2724_v16 }
 0x576   : > { %2534 = vmatmul.msk.f32.gmra.mxu3 %vm1006_vm12, %v1287_v61  ;;  %v1665_v39 = vmul.f32 %v2816_v4, %v3496_v52  ;;  %v2818_v25 = vpop.eup %2817 }
 0x577   : > { %v2820_v42 = vpop.eup %2819  ;;  %v1577_v7 = vmul.f32 %v2818_v25, %v3426_v5 }
 0x578   : > { %v1666_v52 = vmul.f32 %v2820_v42, %v3504_v2  ;;  %v2822_v40 = vpop.eup %2821 }
 0x579   : > { %v1578_v29 = vmul.f32 %v2822_v40, %v3512_v3  ;;  %v2824_v33 = vpop.eup %2823 }
 0x57a   : > { %v1861_v20 = vmul.f32 %v2824_v33, %v3552_v46 }
 0x584   : > { %v2709_v35 = vpop.permute.xlu1 %2708 }
 0x585   : > { %v2711_v9 = vunpack.i.h.bf16 %v2709_v35  ;;  %v2710_v17 = vunpack.i.l.bf16 %v2709_v35 }
 0x587   : > { %1701 = vmatpush.msrb.mxu2 %v2710_v17  ;;  %1745 = vmatpush.msrb.mxu3 %v2711_v9 }
 0x588   : > { %2547 = vmatmul.msk.f32.vlgmr.msrb.gmra.mxu2 %vm1006_vm12, %v1665_v39  ;;  %2550 = vmatmul.msk.f32.vlgmr.msrb.gmra.mxu3 %vm1006_vm12, %v1576_v21 }
 0x589   : > { %1984 = vmatpush.msra.mxu2 %v2715_v24  ;;  %2028 = vmatpush.msra.mxu3 %v2716_v26 }
 0x58b   : > { %1985 = vmatpush.msra.mxu2 %v2720_v60  ;;  %2029 = vmatpush.msra.mxu3 %v2721_v47 }
 0x58d   : > { %1986 = vmatpush.msra.mxu2 %v2725_v37  ;;  %2030 = vmatpush.msra.mxu3 %v2726_v23 }
 0x590   : > { %2548 = vmatmul.msk.f32.gmra.mxu2 %vm1006_vm12, %v1666_v52  ;;  %2551 = vmatmul.msk.f32.gmra.mxu3 %vm1006_vm12, %v1577_v7 }
 0x598   : > { %2552 = vmatmul.msk.f32.gmra.mxu3 %vm1006_vm12, %v1578_v29 }
 0x5a0   : > { %2568 = vmatmul.msk.f32.vlgmr.msra.gmra.mxu3 %vm1006_vm12, %v1861_v20 }
 0x5af   : > { %v1661_v27 = vpop.xlane.xlu1 %1660 }
 0x5b0   : > { %2825 = vrcp.f32 %v1661_v27 }
 0x5b1   : > { %2827 = vrcp.f32 %v1940_v13 }
 0x5b6   : > { %v2826_v2 = vpop.eup %2825 }
 0x5b7   : > { %v1854_v5 = vpop.xlane.xlu1 %1853  ;;  %v1667_v38 = vmul.f32 %v2826_v2, %v3580_v45  ;;  %v2828_v44 = vpop.eup %2827 }
 0x5b8   : > { %2829 = vrcp.f32 %v1854_v5  ;;  %v1950_v43 = vmul.f32 %v2828_v44, %v3528_v30 }
 0x5b9   : > { %2549 = vmatmul.msk.f32.gmra.mxu2 %vm1006_vm12, %v1667_v38  ;;  %2831 = vrcp.f32 %v1943_v48 }
 0x5be   : > { %v2830_v3 = vpop.eup %2829 }
 0x5bf   : > { %v1857_v46 = vpop.xlane.xlu1 %1856  ;;  %v1480_v36 = vpop.permute.xlu2 %1479  ;;  %v1862_v19 = vmul.f32 %v2830_v3, %v3586_v50 }
 0x5c0   : > { %2833 = vrcp.f32 %v1857_v46  ;;  %1488 = vst.msk [vmem:[#allocation2 + $0x8] sm:$0xff] %vm1486_vm13, %v1480_v36  ;;  %v2832_v45 = vpop.eup %2831 }
 0x5c1   : > { %2565 = vmatmul.msk.f32.vlgmr.msra.gmra.mxu2 %vm1006_vm12, %v1950_v43  ;;  %2569 = vmatmul.msk.f32.gmra.mxu3 %vm1006_vm12, %v1862_v19  ;;  %v1951_v51 = vmul.f32 %v2832_v45, %v3556_v1 }
 0x5c6   : > { %v2834_v8 = vpop.eup %2833 }
 0x5c7   : > { %v1946_v11 = vpop.xlane.xlu1 %1945  ;;  %v1863_v34 = vmul.f32 %v2834_v8, %v3592_v58 }
 0x5c8   : > { %2835 = vrcp.f32 %v1946_v11 }
 0x5c9   : > { %2566 = vmatmul.msk.f32.gmra.mxu2 %vm1006_vm12, %v1951_v51  ;;  %2570 = vmatmul.msk.f32.gmra.mxu3 %vm1006_vm12, %v1863_v34 }
 0x5ce   : > { %v2836_v30 = vpop.eup %2835 }
 0x5cf   : > { %v1952_v50 = vmul.f32 %v2836_v30, %v3596_v32 }
 0x5d1   : > { %2567 = vmatmul.msk.f32.gmra.mxu2 %vm1006_vm12, %v1952_v50 }
 0x5df   : > { %v1478_v15 = vpop.permute.xlu1 %1477 }
 0x5e0   : > { %1487 = vst.msk [vmem:[#allocation2] sm:$0xff] %vm1486_vm13, %v1478_v15  ;;  %v2650_v15 = vld [vmem:[%s3747_s13 + $0x18] sm:$0xff] }
 0x5e1   : > { %2194 = vmatpush.bf16.msrb.mxu0 %v2650_v15 }
 0x5f9   : > { %v1468_v55 = vpop.f32.mrf.mxu3 }
 0x5fa   : > { %v1469_v56 = vadd.f32 %v1468_v55, %v1421_v53  ;;  %v2649_v53 = vld [vmem:[%s3747_s13 + $0x10] sm:$0xff]  ;;  %v2648_v55 = vld [vmem:[%s3747_s13 + $0x8] sm:$0xff] }
 0x5fb   : > { %2195 = vmatpush.bf16.msrb.mxu0 %v2649_v53 }
 0x5fc   : > { %v1473_v35 = vmul.f32 0.5, %v1469_v56 }
 0x5ff   : > { %2196 = vmatpush.bf16.msrb.mxu0 %v2648_v55 }
 0x60b   : > { %v1703_v41 = vpop.f32.mrf.mxu2  ;;  %v1747_v1 = vpop.f32.mrf.mxu3 }
 0x60c   : > { %v1748_v54 = vadd.f32 %v1747_v1, %v1703_v41  ;;  %v2647_v41 = vld [vmem:[%s3747_s13] sm:$0xff] }
 0x60d   : > { %2197 = vmatpush.bf16.msrb.mxu0 %v2647_v41 }
 0x60e   : > { %v1756_v58 = vmul.f32 0.5, %v1748_v54 }
 0x610   : > { %1762 = vrot.lane.b32.xlu2 %v1756_v58, %s2862_s22 }
 0x613   : > { %v1706_v59 = vpop.f32.mrf.mxu2  ;;  %v1750_v0 = vpop.f32.mrf.mxu3 }
 0x614   : > { %v1751_v49 = vadd.f32 %v1750_v0, %v1706_v59 }
 0x616   : > { %v1757_v6 = vmul.f32 0.5, %v1751_v49 }
 0x618   : > { %1764 = vrot.lane.b32.xlu0 %v1757_v6, %s2862_s22 }
 0x61b   : > { %v1753_v32 = vpop.f32.mrf.mxu3 }
 0x623   : > { %v2032_v57 = vpop.f32.mrf.mxu3 }
 0x63c   : > { %v1709_v18 = vpop.f32.mrf.mxu2 }
 0x63d   : > { %v1754_v17 = vadd.f32 %v1753_v32, %v1709_v18 }
 0x63f   : > { %v1758_v26 = vmul.f32 0.5, %v1754_v17 }
 0x644   : > { %v1988_v13 = vpop.f32.mrf.mxu2  ;;  %v2035_v63 = vpop.f32.mrf.mxu3 }
 0x645   : > { %v2033_v61 = vadd.f32 %v2032_v57, %v1988_v13 }
 0x647   : > { %v2041_v62 = vmul.f32 0.5, %v2033_v61 }
 0x649   : > { %2047 = vrot.lane.b32.xlu2 %v2041_v62, %s2863_s29 }
 0x64c   : > { %v1991_v14 = vpop.f32.mrf.mxu2  ;;  %v2038_v21 = vpop.f32.mrf.mxu3 }
 0x64d   : > { %v2036_v4 = vadd.f32 %v2035_v63, %v1991_v14 }
 0x64f   : > { %v2042_v9 = vmul.f32 0.5, %v2036_v4 }
 0x651   : > { %2049 = vrot.lane.b32.xlu1 %v2042_v9, %s2863_s29  ;;  %1481 = vrot.lane.b32.xlu2 %v1473_v35, %s2861_s21  ;;  %v2729_v9 = vld [vmem:[%s3745_s11] ss:$0 sm:$0xff] }
 0x654   : > { %v1994_v39 = vpop.f32.mrf.mxu2 }
 0x655   : > { %v2039_v28 = vadd.f32 %v2038_v21, %v1994_v39 }
 0x657   : > { %v2043_v24 = vmul.f32 0.5, %v2039_v28 }
 0x659   : > { %1766 = vrot.lane.b32.xlu1 %v1758_v26, %s2862_s22  ;;  %2051 = vrot.lane.b32.xlu2 %v2043_v24, %s2863_s29  ;;  %v2730_v26 = vld [vmem:[%s3746_s12] ss:$0 sm:$0xff]  ;;  %s548_s22 = scalar_lea.vmem %s3751_s17, %s2666_s26 }
 0x66a   : > { %v1763_v16 = vpop.permute.xlu2 %1762 }
 0x66b   : > { %1772 = vst.msk [vmem:[#allocation2] sm:$0xff] %vm1771_vm14, %v1763_v16 }
 0x68a   : > { %v1765_v47 = vpop.permute.xlu0 %1764 }
 0x68b   : > { %1773 = vst.msk [vmem:[#allocation2 + $0x8] sm:$0xff] %vm1771_vm14, %v1765_v47 }
 0x6a3   : > { %v2048_v60 = vpop.permute.xlu2 %2047 }
 0x6a4   : > { %2057 = vst.msk [vmem:[#allocation2] sm:$0xff] %vm2056_vm15, %v2048_v60 }
 0x6ab   : > { %v1482_v25 = vpop.permute.xlu2 %1481  ;;  %v2060_v42 = vld [vmem:[#allocation2] sm:$0xff] }
 0x6ac   : > { %1489 = vst.msk [vmem:[#allocation2 + $0x10] sm:$0xff] %vm1486_vm13, %v1482_v25  ;;  %v3636_v23 = vadd.f32 %v2060_v42, %v3082_v31 }
 0x6ae   : > { %v2068_v37 = vsel %vm555_vm0, %v3636_v23, 0.0 }
 0x6af   : > { %2069 = vadd.xlane.f32.xlu0 %v2068_v37 }
 0x6b3   : > { %v2052_v29 = vpop.permute.xlu2 %2051 }
 0x6c3   : > { %v2050_v52 = vpop.permute.xlu1 %2049 }
 0x6c4   : > { %2058 = vst.msk [vmem:[#allocation2 + $0x8] sm:$0xff] %vm2056_vm15, %v2050_v52 }
 0x6cb   : > { %v1767_v7 = vpop.permute.xlu1 %1766  ;;  %v2061_v40 = vld [vmem:[#allocation2 + $0x8] sm:$0xff] }
 0x6cc   : > { %1774 = vst.msk [vmem:[#allocation2 + $0x10] sm:$0xff] %vm1771_vm14, %v1767_v7  ;;  %v3643_v33 = vadd.f32 %v2061_v40, %v3084_v22 }
 0x6cd   : > { %2059 = vst.msk [vmem:[#allocation2 + $0x10] sm:$0xff] %vm2056_vm15, %v2052_v29 }
 0x6ce   : > { %v2071_v31 = vsel %vm555_vm0, %v3643_v33, 0.0 }
 0x6cf   : > { %2072 = vadd.xlane.f32.xlu1 %v2071_v31 }
 0x6d4   : > { %v2062_v20 = vld [vmem:[#allocation2 + $0x10] sm:$0xff] }
 0x6d5   : > { %v3649_v27 = vadd.f32 %v2062_v20, %v3063_v10 }
 0x6d7   : > { %v2074_v2 = vsel %vm555_vm0, %v3649_v27, 0.0 }
 0x6d8   : > { %2075 = vadd.xlane.f32.xlu2 %v2074_v2 }
 0x722   : > { %v2070_v5 = vpop.xlane.xlu0 %2069 }
 0x723   : > { %v2077_v38 = vmul.f32 %v2070_v5, %v2973_v12 }
 0x725   : > { %v2080_v22 = vsub.f32 %v3636_v23, %v2077_v38  ;;  %v2658_v38 = vld [vmem:[%s3749_s15 + $0x38] sm:$0xff] }
 0x726   : > { %2305 = vmatpush.bf16.msrb.mxu1 %v2658_v38 }
 0x727   : > { %v2083_v48 = vmul.f32 %v2080_v22, %v2080_v22 }
 0x729   : > { %v2086_v44 = vsel %vm555_vm0, %v2083_v48, 0.0  ;;  %v2656_v48 = vld [vmem:[%s3749_s15 + $0x28] sm:$0xff] }
 0x72a   : > { %2087 = vadd.xlane.f32.xlu0 %v2086_v44  ;;  %v2655_v44 = vld [vmem:[%s3749_s15 + $0x20] sm:$0xff] }
 0x742   : > { %v2073_v3 = vpop.xlane.xlu1 %2072 }
 0x743   : > { %v2078_v43 = vmul.f32 %v2073_v3, %v2973_v12  ;;  %v2654_v3 = vld [vmem:[%s3749_s15 + $0x18] sm:$0xff] }
 0x745   : > { %v2081_v46 = vsub.f32 %v3643_v33, %v2078_v43  ;;  %v2653_v43 = vld [vmem:[%s3749_s15 + $0x10] sm:$0xff] }
 0x747   : > { %v2084_v10 = vmul.f32 %v2081_v46, %v2081_v46 }
 0x749   : > { %v2089_v36 = vsel %vm555_vm0, %v2084_v10, 0.0  ;;  %v2731_v10 = vld [vmem:[%s3748_s14] ss:$0 sm:$0xff] }
 0x74a   : > { %2090 = vadd.xlane.f32.xlu1 %v2089_v36 }
 0x74b   : > { %v2076_v19 = vpop.xlane.xlu2 %2075 }
 0x74c   : > { %v2079_v45 = vmul.f32 %v2076_v19, %v2973_v12  ;;  %v2651_v19 = vld [vmem:[%s3749_s15] sm:$0xff] }
 0x74e   : > { %v3661_v8 = vsub.f32 %v3649_v27, %v2079_v45 }
 0x750   : > { %v2085_v11 = vmul.f32 %v3661_v8, %v3661_v8 }
 0x752   : > { %v2092_v51 = vsel %vm555_vm0, %v2085_v11, 0.0 }
 0x753   : > { %2093 = vadd.xlane.f32.xlu2 %v2092_v51 }
 0x79d   : > { %v2088_v34 = vpop.xlane.xlu0 %2087 }
 0x79e   : > { %v2095_v30 = vmul.f32 %v2088_v34, %v2973_v12 }
 0x7a0   : > { %v2098_v50 = vadd.f32 1e-06, %v2095_v30 }
 0x7a2   : > { %2837 = vrsqrt.f32 %v2098_v50  ;;  %vm2107_vm2 = vweird.f32 %v2098_v50 }
 0x7a8   : > { %v2838_v56 = vpop.eup %2837 }
 0x7a9   : > { %v2102_v1 = vmul.f32 %v2838_v56, %v2098_v50  ;;  %vm2108_vm1 = vweird.f32 %v2838_v56 }
 0x7aa   : > { %vm2109_vm3 = vmor %vm2107_vm2, %vm2108_vm1 }
 0x7ab   : > { %v2103_v54 = vmul.f32 %v2838_v56, %v2102_v1 }
 0x7ad   : > { %v2104_v49 = vmul.f32 0.5, %v2103_v54 }
 0x7af   : > { %v2105_v6 = vsub.f32 1.5, %v2104_v49 }
 0x7b1   : > { %v2106_v13 = vmul.f32 %v2838_v56, %v2105_v6 }
 0x7b3   : > { %v2110_v14 = vsel %vm2109_vm3, %v2838_v56, %v2106_v13 }
 0x7b4   : > { %v2131_v17 = vmul.f32 %v2110_v14, %v2080_v22  ;;  %v2657_v22 = vld [vmem:[%s3749_s15 + $0x30] sm:$0xff] }
 0x7b5   : > { %2306 = vmatpush.bf16.msrb.mxu1 %v2657_v22 }
 0x7b6   : > { %v2137_v24 = vmul.f32 %v2729_v9, %v2131_v17 }
 0x7b8   : > { %v2143_v42 = vadd.f32 %v2730_v26, %v2137_v24 }
 0x7b9   : > { %2307 = vmatpush.bf16.msrb.mxu1 %v2656_v48 }
 0x7bd   : > { %v2091_v58 = vpop.xlane.xlu1 %2090  ;;  %2308 = vmatpush.bf16.msrb.mxu1 %v2655_v44 }
 0x7be   : > { %v2096_v59 = vmul.f32 %v2091_v58, %v2973_v12 }
 0x7c0   : > { %v2099_v0 = vadd.f32 1e-06, %v2096_v59 }
 0x7c1   : > { %2309 = vmatpush.bf16.msrb.mxu1 %v2654_v3 }
 0x7c2   : > { %2839 = vrsqrt.f32 %v2099_v0  ;;  %vm2117_vm5 = vweird.f32 %v2099_v0 }
 0x7c5   : > { %2310 = vmatpush.bf16.msrb.mxu1 %v2653_v43 }
 0x7c6   : > { %v2094_v32 = vpop.xlane.xlu2 %2093 }
 0x7c7   : > { %v2097_v18 = vmul.f32 %v2094_v32, %v2973_v12 }
 0x7c8   : > { %v2840_v57 = vpop.eup %2839 }
 0x7c9   : > { %v2112_v61 = vmul.f32 %v2840_v57, %v2099_v0  ;;  %v2100_v62 = vadd.f32 1e-06, %v2097_v18  ;;  %vm2118_vm4 = vweird.f32 %v2840_v57 }
 0x7ca   : > { %vm2119_vm6 = vmor %vm2117_vm5, %vm2118_vm4 }
 0x7cb   : > { %v2113_v63 = vmul.f32 %v2840_v57, %v2112_v61  ;;  %2841 = vrsqrt.f32 %v2100_v62  ;;  %vm2127_vm8 = vweird.f32 %v2100_v62 }
 0x7cd   : > { %v2114_v4 = vmul.f32 0.5, %v2113_v63 }
 0x7cf   : > { %v2115_v35 = vsub.f32 1.5, %v2114_v4 }
 0x7d1   : > { %v2842_v21 = vpop.eup %2841  ;;  %v2116_v12 = vmul.f32 %v2840_v57, %v2115_v35 }
 0x7d2   : > { %v2122_v39 = vmul.f32 %v2842_v21, %v2100_v62  ;;  %vm2128_vm7 = vweird.f32 %v2842_v21 }
 0x7d3   : > { %v2120_v28 = vsel %vm2119_vm6, %v2840_v57, %v2116_v12  ;;  %vm2129_vm9 = vmor %vm2127_vm8, %vm2128_vm7 }
 0x7d4   : > { %v2132_v16 = vmul.f32 %v2120_v28, %v2081_v46  ;;  %v2123_v47 = vmul.f32 %v2842_v21, %v2122_v39  ;;  %v2652_v46 = vld [vmem:[%s3749_s15 + $0x8] sm:$0xff] }
 0x7d5   : > { %2311 = vmatpush.bf16.msrb.mxu1 %v2652_v46 }
 0x7d6   : > { %v2138_v60 = vmul.f32 %v2729_v9, %v2132_v16  ;;  %v2124_v25 = vmul.f32 0.5, %v2123_v47 }
 0x7d8   : > { %v2144_v37 = vadd.f32 %v2730_v26, %v2138_v60  ;;  %v2125_v52 = vsub.f32 1.5, %v2124_v25 }
 0x7d9   : > { %2312 = vmatpush.bf16.msrb.mxu1 %v2651_v19 }
 0x7da   : > { %v2126_v7 = vmul.f32 %v2842_v21, %v2125_v52  ;;  %v2146_v40 = vpack.c.bf16 %v2144_v37, %v2143_v42 }
 0x7dc   : > { %v2130_v29 = vsel %vm2129_vm9, %v2842_v21, %v2126_v7  ;;  %2587 = vmatmul.msk.bf16.vlgmr.msrb.gmra.mxu0 %vm555_vm0, %v2146_v40 }
 0x7dd   : > { %v2133_v31 = vmul.f32 %v2130_v29, %v3661_v8 }
 0x7df   : > { %v2139_v20 = vmul.f32 %v2729_v9, %v2133_v31 }
 0x7e1   : > { %v2145_v2 = vadd.f32 %v2730_v26, %v2139_v20  ;;  %v2732_v26 = vld [vmem:[%s3750_s16] ss:$0 sm:$0xff] }
 0x7e3   : > { %v2147_v5 = vpack.c.bf16 %v2145_v2, %v2145_v2 }
 0x7ec   : > { %2588 = vmatmul.msk.bf16.gmra.mxu0 %vm555_vm0, %v2147_v5 }
 0x859   : > { %v2199_v36 = vpop.f32.mrf.mxu0 }
 0x85a   : > { %v2200_v45 = vadd.f32 %v2731_v10, %v2199_v36 }
 0x85c   : > { %v2208_v8 = vmul.f32 %v2200_v45, %v2200_v45 }
 0x85e   : > { %v2211_v11 = vmul.f32 %v2208_v8, %v2200_v45 }
 0x860   : > { %v2214_v51 = vmul.f32 0.044715, %v2211_v11 }
 0x861   : > { %v2201_v34 = vpop.f32.mrf.mxu0 }
 0x862   : > { %v2217_v30 = vadd.f32 %v2214_v51, %v2200_v45  ;;  %v2202_v50 = vadd.f32 %v2731_v10, %v2201_v34 }
 0x864   : > { %v2220_v15 = vmul.f32 0.7978846, %v2217_v30  ;;  %v2209_v53 = vmul.f32 %v2202_v50, %v2202_v50 }
 0x866   : > { %v2212_v55 = vmul.f32 %v2209_v53, %v2202_v50  ;;  %2843 = vtanh.f32 %v2220_v15 }
 0x868   : > { %v2215_v56 = vmul.f32 0.044715, %v2212_v55 }
 0x869   : > { %v2204_v41 = vpop.f32.mrf.mxu0 }
 0x86a   : > { %v2218_v1 = vadd.f32 %v2215_v56, %v2202_v50  ;;  %v2205_v54 = vadd.f32 %v2731_v10, %v2204_v41 }
 0x86c   : > { %v2221_v58 = vmul.f32 0.7978846, %v2218_v1  ;;  %v2210_v59 = vmul.f32 %v2205_v54, %v2205_v54  ;;  %v2844_v0 = vpop.eup %2843 }
 0x86d   : > { %v2226_v32 = vadd.f32 1.0, %v2844_v0 }
 0x86e   : > { %2845 = vtanh.f32 %v2221_v58  ;;  %v2213_v49 = vmul.f32 %v2210_v59, %v2205_v54 }
 0x86f   : > { %v2229_v62 = vmul.f32 0.5, %v2226_v32 }
 0x870   : > { %v2216_v6 = vmul.f32 0.044715, %v2213_v49 }
 0x871   : > { %v2206_v18 = vpop.f32.mrf.mxu0  ;;  %v2232_v4 = vmul.f32 %v2229_v62, %v2200_v45 }
 0x872   : > { %v2219_v57 = vadd.f32 %v2216_v6, %v2205_v54 }
 0x874   : > { %v2846_v13 = vpop.eup %2845  ;;  %v2222_v61 = vmul.f32 0.7978846, %v2219_v57 }
 0x875   : > { %v2227_v63 = vadd.f32 1.0, %v2846_v13 }
 0x876   : > { %2847 = vtanh.f32 %v2222_v61 }
 0x877   : > { %v2230_v14 = vmul.f32 0.5, %v2227_v63 }
 0x879   : > { %v2233_v35 = vmul.f32 %v2230_v14, %v2202_v50 }
 0x87b   : > { %v2235_v9 = vpack.c.bf16 %v2233_v35, %v2232_v4 }
 0x87c   : > { %v2848_v17 = vpop.eup %2847 }
 0x87d   : > { %2313 = vmatmul.bf16.vlgmr.msrb.gmra.mxu1 %v2235_v9  ;;  %v2228_v21 = vadd.f32 1.0, %v2848_v17 }
 0x87f   : > { %v2231_v12 = vmul.f32 0.5, %v2228_v21 }
 0x881   : > { %v2234_v39 = vmul.f32 %v2231_v12, %v2205_v54 }
 0x883   : > { %v2236_v28 = vpack.c.bf16 %v2234_v39, %v2234_v39 }
 0x88d   : > { %2318 = vmatmul.bf16.gmra.mxu1 %v2236_v28 }
 0x8fa   : > { %v2314_v24 = vpop.f32.mrf.mxu1 }
 0x8fb   : > { %v2315_v16 = vadd.f32 %v2732_v26, %v2314_v24 }
 0x8fd   : > { %v2323_v47 = vadd.f32 %v2315_v16, %v3636_v23 }
 0x8ff   : > { %2326 = vst.msk [vmem:[%s548_s22] sm:$0xff] %vm555_vm0, %v2323_v47 }
 0x902   : > { %v2316_v60 = vpop.f32.mrf.mxu1 }
 0x903   : > { %v2317_v25 = vadd.f32 %v2732_v26, %v2316_v60 }
 0x905   : > { %v2324_v42 = vadd.f32 %v2317_v25, %v3643_v33 }
 0x907   : > { %2327 = vst.msk [vmem:[%s548_s22 + $0x8] sm:$0xff] %vm555_vm0, %v2324_v42 }
 0x90a   : > { %v2319_v37 = vpop.f32.mrf.mxu1 }
 0x90b   : > { %v2320_v52 = vadd.f32 %v2732_v26, %v2319_v37 }
 0x90d   : > { %v2325_v7 = vadd.f32 %v2320_v52, %v3649_v27 }
 0x90f   : > { %2328 = vst.msk [vmem:[%s548_s22 + $0x10] sm:$0xff] %vm555_vm0, %v2325_v7 }
 0x912   : > { %v2321_v40 = vpop.f32.mrf.mxu1 }
 0x913 PF: > { %s27_s24 = sadd.s32 1, %s2855_s24  }
 0x914   : > { %p24_p4 = scmp.ge.s32.totalorder %s27_s24, 4  }
 0x916   :  { %26 = sbr.rel (!%p24_p4) target bundleno = 3 (0x3), region = 118 }

</bundles_post_ra>
